<compile_context>
chip_gen: v6e
topology: v6e:2x2x1
jax: 0.10.0
libtpu: 0.0.40
codegen_flags: <defaults>
</compile_context>

<pallas_src>
import jax
import jax.numpy as jnp
from jax.experimental import pallas as pl

# ---------------- model config (small synthetic stand-in for dinov2_vits14) --
PATCH = 8
C_IN = 3
IMG = 32
D = 64                       # embed dim
HEADS = 2
HEAD_DIM = D // HEADS
DEPTH = 2
MLP = 4 * D
NUM_CLASSES = 16
LN_EPS = 1e-6

N_PATCH = (IMG // PATCH) * (IMG // PATCH)   # 16 patch tokens
S_REAL = N_PATCH + 1                         # 17 = CLS + patches
S_PAD = 24                                   # padded to a multiple of 8 sublanes


# ------------------------------ in-kernel helpers -----------------------------


def _ln(x, g, b):
    """Row-wise LayerNorm in f32. x: (rows, D); g, b: (1, D)."""
    x = x.astype(jnp.float32)
    mu = jnp.mean(x, axis=-1, keepdims=True)
    var = jnp.mean(jnp.square(x - mu), axis=-1, keepdims=True)
    return (x - mu) * jax.lax.rsqrt(var + LN_EPS) * g + b


# ------------------------------ Pallas kernels --------------------------------


def _embed_kernel(p_ref, w_ref, b_ref, cls_ref, pos_ref, o_ref):
    """Patch embedding + CLS token + positional embedding + row padding.

    p_ref: (B*N, C*p*p) f32, w_ref: (C*p*p, D) bf16, b/cls: (1, D) f32,
    pos_ref: (S_PAD, D) f32 (rows >= S_REAL are zero), o_ref: (B*S_PAD, D) f32.
    """
    nb = o_ref.shape[0] // S_PAD
    emb = jnp.dot(p_ref[...].astype(jnp.bfloat16), w_ref[...],
                  preferred_element_type=jnp.float32) + b_ref[...]      # (B*N, D)
    cls_row = cls_ref[...] + pos_ref[0:1, :]                            # (1, D)
    pos_patch = pos_ref[1:1 + N_PATCH, :]                               # (N, D)

    o_ref[...] = jnp.zeros_like(o_ref)                                  # pad rows
    for b in range(nb):
        o_ref[b * S_PAD:b * S_PAD + 1, :] = cls_row
        o_ref[b * S_PAD + 1:b * S_PAD + 1 + N_PATCH, :] = (
            emb[b * N_PATCH:(b + 1) * N_PATCH, :] + pos_patch)


def _block_kernel(x_ref, g1_ref, b1_ref,
                  wq_ref, bq_ref, wk_ref, bk_ref, wv_ref, bv_ref,
                  wo_ref, bo_ref, g2_ref, b2_ref,
                  w1_ref, c1_ref, w2_ref, c2_ref, o_ref):
    """One fused DINOv2 block: x += ls1(attn(norm1 x)); x += ls2(mlp(norm2 x)).

    LayerScale is pre-folded (exactly) into the proj / fc2 weights+biases.
    Tokens: (B*S_PAD, D) f32; weight matrices bf16; biases / LN params f32.
    """
    nb = x_ref.shape[0] // S_PAD
    scale = HEAD_DIM ** -0.5

    # Additive mask so padded key positions never receive attention weight.
    key_bias = jnp.where(
        jax.lax.broadcasted_iota(jnp.int32, (1, S_PAD), 1) < S_REAL,
        0.0, -1e30).astype(jnp.float32)                                 # (1, S_PAD)

    g1, b1 = g1_ref[...], b1_ref[...]
    g2, b2 = g2_ref[...], b2_ref[...]
    wq, bq = wq_ref[...], bq_ref[...]
    wk, bk = wk_ref[...], bk_ref[...]
    wv, bv = wv_ref[...], bv_ref[...]
    wo, bo = wo_ref[...], bo_ref[...]
    w1, c1 = w1_ref[...], c1_ref[...]
    w2, c2 = w2_ref[...], c2_ref[...]

    for b in range(nb):                                  # unrolled, nb is static
        xb = x_ref[b * S_PAD:(b + 1) * S_PAD, :]         # (S_PAD, D) f32

        # ---- attention branch --------------------------------------------
        h = _ln(xb, g1, b1).astype(jnp.bfloat16)
        q = jnp.dot(h, wq, preferred_element_type=jnp.float32) + bq     # (S_PAD, D)
        k = jnp.dot(h, wk, preferred_element_type=jnp.float32) + bk
        v = jnp.dot(h, wv, preferred_element_type=jnp.float32) + bv

        attn_proj = jnp.zeros((S_PAD, D), jnp.float32)
        for hh in range(HEADS):                          # unrolled
            lo = hh * HEAD_DIM
            hi = lo + HEAD_DIM
            qh = q[:, lo:hi] * scale                     # (S_PAD, dh) f32
            kh = k[:, lo:hi]
            vh = v[:, lo:hi]
            # scores = qh @ kh^T (contract head dims, no explicit transpose)
            s = jax.lax.dot_general(qh, kh, (((1,), (1,)), ((), ())),
                                    preferred_element_type=jnp.float32)
            s = s + key_bias
            s = s - jnp.max(s, axis=-1, keepdims=True)
            p = jnp.exp(s)
            p = p * pl.reciprocal(jnp.sum(p, axis=-1, keepdims=True),
                                  approx=True)
            oh = jnp.dot(p, vh, preferred_element_type=jnp.float32)     # (S_PAD, dh)
            # per-head slice of the (LayerScale-folded) projection weight
            attn_proj = attn_proj + jnp.dot(
                oh.astype(jnp.bfloat16), wo[lo:hi, :],
                preferred_element_type=jnp.float32)
        x1 = xb + attn_proj + bo                          # residual 1 (in-kernel)

        # ---- MLP branch ----------------------------------------------------
        h2 = _ln(x1, g2, b2).astype(jnp.bfloat16)
        m = jnp.dot(h2, w1, preferred_element_type=jnp.float32) + c1
        m = jax.nn.gelu(m, approximate=True)
        m2 = jnp.dot(m.astype(jnp.bfloat16), w2,
                     preferred_element_type=jnp.float32) + c2
        o_ref[b * S_PAD:(b + 1) * S_PAD, :] = x1 + m2     # residual 2 (in-kernel)


def _head_kernel(x_ref, g_ref, b_ref, wc_ref, wp_ref, bh_ref, o_ref):
    """Final LayerNorm + [CLS, mean(patch)] pooling + linear classifier.

    logits = cls @ W[:D] + mean(patch) @ W[D:] + b  (split-weight concat).
    """
    nb = x_ref.shape[0] // S_PAD
    g, beta = g_ref[...], b_ref[...]
    wc, wp, bh = wc_ref[...], wp_ref[...], bh_ref[...]
    for b in range(nb):
        xb = x_ref[b * S_PAD:(b + 1) * S_PAD, :]          # (S_PAD, D)
        xn = _ln(xb, g, beta)                             # pad rows ignored below
        cls_b = xn[0:1, :]                                # class token
        pooled = jnp.mean(xn[1:1 + N_PATCH, :], axis=0, keepdims=True)
        logit = (jnp.dot(cls_b, wc, preferred_element_type=jnp.float32)
                 + jnp.dot(pooled, wp, preferred_element_type=jnp.float32)
                 + bh)
        o_ref[b:b + 1, :] = logit


# ------------------------------ pallas_call wrapper ---------------------------


def _call_whole(kernel, out_shape, *args):
    """Single-step pallas_call with every operand as one whole VMEM block."""
    return pl.pallas_call(
        kernel,
        out_shape=jax.ShapeDtypeStruct(out_shape, jnp.float32),
        grid=(1,),
        in_specs=[pl.BlockSpec(a.shape, lambda *_, n=a.ndim: (0,) * n)
                  for a in args],
        out_specs=pl.BlockSpec(out_shape, lambda *_, n=len(out_shape): (0,) * n),
    )(*args)


# ------------------------------ glue (plain JAX) ------------------------------


def extract_patches(x, p):
    """NCHW image -> (B, num_patches, C*p*p), matching Conv2d(kernel=stride=p)."""
    B, C, H, W = x.shape
    Hp, Wp = H // p, W // p
    x = x.reshape(B, C, Hp, p, Wp, p)
    x = x.transpose(0, 2, 4, 1, 3, 5)             # (B, Hp, Wp, C, p, p)
    return x.reshape(B, Hp * Wp, C * p * p)


def dino_forward(x, params):
    """x: (B, 3, H, W) NCHW float -> logits (B, NUM_CLASSES) float32."""
    B = x.shape[0]
    patches = extract_patches(x.astype(jnp.float32), PATCH)        # (B, N, C*p*p)
    patches2d = patches.reshape(B * N_PATCH, C_IN * PATCH * PATCH)

    # Patch embed + CLS + pos embed + pad rows -> (B*S_PAD, D) token slab.
    tokens = _call_whole(
        _embed_kernel, (B * S_PAD, D),
        patches2d, params["patch_w"], params["patch_b"],
        params["cls_token"], params["pos_embed"])

    # One fused kernel per transformer block.
    for blk in params["blocks"]:
        tokens = _call_whole(
            _block_kernel, (B * S_PAD, D),
            tokens, blk["ln1_g"], blk["ln1_b"],
            blk["wq"], blk["bq"], blk["wk"], blk["bk"], blk["wv"], blk["bv"],
            blk["wo"], blk["bo"], blk["ln2_g"], blk["ln2_b"],
            blk["fc1_w"], blk["fc1_b"], blk["fc2_w"], blk["fc2_b"])

    # get_intermediate_layers(norm=True, return_class_token=True) + head, fused.
    logits = _call_whole(
        _head_kernel, (B, NUM_CLASSES),
        tokens, params["norm_g"], params["norm_b"],
        params["head_w_cls"], params["head_w_pool"], params["head_b"])
    return logits


# ------------------------------ parameter init --------------------------------


def init_params(key):
    ks = iter(jax.random.split(key, 64))

    def nrm(shape, std=0.02):
        return jax.random.normal(next(ks), shape, dtype=jnp.float32) * std

    def bf16(w):
        return w.astype(jnp.bfloat16)

    pos = nrm((S_REAL, D))
    pos_pad = jnp.concatenate(
        [pos, jnp.zeros((S_PAD - S_REAL, D), jnp.float32)], axis=0)

    params = {
        "patch_w": bf16(nrm((C_IN * PATCH * PATCH, D))),   # Conv2d weight, flattened (C,p,p)
        "patch_b": jnp.zeros((1, D), jnp.float32),
        "cls_token": nrm((1, D)),
        "pos_embed": pos_pad,                              # (S_PAD, D), pad rows zero
        "norm_g": jnp.ones((1, D), jnp.float32),
        "norm_b": jnp.zeros((1, D), jnp.float32),
        "head_w_cls": nrm((D, NUM_CLASSES)),               # head rows for CLS part (f32)
        "head_w_pool": nrm((D, NUM_CLASSES)),              # head rows for avgpool part (f32)
        "head_b": jnp.zeros((1, NUM_CLASSES), jnp.float32),
        "blocks": [],
    }

    for _ in range(DEPTH):
        qkv_w = nrm((D, 3 * D))
        qkv_b = jnp.zeros((3 * D,), jnp.float32)
        gamma1 = jnp.full((D,), 0.1, jnp.float32)          # LayerScale gammas
        gamma2 = jnp.full((D,), 0.1, jnp.float32)
        proj_w, proj_b = nrm((D, D)), jnp.zeros((D,), jnp.float32)
        fc1_w, fc1_b = nrm((D, MLP)), jnp.zeros((MLP,), jnp.float32)
        fc2_w, fc2_b = nrm((MLP, D)), jnp.zeros((D,), jnp.float32)
        params["blocks"].append({
            "ln1_g": jnp.ones((1, D), jnp.float32),
            "ln1_b": jnp.zeros((1, D), jnp.float32),
            # qkv Linear split into q / k / v (exact)
            "wq": bf16(qkv_w[:, :D]),        "bq": qkv_b[:D].reshape(1, D),
            "wk": bf16(qkv_w[:, D:2 * D]),   "bk": qkv_b[D:2 * D].reshape(1, D),
            "wv": bf16(qkv_w[:, 2 * D:]),    "bv": qkv_b[2 * D:].reshape(1, D),
            # ls1(x@W + b) == x@(W*g) + b*g  (exact LayerScale fold)
            "wo": bf16(proj_w * gamma1[None, :]),
            "bo": (proj_b * gamma1).reshape(1, D),
            "ln2_g": jnp.ones((1, D), jnp.float32),
            "ln2_b": jnp.zeros((1, D), jnp.float32),
            "fc1_w": bf16(fc1_w),            "fc1_b": fc1_b.reshape(1, MLP),
            "fc2_w": bf16(fc2_w * gamma2[None, :]),
            "fc2_b": (fc2_b * gamma2).reshape(1, D),
        })
    return params


# ------------------------------------ main -------------------------------------

if __name__ == "__main__":
    key = jax.random.PRNGKey(0)
    k_img, k_par = jax.random.split(key)

    B = 2
    x = jax.random.normal(k_img, (B, C_IN, IMG, IMG), dtype=jnp.float32)
    params = init_params(k_par)

    fwd = jax.jit(dino_forward)
    logits = fwd(x, params)
    jax.block_until_ready(logits)

    assert logits.shape == (B, NUM_CLASSES)
    assert logits.dtype == jnp.float32
    assert bool(jnp.all(jnp.isfinite(logits)))
    print("KERNEL_OK")
</pallas_src>

<mosaic_0001>
module attributes {stable_mosaic.version = 11 : i64} {
  func.func @_block_kernel(%arg0: i32, %arg1: memref<48x64xf32, #tpu.memory_space<vmem>>, %arg2: memref<1x64xf32, #tpu.memory_space<vmem>>, %arg3: memref<1x64xf32, #tpu.memory_space<vmem>>, %arg4: memref<64x64xbf16, #tpu.memory_space<vmem>>, %arg5: memref<1x64xf32, #tpu.memory_space<vmem>>, %arg6: memref<64x64xbf16, #tpu.memory_space<vmem>>, %arg7: memref<1x64xf32, #tpu.memory_space<vmem>>, %arg8: memref<64x64xbf16, #tpu.memory_space<vmem>>, %arg9: memref<1x64xf32, #tpu.memory_space<vmem>>, %arg10: memref<64x64xbf16, #tpu.memory_space<vmem>>, %arg11: memref<1x64xf32, #tpu.memory_space<vmem>>, %arg12: memref<1x64xf32, #tpu.memory_space<vmem>>, %arg13: memref<1x64xf32, #tpu.memory_space<vmem>>, %arg14: memref<64x256xbf16, #tpu.memory_space<vmem>>, %arg15: memref<1x256xf32, #tpu.memory_space<vmem>>, %arg16: memref<256x64xbf16, #tpu.memory_space<vmem>>, %arg17: memref<1x64xf32, #tpu.memory_space<vmem>>, %arg18: memref<48x64xf32, #tpu.memory_space<vmem>>) attributes {dimension_semantics = [#tpu.dimension_semantics<arbitrary>], iteration_bounds = array<i64: 1>, scalar_prefetch = 0 : i64, scratch_operands = 0 : i64, tpu.core_type = #tpu.core_type<tc>, window_params = [{pipeline_mode = #tpu.pipeline_mode<synchronous>, transform_indices = @transform_0, window_bounds = array<i64: 48, 64>}, {pipeline_mode = #tpu.pipeline_mode<synchronous>, transform_indices = @transform_1, window_bounds = array<i64: 1, 64>}, {pipeline_mode = #tpu.pipeline_mode<synchronous>, transform_indices = @transform_2, window_bounds = array<i64: 1, 64>}, {pipeline_mode = #tpu.pipeline_mode<synchronous>, transform_indices = @transform_3, window_bounds = array<i64: 64, 64>}, {pipeline_mode = #tpu.pipeline_mode<synchronous>, transform_indices = @transform_4, window_bounds = array<i64: 1, 64>}, {pipeline_mode = #tpu.pipeline_mode<synchronous>, transform_indices = @transform_5, window_bounds = array<i64: 64, 64>}, {pipeline_mode = #tpu.pipeline_mode<synchronous>, transform_indices = @transform_6, window_bounds = array<i64: 1, 64>}, {pipeline_mode = #tpu.pipeline_mode<synchronous>, transform_indices = @transform_7, window_bounds = array<i64: 64, 64>}, {pipeline_mode = #tpu.pipeline_mode<synchronous>, transform_indices = @transform_8, window_bounds = array<i64: 1, 64>}, {pipeline_mode = #tpu.pipeline_mode<synchronous>, transform_indices = @transform_9, window_bounds = array<i64: 64, 64>}, {pipeline_mode = #tpu.pipeline_mode<synchronous>, transform_indices = @transform_10, window_bounds = array<i64: 1, 64>}, {pipeline_mode = #tpu.pipeline_mode<synchronous>, transform_indices = @transform_11, window_bounds = array<i64: 1, 64>}, {pipeline_mode = #tpu.pipeline_mode<synchronous>, transform_indices = @transform_12, window_bounds = array<i64: 1, 64>}, {pipeline_mode = #tpu.pipeline_mode<synchronous>, transform_indices = @transform_13, window_bounds = array<i64: 64, 256>}, {pipeline_mode = #tpu.pipeline_mode<synchronous>, transform_indices = @transform_14, window_bounds = array<i64: 1, 256>}, {pipeline_mode = #tpu.pipeline_mode<synchronous>, transform_indices = @transform_15, window_bounds = array<i64: 256, 64>}, {pipeline_mode = #tpu.pipeline_mode<synchronous>, transform_indices = @transform_16, window_bounds = array<i64: 1, 64>}, {pipeline_mode = #tpu.pipeline_mode<synchronous>, transform_indices = @transform_17, window_bounds = array<i64: 48, 64>}]} {
    %0 = tpu.iota {dimensions = array<i32: 1>} : vector<1x24xi32>
    %c17_i32 = arith.constant 17 : i32
    %1 = vector.broadcast %c17_i32 : i32 to vector<1x24xi32>
    %2 = arith.cmpi slt, %0, %1 : vector<1x24xi32>
    %cst = arith.constant 0.000000e+00 : f32
    %cst_0 = arith.constant -1.000000e+30 : f32
    %3 = vector.broadcast %cst : f32 to vector<1x24xf32>
    %4 = vector.broadcast %cst_0 : f32 to vector<1x24xf32>
    %5 = arith.select %2, %3, %4 : vector<1x24xi1>, vector<1x24xf32>
    %c0 = arith.constant 0 : index
    %c0_1 = arith.constant 0 : index
    %6 = vector.load %arg2[%c0, %c0_1] : memref<1x64xf32, #tpu.memory_space<vmem>>, vector<1x64xf32>
    %c0_2 = arith.constant 0 : index
    %c0_3 = arith.constant 0 : index
    %7 = vector.load %arg3[%c0_2, %c0_3] : memref<1x64xf32, #tpu.memory_space<vmem>>, vector<1x64xf32>
    %c0_4 = arith.constant 0 : index
    %c0_5 = arith.constant 0 : index
    %8 = vector.load %arg12[%c0_4, %c0_5] : memref<1x64xf32, #tpu.memory_space<vmem>>, vector<1x64xf32>
    %c0_6 = arith.constant 0 : index
    %c0_7 = arith.constant 0 : index
    %9 = vector.load %arg13[%c0_6, %c0_7] : memref<1x64xf32, #tpu.memory_space<vmem>>, vector<1x64xf32>
    %c0_8 = arith.constant 0 : index
    %c0_9 = arith.constant 0 : index
    %10 = vector.load %arg4[%c0_8, %c0_9] : memref<64x64xbf16, #tpu.memory_space<vmem>>, vector<64x64xbf16>
    %c0_10 = arith.constant 0 : index
    %c0_11 = arith.constant 0 : index
    %11 = vector.load %arg5[%c0_10, %c0_11] : memref<1x64xf32, #tpu.memory_space<vmem>>, vector<1x64xf32>
    %c0_12 = arith.constant 0 : index
    %c0_13 = arith.constant 0 : index
    %12 = vector.load %arg6[%c0_12, %c0_13] : memref<64x64xbf16, #tpu.memory_space<vmem>>, vector<64x64xbf16>
    %c0_14 = arith.constant 0 : index
    %c0_15 = arith.constant 0 : index
    %13 = vector.load %arg7[%c0_14, %c0_15] : memref<1x64xf32, #tpu.memory_space<vmem>>, vector<1x64xf32>
    %c0_16 = arith.constant 0 : index
    %c0_17 = arith.constant 0 : index
    %14 = vector.load %arg8[%c0_16, %c0_17] : memref<64x64xbf16, #tpu.memory_space<vmem>>, vector<64x64xbf16>
    %c0_18 = arith.constant 0 : index
    %c0_19 = arith.constant 0 : index
    %15 = vector.load %arg9[%c0_18, %c0_19] : memref<1x64xf32, #tpu.memory_space<vmem>>, vector<1x64xf32>
    %c0_20 = arith.constant 0 : index
    %c0_21 = arith.constant 0 : index
    %16 = vector.load %arg10[%c0_20, %c0_21] : memref<64x64xbf16, #tpu.memory_space<vmem>>, vector<64x64xbf16>
    %c0_22 = arith.constant 0 : index
    %c0_23 = arith.constant 0 : index
    %17 = vector.load %arg11[%c0_22, %c0_23] : memref<1x64xf32, #tpu.memory_space<vmem>>, vector<1x64xf32>
    %c0_24 = arith.constant 0 : index
    %c0_25 = arith.constant 0 : index
    %18 = vector.load %arg14[%c0_24, %c0_25] : memref<64x256xbf16, #tpu.memory_space<vmem>>, vector<64x256xbf16>
    %c0_26 = arith.constant 0 : index
    %c0_27 = arith.constant 0 : index
    %19 = vector.load %arg15[%c0_26, %c0_27] : memref<1x256xf32, #tpu.memory_space<vmem>>, vector<1x256xf32>
    %c0_28 = arith.constant 0 : index
    %c0_29 = arith.constant 0 : index
    %20 = vector.load %arg16[%c0_28, %c0_29] : memref<256x64xbf16, #tpu.memory_space<vmem>>, vector<256x64xbf16>
    %c0_30 = arith.constant 0 : index
    %c0_31 = arith.constant 0 : index
    %21 = vector.load %arg17[%c0_30, %c0_31] : memref<1x64xf32, #tpu.memory_space<vmem>>, vector<1x64xf32>
    %c0_32 = arith.constant 0 : index
    %c0_33 = arith.constant 0 : index
    %22 = vector.load %arg1[%c0_32, %c0_33] : memref<48x64xf32, #tpu.memory_space<vmem>>, vector<24x64xf32>
    %cst_34 = arith.constant dense<0.000000e+00> : vector<24xf32>
    %23 = vector.multi_reduction <add>, %22, %cst_34 [1] : vector<24x64xf32> to vector<24xf32>
    %24 = vector.shape_cast %23 : vector<24xf32> to vector<24x1xf32>
    %cst_35 = arith.constant 6.400000e+01 : f32
    %25 = vector.broadcast %cst_35 : f32 to vector<24x1xf32>
    %26 = arith.divf %24, %25 : vector<24x1xf32>
    %27 = vector.broadcast %26 : vector<24x1xf32> to vector<24x64xf32>
    %28 = arith.subf %22, %27 : vector<24x64xf32>
    %29 = arith.mulf %28, %28 : vector<24x64xf32>
    %cst_36 = arith.constant dense<0.000000e+00> : vector<24xf32>
    %30 = vector.multi_reduction <add>, %29, %cst_36 [1] : vector<24x64xf32> to vector<24xf32>
    %31 = vector.shape_cast %30 : vector<24xf32> to vector<24x1xf32>
    %cst_37 = arith.constant 6.400000e+01 : f32
    %32 = vector.broadcast %cst_37 : f32 to vector<24x1xf32>
    %33 = arith.divf %31, %32 : vector<24x1xf32>
    %34 = vector.broadcast %26 : vector<24x1xf32> to vector<24x64xf32>
    %35 = arith.subf %22, %34 : vector<24x64xf32>
    %cst_38 = arith.constant 9.99999997E-7 : f32
    %36 = vector.broadcast %cst_38 : f32 to vector<24x1xf32>
    %37 = arith.addf %33, %36 : vector<24x1xf32>
    %38 = math.rsqrt %37 : vector<24x1xf32>
    %39 = vector.broadcast %38 : vector<24x1xf32> to vector<24x64xf32>
    %40 = arith.mulf %35, %39 : vector<24x64xf32>
    %41 = vector.broadcast %6 : vector<1x64xf32> to vector<24x64xf32>
    %42 = arith.mulf %40, %41 : vector<24x64xf32>
    %43 = vector.broadcast %7 : vector<1x64xf32> to vector<24x64xf32>
    %44 = arith.addf %42, %43 : vector<24x64xf32>
    %45 = arith.truncf %44 : vector<24x64xf32> to vector<24x64xbf16>
    %cst_39 = arith.constant dense<0.000000e+00> : vector<24x64xf32>
    %46 = tpu.matmul %45, %10, %cst_39 {dimension_numbers = #tpu.dot_dimension_numbers<[1], [0], [0], [1], [0, 0, 1, 1], [], []>} : vector<24x64xbf16>, vector<64x64xbf16>, vector<24x64xf32> -> vector<24x64xf32>
    %47 = vector.broadcast %11 : vector<1x64xf32> to vector<24x64xf32>
    %48 = arith.addf %46, %47 : vector<24x64xf32>
    %cst_40 = arith.constant dense<0.000000e+00> : vector<24x64xf32>
    %49 = tpu.matmul %45, %12, %cst_40 {dimension_numbers = #tpu.dot_dimension_numbers<[1], [0], [0], [1], [0, 0, 1, 1], [], []>} : vector<24x64xbf16>, vector<64x64xbf16>, vector<24x64xf32> -> vector<24x64xf32>
    %50 = vector.broadcast %13 : vector<1x64xf32> to vector<24x64xf32>
    %51 = arith.addf %49, %50 : vector<24x64xf32>
    %cst_41 = arith.constant dense<0.000000e+00> : vector<24x64xf32>
    %52 = tpu.matmul %45, %14, %cst_41 {dimension_numbers = #tpu.dot_dimension_numbers<[1], [0], [0], [1], [0, 0, 1, 1], [], []>} : vector<24x64xbf16>, vector<64x64xbf16>, vector<24x64xf32> -> vector<24x64xf32>
    %53 = vector.broadcast %15 : vector<1x64xf32> to vector<24x64xf32>
    %54 = arith.addf %52, %53 : vector<24x64xf32>
    %cst_42 = arith.constant 0.000000e+00 : f32
    %55 = vector.broadcast %cst_42 : f32 to vector<24x64xf32>
    %56 = vector.extract_strided_slice %48 {offsets = [0, 0], sizes = [24, 32], strides = [1, 1]} : vector<24x64xf32> to vector<24x32xf32>
    %cst_43 = arith.constant 0.176776692 : f32
    %57 = vector.broadcast %cst_43 : f32 to vector<24x32xf32>
    %58 = arith.mulf %56, %57 : vector<24x32xf32>
    %59 = vector.extract_strided_slice %51 {offsets = [0, 0], sizes = [24, 32], strides = [1, 1]} : vector<24x64xf32> to vector<24x32xf32>
    %60 = vector.extract_strided_slice %54 {offsets = [0, 0], sizes = [24, 32], strides = [1, 1]} : vector<24x64xf32> to vector<24x32xf32>
    %cst_44 = arith.constant dense<0.000000e+00> : vector<24x24xf32>
    %61 = tpu.matmul %58, %59, %cst_44 {dimension_numbers = #tpu.dot_dimension_numbers<[1], [1], [0], [0], [0, 0, 1, 0], [], []>} : vector<24x32xf32>, vector<24x32xf32>, vector<24x24xf32> -> vector<24x24xf32>
    %62 = vector.broadcast %5 : vector<1x24xf32> to vector<24x24xf32>
    %63 = arith.addf %61, %62 : vector<24x24xf32>
    %cst_45 = arith.constant dense<0xFF800000> : vector<24xf32>
    %64 = vector.multi_reduction <maximumf>, %63, %cst_45 [1] : vector<24x24xf32> to vector<24xf32>
    %65 = vector.shape_cast %64 : vector<24xf32> to vector<24x1xf32>
    %66 = vector.broadcast %65 : vector<24x1xf32> to vector<24x24xf32>
    %67 = arith.subf %63, %66 : vector<24x24xf32>
    %68 = math.exp %67 : vector<24x24xf32>
    %cst_46 = arith.constant dense<0.000000e+00> : vector<24xf32>
    %69 = vector.multi_reduction <add>, %68, %cst_46 [1] : vector<24x24xf32> to vector<24xf32>
    %70 = vector.shape_cast %69 : vector<24xf32> to vector<24x1xf32>
    %71 = tpu.reciprocal %70 {approx = true} : vector<24x1xf32> -> vector<24x1xf32>
    %72 = vector.broadcast %71 : vector<24x1xf32> to vector<24x24xf32>
    %73 = arith.mulf %68, %72 : vector<24x24xf32>
    %cst_47 = arith.constant dense<0.000000e+00> : vector<24x32xf32>
    %74 = tpu.matmul %73, %60, %cst_47 {dimension_numbers = #tpu.dot_dimension_numbers<[1], [0], [0], [1], [0, 0, 1, 1], [], []>} : vector<24x24xf32>, vector<24x32xf32>, vector<24x32xf32> -> vector<24x32xf32>
    %75 = arith.truncf %74 : vector<24x32xf32> to vector<24x32xbf16>
    %76 = vector.extract_strided_slice %16 {offsets = [0, 0], sizes = [32, 64], strides = [1, 1]} : vector<64x64xbf16> to vector<32x64xbf16>
    %cst_48 = arith.constant dense<0.000000e+00> : vector<24x64xf32>
    %77 = tpu.matmul %75, %76, %cst_48 {dimension_numbers = #tpu.dot_dimension_numbers<[1], [0], [0], [1], [0, 0, 1, 1], [], []>} : vector<24x32xbf16>, vector<32x64xbf16>, vector<24x64xf32> -> vector<24x64xf32>
    %78 = arith.addf %55, %77 : vector<24x64xf32>
    %79 = vector.extract_strided_slice %48 {offsets = [0, 32], sizes = [24, 32], strides = [1, 1]} : vector<24x64xf32> to vector<24x32xf32>
    %cst_49 = arith.constant 0.176776692 : f32
    %80 = vector.broadcast %cst_49 : f32 to vector<24x32xf32>
    %81 = arith.mulf %79, %80 : vector<24x32xf32>
    %82 = vector.extract_strided_slice %51 {offsets = [0, 32], sizes = [24, 32], strides = [1, 1]} : vector<24x64xf32> to vector<24x32xf32>
    %83 = vector.extract_strided_slice %54 {offsets = [0, 32], sizes = [24, 32], strides = [1, 1]} : vector<24x64xf32> to vector<24x32xf32>
    %cst_50 = arith.constant dense<0.000000e+00> : vector<24x24xf32>
    %84 = tpu.matmul %81, %82, %cst_50 {dimension_numbers = #tpu.dot_dimension_numbers<[1], [1], [0], [0], [0, 0, 1, 0], [], []>} : vector<24x32xf32>, vector<24x32xf32>, vector<24x24xf32> -> vector<24x24xf32>
    %85 = vector.broadcast %5 : vector<1x24xf32> to vector<24x24xf32>
    %86 = arith.addf %84, %85 : vector<24x24xf32>
    %cst_51 = arith.constant dense<0xFF800000> : vector<24xf32>
    %87 = vector.multi_reduction <maximumf>, %86, %cst_51 [1] : vector<24x24xf32> to vector<24xf32>
    %88 = vector.shape_cast %87 : vector<24xf32> to vector<24x1xf32>
    %89 = vector.broadcast %88 : vector<24x1xf32> to vector<24x24xf32>
    %90 = arith.subf %86, %89 : vector<24x24xf32>
    %91 = math.exp %90 : vector<24x24xf32>
    %cst_52 = arith.constant dense<0.000000e+00> : vector<24xf32>
    %92 = vector.multi_reduction <add>, %91, %cst_52 [1] : vector<24x24xf32> to vector<24xf32>
    %93 = vector.shape_cast %92 : vector<24xf32> to vector<24x1xf32>
    %94 = tpu.reciprocal %93 {approx = true} : vector<24x1xf32> -> vector<24x1xf32>
    %95 = vector.broadcast %94 : vector<24x1xf32> to vector<24x24xf32>
    %96 = arith.mulf %91, %95 : vector<24x24xf32>
    %cst_53 = arith.constant dense<0.000000e+00> : vector<24x32xf32>
    %97 = tpu.matmul %96, %83, %cst_53 {dimension_numbers = #tpu.dot_dimension_numbers<[1], [0], [0], [1], [0, 0, 1, 1], [], []>} : vector<24x24xf32>, vector<24x32xf32>, vector<24x32xf32> -> vector<24x32xf32>
    %98 = arith.truncf %97 : vector<24x32xf32> to vector<24x32xbf16>
    %99 = vector.extract_strided_slice %16 {offsets = [32, 0], sizes = [32, 64], strides = [1, 1]} : vector<64x64xbf16> to vector<32x64xbf16>
    %cst_54 = arith.constant dense<0.000000e+00> : vector<24x64xf32>
    %100 = tpu.matmul %98, %99, %cst_54 {dimension_numbers = #tpu.dot_dimension_numbers<[1], [0], [0], [1], [0, 0, 1, 1], [], []>} : vector<24x32xbf16>, vector<32x64xbf16>, vector<24x64xf32> -> vector<24x64xf32>
    %101 = arith.addf %78, %100 : vector<24x64xf32>
    %102 = arith.addf %22, %101 : vector<24x64xf32>
    %103 = vector.broadcast %17 : vector<1x64xf32> to vector<24x64xf32>
    %104 = arith.addf %102, %103 : vector<24x64xf32>
    %cst_55 = arith.constant dense<0.000000e+00> : vector<24xf32>
    %105 = vector.multi_reduction <add>, %104, %cst_55 [1] : vector<24x64xf32> to vector<24xf32>
    %106 = vector.shape_cast %105 : vector<24xf32> to vector<24x1xf32>
    %cst_56 = arith.constant 6.400000e+01 : f32
    %107 = vector.broadcast %cst_56 : f32 to vector<24x1xf32>
    %108 = arith.divf %106, %107 : vector<24x1xf32>
    %109 = vector.broadcast %108 : vector<24x1xf32> to vector<24x64xf32>
    %110 = arith.subf %104, %109 : vector<24x64xf32>
    %111 = arith.mulf %110, %110 : vector<24x64xf32>
    %cst_57 = arith.constant dense<0.000000e+00> : vector<24xf32>
    %112 = vector.multi_reduction <add>, %111, %cst_57 [1] : vector<24x64xf32> to vector<24xf32>
    %113 = vector.shape_cast %112 : vector<24xf32> to vector<24x1xf32>
    %cst_58 = arith.constant 6.400000e+01 : f32
    %114 = vector.broadcast %cst_58 : f32 to vector<24x1xf32>
    %115 = arith.divf %113, %114 : vector<24x1xf32>
    %116 = vector.broadcast %108 : vector<24x1xf32> to vector<24x64xf32>
    %117 = arith.subf %104, %116 : vector<24x64xf32>
    %cst_59 = arith.constant 9.99999997E-7 : f32
    %118 = vector.broadcast %cst_59 : f32 to vector<24x1xf32>
    %119 = arith.addf %115, %118 : vector<24x1xf32>
    %120 = math.rsqrt %119 : vector<24x1xf32>
    %121 = vector.broadcast %120 : vector<24x1xf32> to vector<24x64xf32>
    %122 = arith.mulf %117, %121 : vector<24x64xf32>
    %123 = vector.broadcast %8 : vector<1x64xf32> to vector<24x64xf32>
    %124 = arith.mulf %122, %123 : vector<24x64xf32>
    %125 = vector.broadcast %9 : vector<1x64xf32> to vector<24x64xf32>
    %126 = arith.addf %124, %125 : vector<24x64xf32>
    %127 = arith.truncf %126 : vector<24x64xf32> to vector<24x64xbf16>
    %cst_60 = arith.constant dense<0.000000e+00> : vector<24x256xf32>
    %128 = tpu.matmul %127, %18, %cst_60 {dimension_numbers = #tpu.dot_dimension_numbers<[1], [0], [0], [1], [0, 0, 1, 1], [], []>} : vector<24x64xbf16>, vector<64x256xbf16>, vector<24x256xf32> -> vector<24x256xf32>
    %129 = vector.broadcast %19 : vector<1x256xf32> to vector<24x256xf32>
    %130 = arith.addf %128, %129 : vector<24x256xf32>
    %131 = arith.mulf %130, %130 : vector<24x256xf32>
    %132 = arith.mulf %130, %131 : vector<24x256xf32>
    %cst_61 = arith.constant 4.471500e-02 : f32
    %133 = vector.broadcast %cst_61 : f32 to vector<24x256xf32>
    %134 = arith.mulf %133, %132 : vector<24x256xf32>
    %135 = arith.addf %130, %134 : vector<24x256xf32>
    %cst_62 = arith.constant 0.797884583 : f32
    %136 = vector.broadcast %cst_62 : f32 to vector<24x256xf32>
    %137 = arith.mulf %136, %135 : vector<24x256xf32>
    %138 = math.tanh %137 : vector<24x256xf32>
    %cst_63 = arith.constant 1.000000e+00 : f32
    %139 = vector.broadcast %cst_63 : f32 to vector<24x256xf32>
    %140 = arith.addf %139, %138 : vector<24x256xf32>
    %cst_64 = arith.constant 5.000000e-01 : f32
    %141 = vector.broadcast %cst_64 : f32 to vector<24x256xf32>
    %142 = arith.mulf %141, %140 : vector<24x256xf32>
    %143 = arith.mulf %130, %142 : vector<24x256xf32>
    %144 = arith.truncf %143 : vector<24x256xf32> to vector<24x256xbf16>
    %cst_65 = arith.constant dense<0.000000e+00> : vector<24x64xf32>
    %145 = tpu.matmul %144, %20, %cst_65 {dimension_numbers = #tpu.dot_dimension_numbers<[1], [0], [0], [1], [0, 0, 1, 1], [], []>} : vector<24x256xbf16>, vector<256x64xbf16>, vector<24x64xf32> -> vector<24x64xf32>
    %146 = vector.broadcast %21 : vector<1x64xf32> to vector<24x64xf32>
    %147 = arith.addf %145, %146 : vector<24x64xf32>
    %148 = arith.addf %104, %147 : vector<24x64xf32>
    %c0_66 = arith.constant 0 : index
    %c0_67 = arith.constant 0 : index
    %149 = vector.load %arg18[%c0_66, %c0_67] : memref<48x64xf32, #tpu.memory_space<vmem>>, vector<24x64xf32>
    tpu.vector_store %arg18[%c0_66, %c0_67], %148 {strides = array<i32>} : memref<48x64xf32, #tpu.memory_space<vmem>>, vector<24x64xf32>,
    %c24 = arith.constant 24 : index
    %c0_68 = arith.constant 0 : index
    %150 = vector.load %arg1[%c24, %c0_68] : memref<48x64xf32, #tpu.memory_space<vmem>>, vector<24x64xf32>
    %cst_69 = arith.constant dense<0.000000e+00> : vector<24xf32>
    %151 = vector.multi_reduction <add>, %150, %cst_69 [1] : vector<24x64xf32> to vector<24xf32>
    %152 = vector.shape_cast %151 : vector<24xf32> to vector<24x1xf32>
    %cst_70 = arith.constant 6.400000e+01 : f32
    %153 = vector.broadcast %cst_70 : f32 to vector<24x1xf32>
    %154 = arith.divf %152, %153 : vector<24x1xf32>
    %155 = vector.broadcast %154 : vector<24x1xf32> to vector<24x64xf32>
    %156 = arith.subf %150, %155 : vector<24x64xf32>
    %157 = arith.mulf %156, %156 : vector<24x64xf32>
    %cst_71 = arith.constant dense<0.000000e+00> : vector<24xf32>
    %158 = vector.multi_reduction <add>, %157, %cst_71 [1] : vector<24x64xf32> to vector<24xf32>
    %159 = vector.shape_cast %158 : vector<24xf32> to vector<24x1xf32>
    %cst_72 = arith.constant 6.400000e+01 : f32
    %160 = vector.broadcast %cst_72 : f32 to vector<24x1xf32>
    %161 = arith.divf %159, %160 : vector<24x1xf32>
    %162 = vector.broadcast %154 : vector<24x1xf32> to vector<24x64xf32>
    %163 = arith.subf %150, %162 : vector<24x64xf32>
    %cst_73 = arith.constant 9.99999997E-7 : f32
    %164 = vector.broadcast %cst_73 : f32 to vector<24x1xf32>
    %165 = arith.addf %161, %164 : vector<24x1xf32>
    %166 = math.rsqrt %165 : vector<24x1xf32>
    %167 = vector.broadcast %166 : vector<24x1xf32> to vector<24x64xf32>
    %168 = arith.mulf %163, %167 : vector<24x64xf32>
    %169 = vector.broadcast %6 : vector<1x64xf32> to vector<24x64xf32>
    %170 = arith.mulf %168, %169 : vector<24x64xf32>
    %171 = vector.broadcast %7 : vector<1x64xf32> to vector<24x64xf32>
    %172 = arith.addf %170, %171 : vector<24x64xf32>
    %173 = arith.truncf %172 : vector<24x64xf32> to vector<24x64xbf16>
    %cst_74 = arith.constant dense<0.000000e+00> : vector<24x64xf32>
    %174 = tpu.matmul %173, %10, %cst_74 {dimension_numbers = #tpu.dot_dimension_numbers<[1], [0], [0], [1], [0, 0, 1, 1], [], []>} : vector<24x64xbf16>, vector<64x64xbf16>, vector<24x64xf32> -> vector<24x64xf32>
    %175 = vector.broadcast %11 : vector<1x64xf32> to vector<24x64xf32>
    %176 = arith.addf %174, %175 : vector<24x64xf32>
    %cst_75 = arith.constant dense<0.000000e+00> : vector<24x64xf32>
    %177 = tpu.matmul %173, %12, %cst_75 {dimension_numbers = #tpu.dot_dimension_numbers<[1], [0], [0], [1], [0, 0, 1, 1], [], []>} : vector<24x64xbf16>, vector<64x64xbf16>, vector<24x64xf32> -> vector<24x64xf32>
    %178 = vector.broadcast %13 : vector<1x64xf32> to vector<24x64xf32>
    %179 = arith.addf %177, %178 : vector<24x64xf32>
    %cst_76 = arith.constant dense<0.000000e+00> : vector<24x64xf32>
    %180 = tpu.matmul %173, %14, %cst_76 {dimension_numbers = #tpu.dot_dimension_numbers<[1], [0], [0], [1], [0, 0, 1, 1], [], []>} : vector<24x64xbf16>, vector<64x64xbf16>, vector<24x64xf32> -> vector<24x64xf32>
    %181 = vector.broadcast %15 : vector<1x64xf32> to vector<24x64xf32>
    %182 = arith.addf %180, %181 : vector<24x64xf32>
    %cst_77 = arith.constant 0.000000e+00 : f32
    %183 = vector.broadcast %cst_77 : f32 to vector<24x64xf32>
    %184 = vector.extract_strided_slice %176 {offsets = [0, 0], sizes = [24, 32], strides = [1, 1]} : vector<24x64xf32> to vector<24x32xf32>
    %cst_78 = arith.constant 0.176776692 : f32
    %185 = vector.broadcast %cst_78 : f32 to vector<24x32xf32>
    %186 = arith.mulf %184, %185 : vector<24x32xf32>
    %187 = vector.extract_strided_slice %179 {offsets = [0, 0], sizes = [24, 32], strides = [1, 1]} : vector<24x64xf32> to vector<24x32xf32>
    %188 = vector.extract_strided_slice %182 {offsets = [0, 0], sizes = [24, 32], strides = [1, 1]} : vector<24x64xf32> to vector<24x32xf32>
    %cst_79 = arith.constant dense<0.000000e+00> : vector<24x24xf32>
    %189 = tpu.matmul %186, %187, %cst_79 {dimension_numbers = #tpu.dot_dimension_numbers<[1], [1], [0], [0], [0, 0, 1, 0], [], []>} : vector<24x32xf32>, vector<24x32xf32>, vector<24x24xf32> -> vector<24x24xf32>
    %190 = vector.broadcast %5 : vector<1x24xf32> to vector<24x24xf32>
    %191 = arith.addf %189, %190 : vector<24x24xf32>
    %cst_80 = arith.constant dense<0xFF800000> : vector<24xf32>
    %192 = vector.multi_reduction <maximumf>, %191, %cst_80 [1] : vector<24x24xf32> to vector<24xf32>
    %193 = vector.shape_cast %192 : vector<24xf32> to vector<24x1xf32>
    %194 = vector.broadcast %193 : vector<24x1xf32> to vector<24x24xf32>
    %195 = arith.subf %191, %194 : vector<24x24xf32>
    %196 = math.exp %195 : vector<24x24xf32>
    %cst_81 = arith.constant dense<0.000000e+00> : vector<24xf32>
    %197 = vector.multi_reduction <add>, %196, %cst_81 [1] : vector<24x24xf32> to vector<24xf32>
    %198 = vector.shape_cast %197 : vector<24xf32> to vector<24x1xf32>
    %199 = tpu.reciprocal %198 {approx = true} : vector<24x1xf32> -> vector<24x1xf32>
    %200 = vector.broadcast %199 : vector<24x1xf32> to vector<24x24xf32>
    %201 = arith.mulf %196, %200 : vector<24x24xf32>
    %cst_82 = arith.constant dense<0.000000e+00> : vector<24x32xf32>
    %202 = tpu.matmul %201, %188, %cst_82 {dimension_numbers = #tpu.dot_dimension_numbers<[1], [0], [0], [1], [0, 0, 1, 1], [], []>} : vector<24x24xf32>, vector<24x32xf32>, vector<24x32xf32> -> vector<24x32xf32>
    %203 = arith.truncf %202 : vector<24x32xf32> to vector<24x32xbf16>
    %204 = vector.extract_strided_slice %16 {offsets = [0, 0], sizes = [32, 64], strides = [1, 1]} : vector<64x64xbf16> to vector<32x64xbf16>
    %cst_83 = arith.constant dense<0.000000e+00> : vector<24x64xf32>
    %205 = tpu.matmul %203, %204, %cst_83 {dimension_numbers = #tpu.dot_dimension_numbers<[1], [0], [0], [1], [0, 0, 1, 1], [], []>} : vector<24x32xbf16>, vector<32x64xbf16>, vector<24x64xf32> -> vector<24x64xf32>
    %206 = arith.addf %183, %205 : vector<24x64xf32>
    %207 = vector.extract_strided_slice %176 {offsets = [0, 32], sizes = [24, 32], strides = [1, 1]} : vector<24x64xf32> to vector<24x32xf32>
    %cst_84 = arith.constant 0.176776692 : f32
    %208 = vector.broadcast %cst_84 : f32 to vector<24x32xf32>
    %209 = arith.mulf %207, %208 : vector<24x32xf32>
    %210 = vector.extract_strided_slice %179 {offsets = [0, 32], sizes = [24, 32], strides = [1, 1]} : vector<24x64xf32> to vector<24x32xf32>
    %211 = vector.extract_strided_slice %182 {offsets = [0, 32], sizes = [24, 32], strides = [1, 1]} : vector<24x64xf32> to vector<24x32xf32>
    %cst_85 = arith.constant dense<0.000000e+00> : vector<24x24xf32>
    %212 = tpu.matmul %209, %210, %cst_85 {dimension_numbers = #tpu.dot_dimension_numbers<[1], [1], [0], [0], [0, 0, 1, 0], [], []>} : vector<24x32xf32>, vector<24x32xf32>, vector<24x24xf32> -> vector<24x24xf32>
    %213 = vector.broadcast %5 : vector<1x24xf32> to vector<24x24xf32>
    %214 = arith.addf %212, %213 : vector<24x24xf32>
    %cst_86 = arith.constant dense<0xFF800000> : vector<24xf32>
    %215 = vector.multi_reduction <maximumf>, %214, %cst_86 [1] : vector<24x24xf32> to vector<24xf32>
    %216 = vector.shape_cast %215 : vector<24xf32> to vector<24x1xf32>
    %217 = vector.broadcast %216 : vector<24x1xf32> to vector<24x24xf32>
    %218 = arith.subf %214, %217 : vector<24x24xf32>
    %219 = math.exp %218 : vector<24x24xf32>
    %cst_87 = arith.constant dense<0.000000e+00> : vector<24xf32>
    %220 = vector.multi_reduction <add>, %219, %cst_87 [1] : vector<24x24xf32> to vector<24xf32>
    %221 = vector.shape_cast %220 : vector<24xf32> to vector<24x1xf32>
    %222 = tpu.reciprocal %221 {approx = true} : vector<24x1xf32> -> vector<24x1xf32>
    %223 = vector.broadcast %222 : vector<24x1xf32> to vector<24x24xf32>
    %224 = arith.mulf %219, %223 : vector<24x24xf32>
    %cst_88 = arith.constant dense<0.000000e+00> : vector<24x32xf32>
    %225 = tpu.matmul %224, %211, %cst_88 {dimension_numbers = #tpu.dot_dimension_numbers<[1], [0], [0], [1], [0, 0, 1, 1], [], []>} : vector<24x24xf32>, vector<24x32xf32>, vector<24x32xf32> -> vector<24x32xf32>
    %226 = arith.truncf %225 : vector<24x32xf32> to vector<24x32xbf16>
    %227 = vector.extract_strided_slice %16 {offsets = [32, 0], sizes = [32, 64], strides = [1, 1]} : vector<64x64xbf16> to vector<32x64xbf16>
    %cst_89 = arith.constant dense<0.000000e+00> : vector<24x64xf32>
    %228 = tpu.matmul %226, %227, %cst_89 {dimension_numbers = #tpu.dot_dimension_numbers<[1], [0], [0], [1], [0, 0, 1, 1], [], []>} : vector<24x32xbf16>, vector<32x64xbf16>, vector<24x64xf32> -> vector<24x64xf32>
    %229 = arith.addf %206, %228 : vector<24x64xf32>
    %230 = arith.addf %150, %229 : vector<24x64xf32>
    %231 = vector.broadcast %17 : vector<1x64xf32> to vector<24x64xf32>
    %232 = arith.addf %230, %231 : vector<24x64xf32>
    %cst_90 = arith.constant dense<0.000000e+00> : vector<24xf32>
    %233 = vector.multi_reduction <add>, %232, %cst_90 [1] : vector<24x64xf32> to vector<24xf32>
    %234 = vector.shape_cast %233 : vector<24xf32> to vector<24x1xf32>
    %cst_91 = arith.constant 6.400000e+01 : f32
    %235 = vector.broadcast %cst_91 : f32 to vector<24x1xf32>
    %236 = arith.divf %234, %235 : vector<24x1xf32>
    %237 = vector.broadcast %236 : vector<24x1xf32> to vector<24x64xf32>
    %238 = arith.subf %232, %237 : vector<24x64xf32>
    %239 = arith.mulf %238, %238 : vector<24x64xf32>
    %cst_92 = arith.constant dense<0.000000e+00> : vector<24xf32>
    %240 = vector.multi_reduction <add>, %239, %cst_92 [1] : vector<24x64xf32> to vector<24xf32>
    %241 = vector.shape_cast %240 : vector<24xf32> to vector<24x1xf32>
    %cst_93 = arith.constant 6.400000e+01 : f32
    %242 = vector.broadcast %cst_93 : f32 to vector<24x1xf32>
    %243 = arith.divf %241, %242 : vector<24x1xf32>
    %244 = vector.broadcast %236 : vector<24x1xf32> to vector<24x64xf32>
    %245 = arith.subf %232, %244 : vector<24x64xf32>
    %cst_94 = arith.constant 9.99999997E-7 : f32
    %246 = vector.broadcast %cst_94 : f32 to vector<24x1xf32>
    %247 = arith.addf %243, %246 : vector<24x1xf32>
    %248 = math.rsqrt %247 : vector<24x1xf32>
    %249 = vector.broadcast %248 : vector<24x1xf32> to vector<24x64xf32>
    %250 = arith.mulf %245, %249 : vector<24x64xf32>
    %251 = vector.broadcast %8 : vector<1x64xf32> to vector<24x64xf32>
    %252 = arith.mulf %250, %251 : vector<24x64xf32>
    %253 = vector.broadcast %9 : vector<1x64xf32> to vector<24x64xf32>
    %254 = arith.addf %252, %253 : vector<24x64xf32>
    %255 = arith.truncf %254 : vector<24x64xf32> to vector<24x64xbf16>
    %cst_95 = arith.constant dense<0.000000e+00> : vector<24x256xf32>
    %256 = tpu.matmul %255, %18, %cst_95 {dimension_numbers = #tpu.dot_dimension_numbers<[1], [0], [0], [1], [0, 0, 1, 1], [], []>} : vector<24x64xbf16>, vector<64x256xbf16>, vector<24x256xf32> -> vector<24x256xf32>
    %257 = vector.broadcast %19 : vector<1x256xf32> to vector<24x256xf32>
    %258 = arith.addf %256, %257 : vector<24x256xf32>
    %259 = arith.mulf %258, %258 : vector<24x256xf32>
    %260 = arith.mulf %258, %259 : vector<24x256xf32>
    %cst_96 = arith.constant 4.471500e-02 : f32
    %261 = vector.broadcast %cst_96 : f32 to vector<24x256xf32>
    %262 = arith.mulf %261, %260 : vector<24x256xf32>
    %263 = arith.addf %258, %262 : vector<24x256xf32>
    %cst_97 = arith.constant 0.797884583 : f32
    %264 = vector.broadcast %cst_97 : f32 to vector<24x256xf32>
    %265 = arith.mulf %264, %263 : vector<24x256xf32>
    %266 = math.tanh %265 : vector<24x256xf32>
    %cst_98 = arith.constant 1.000000e+00 : f32
    %267 = vector.broadcast %cst_98 : f32 to vector<24x256xf32>
    %268 = arith.addf %267, %266 : vector<24x256xf32>
    %cst_99 = arith.constant 5.000000e-01 : f32
    %269 = vector.broadcast %cst_99 : f32 to vector<24x256xf32>
    %270 = arith.mulf %269, %268 : vector<24x256xf32>
    %271 = arith.mulf %258, %270 : vector<24x256xf32>
    %272 = arith.truncf %271 : vector<24x256xf32> to vector<24x256xbf16>
    %cst_100 = arith.constant dense<0.000000e+00> : vector<24x64xf32>
    %273 = tpu.matmul %272, %20, %cst_100 {dimension_numbers = #tpu.dot_dimension_numbers<[1], [0], [0], [1], [0, 0, 1, 1], [], []>} : vector<24x256xbf16>, vector<256x64xbf16>, vector<24x64xf32> -> vector<24x64xf32>
    %274 = vector.broadcast %21 : vector<1x64xf32> to vector<24x64xf32>
    %275 = arith.addf %273, %274 : vector<24x64xf32>
    %276 = arith.addf %232, %275 : vector<24x64xf32>
    %c24_101 = arith.constant 24 : index
    %c0_102 = arith.constant 0 : index
    %277 = vector.load %arg18[%c24_101, %c0_102] : memref<48x64xf32, #tpu.memory_space<vmem>>, vector<24x64xf32>
    tpu.vector_store %arg18[%c24_101, %c0_102], %276 {strides = array<i32>} : memref<48x64xf32, #tpu.memory_space<vmem>>, vector<24x64xf32>,
    return
  }
  func.func @transform_0(%arg0: i32) -> (i32, i32) {
    %c0_i32 = arith.constant 0 : i32
    %c0_i32_0 = arith.constant 0 : i32
    %c0_i32_1 = arith.constant 0 : i32
    return %c0_i32, %c0_i32_0 : i32, i32
  }
  func.func @transform_1(%arg0: i32) -> (i32, i32) {
    %c0_i32 = arith.constant 0 : i32
    %c0_i32_0 = arith.constant 0 : i32
    %c0_i32_1 = arith.constant 0 : i32
    return %c0_i32, %c0_i32_0 : i32, i32
  }
  func.func @transform_2(%arg0: i32) -> (i32, i32) {
    %c0_i32 = arith.constant 0 : i32
    %c0_i32_0 = arith.constant 0 : i32
    %c0_i32_1 = arith.constant 0 : i32
    return %c0_i32, %c0_i32_0 : i32, i32
  }
  func.func @transform_3(%arg0: i32) -> (i32, i32) {
    %c0_i32 = arith.constant 0 : i32
    %c0_i32_0 = arith.constant 0 : i32
    %c0_i32_1 = arith.constant 0 : i32
    return %c0_i32, %c0_i32_0 : i32, i32
  }
  func.func @transform_4(%arg0: i32) -> (i32, i32) {
    %c0_i32 = arith.constant 0 : i32
    %c0_i32_0 = arith.constant 0 : i32
    %c0_i32_1 = arith.constant 0 : i32
    return %c0_i32, %c0_i32_0 : i32, i32
  }
  func.func @transform_5(%arg0: i32) -> (i32, i32) {
    %c0_i32 = arith.constant 0 : i32
    %c0_i32_0 = arith.constant 0 : i32
    %c0_i32_1 = arith.constant 0 : i32
    return %c0_i32, %c0_i32_0 : i32, i32
  }
  func.func @transform_6(%arg0: i32) -> (i32, i32) {
    %c0_i32 = arith.constant 0 : i32
    %c0_i32_0 = arith.constant 0 : i32
    %c0_i32_1 = arith.constant 0 : i32
    return %c0_i32, %c0_i32_0 : i32, i32
  }
  func.func @transform_7(%arg0: i32) -> (i32, i32) {
    %c0_i32 = arith.constant 0 : i32
    %c0_i32_0 = arith.constant 0 : i32
    %c0_i32_1 = arith.constant 0 : i32
    return %c0_i32, %c0_i32_0 : i32, i32
  }
  func.func @transform_8(%arg0: i32) -> (i32, i32) {
    %c0_i32 = arith.constant 0 : i32
    %c0_i32_0 = arith.constant 0 : i32
    %c0_i32_1 = arith.constant 0 : i32
    return %c0_i32, %c0_i32_0 : i32, i32
  }
  func.func @transform_9(%arg0: i32) -> (i32, i32) {
    %c0_i32 = arith.constant 0 : i32
    %c0_i32_0 = arith.constant 0 : i32
    %c0_i32_1 = arith.constant 0 : i32
    return %c0_i32, %c0_i32_0 : i32, i32
  }
  func.func @transform_10(%arg0: i32) -> (i32, i32) {
    %c0_i32 = arith.constant 0 : i32
    %c0_i32_0 = arith.constant 0 : i32
    %c0_i32_1 = arith.constant 0 : i32
    return %c0_i32, %c0_i32_0 : i32, i32
  }
  func.func @transform_11(%arg0: i32) -> (i32, i32) {
    %c0_i32 = arith.constant 0 : i32
    %c0_i32_0 = arith.constant 0 : i32
    %c0_i32_1 = arith.constant 0 : i32
    return %c0_i32, %c0_i32_0 : i32, i32
  }
  func.func @transform_12(%arg0: i32) -> (i32, i32) {
    %c0_i32 = arith.constant 0 : i32
    %c0_i32_0 = arith.constant 0 : i32
    %c0_i32_1 = arith.constant 0 : i32
    return %c0_i32, %c0_i32_0 : i32, i32
  }
  func.func @transform_13(%arg0: i32) -> (i32, i32) {
    %c0_i32 = arith.constant 0 : i32
    %c0_i32_0 = arith.constant 0 : i32
    %c0_i32_1 = arith.constant 0 : i32
    return %c0_i32, %c0_i32_0 : i32, i32
  }
  func.func @transform_14(%arg0: i32) -> (i32, i32) {
    %c0_i32 = arith.constant 0 : i32
    %c0_i32_0 = arith.constant 0 : i32
    %c0_i32_1 = arith.constant 0 : i32
    return %c0_i32, %c0_i32_0 : i32, i32
  }
  func.func @transform_15(%arg0: i32) -> (i32, i32) {
    %c0_i32 = arith.constant 0 : i32
    %c0_i32_0 = arith.constant 0 : i32
    %c0_i32_1 = arith.constant 0 : i32
    return %c0_i32, %c0_i32_0 : i32, i32
  }
  func.func @transform_16(%arg0: i32) -> (i32, i32) {
    %c0_i32 = arith.constant 0 : i32
    %c0_i32_0 = arith.constant 0 : i32
    %c0_i32_1 = arith.constant 0 : i32
    return %c0_i32, %c0_i32_0 : i32, i32
  }
  func.func @transform_17(%arg0: i32) -> (i32, i32) {
    %c0_i32 = arith.constant 0 : i32
    %c0_i32_0 = arith.constant 0 : i32
    %c0_i32_1 = arith.constant 0 : i32
    return %c0_i32, %c0_i32_0 : i32, i32
  }
}

module attributes {stable_mosaic.version = 11 : i64} {
  func.func @_embed_kernel(%arg0: i32, %arg1: memref<32x192xf32, #tpu.memory_space<vmem>>, %arg2: memref<192x64xbf16, #tpu.memory_space<vmem>>, %arg3: memref<1x64xf32, #tpu.memory_space<vmem>>, %arg4: memref<1x64xf32, #tpu.memory_space<vmem>>, %arg5: memref<24x64xf32, #tpu.memory_space<vmem>>, %arg6: memref<48x64xf32, #tpu.memory_space<vmem>>) attributes {dimension_semantics = [#tpu.dimension_semantics<arbitrary>], iteration_bounds = array<i64: 1>, scalar_prefetch = 0 : i64, scratch_operands = 0 : i64, tpu.core_type = #tpu.core_type<tc>, window_params = [{pipeline_mode = #tpu.pipeline_mode<synchronous>, transform_indices = @transform_0, window_bounds = array<i64: 32, 192>}, {pipeline_mode = #tpu.pipeline_mode<synchronous>, transform_indices = @transform_1, window_bounds = array<i64: 192, 64>}, {pipeline_mode = #tpu.pipeline_mode<synchronous>, transform_indices = @transform_2, window_bounds = array<i64: 1, 64>}, {pipeline_mode = #tpu.pipeline_mode<synchronous>, transform_indices = @transform_3, window_bounds = array<i64: 1, 64>}, {pipeline_mode = #tpu.pipeline_mode<synchronous>, transform_indices = @transform_4, window_bounds = array<i64: 24, 64>}, {pipeline_mode = #tpu.pipeline_mode<synchronous>, transform_indices = @transform_5, window_bounds = array<i64: 48, 64>}]} {
    %c0 = arith.constant 0 : index
    %c0_0 = arith.constant 0 : index
    %0 = vector.load %arg1[%c0, %c0_0] : memref<32x192xf32, #tpu.memory_space<vmem>>, vector<32x192xf32>
    %1 = arith.truncf %0 : vector<32x192xf32> to vector<32x192xbf16>
    %c0_1 = arith.constant 0 : index
    %c0_2 = arith.constant 0 : index
    %2 = vector.load %arg2[%c0_1, %c0_2] : memref<192x64xbf16, #tpu.memory_space<vmem>>, vector<192x64xbf16>
    %cst = arith.constant dense<0.000000e+00> : vector<32x64xf32>
    %3 = tpu.matmul %1, %2, %cst {dimension_numbers = #tpu.dot_dimension_numbers<[1], [0], [0], [1], [0, 0, 1, 1], [], []>} : vector<32x192xbf16>, vector<192x64xbf16>, vector<32x64xf32> -> vector<32x64xf32>
    %c0_3 = arith.constant 0 : index
    %c0_4 = arith.constant 0 : index
    %4 = vector.load %arg3[%c0_3, %c0_4] : memref<1x64xf32, #tpu.memory_space<vmem>>, vector<1x64xf32>
    %5 = vector.broadcast %4 : vector<1x64xf32> to vector<32x64xf32>
    %6 = arith.addf %3, %5 : vector<32x64xf32>
    %c0_5 = arith.constant 0 : index
    %c0_6 = arith.constant 0 : index
    %7 = vector.load %arg4[%c0_5, %c0_6] : memref<1x64xf32, #tpu.memory_space<vmem>>, vector<1x64xf32>
    %c0_7 = arith.constant 0 : index
    %c0_8 = arith.constant 0 : index
    %8 = vector.load %arg5[%c0_7, %c0_8] : memref<24x64xf32, #tpu.memory_space<vmem>>, vector<1x64xf32>
    %9 = arith.addf %7, %8 : vector<1x64xf32>
    %c1 = arith.constant 1 : index
    %c0_9 = arith.constant 0 : index
    %10 = vector.load %arg5[%c1, %c0_9] : memref<24x64xf32, #tpu.memory_space<vmem>>, vector<16x64xf32>
    %cst_10 = arith.constant 0.000000e+00 : f32
    %11 = vector.broadcast %cst_10 : f32 to vector<48x64xf32>
    %c0_11 = arith.constant 0 : index
    %c0_12 = arith.constant 0 : index
    %12 = vector.load %arg6[%c0_11, %c0_12] : memref<48x64xf32, #tpu.memory_space<vmem>>, vector<48x64xf32>
    tpu.vector_store %arg6[%c0_11, %c0_12], %11 {strides = array<i32>} : memref<48x64xf32, #tpu.memory_space<vmem>>, vector<48x64xf32>,
    %c0_13 = arith.constant 0 : index
    %c0_14 = arith.constant 0 : index
    %13 = vector.load %arg6[%c0_13, %c0_14] : memref<48x64xf32, #tpu.memory_space<vmem>>, vector<1x64xf32>
    tpu.vector_store %arg6[%c0_13, %c0_14], %9 {strides = array<i32>} : memref<48x64xf32, #tpu.memory_space<vmem>>, vector<1x64xf32>,
    %14 = vector.extract_strided_slice %6 {offsets = [0, 0], sizes = [16, 64], strides = [1, 1]} : vector<32x64xf32> to vector<16x64xf32>
    %15 = arith.addf %14, %10 : vector<16x64xf32>
    %c1_15 = arith.constant 1 : index
    %c0_16 = arith.constant 0 : index
    %16 = vector.load %arg6[%c1_15, %c0_16] : memref<48x64xf32, #tpu.memory_space<vmem>>, vector<16x64xf32>
    tpu.vector_store %arg6[%c1_15, %c0_16], %15 {strides = array<i32>} : memref<48x64xf32, #tpu.memory_space<vmem>>, vector<16x64xf32>,
    %c24 = arith.constant 24 : index
    %c0_17 = arith.constant 0 : index
    %17 = vector.load %arg6[%c24, %c0_17] : memref<48x64xf32, #tpu.memory_space<vmem>>, vector<1x64xf32>
    tpu.vector_store %arg6[%c24, %c0_17], %9 {strides = array<i32>} : memref<48x64xf32, #tpu.memory_space<vmem>>, vector<1x64xf32>,
    %18 = vector.extract_strided_slice %6 {offsets = [16, 0], sizes = [16, 64], strides = [1, 1]} : vector<32x64xf32> to vector<16x64xf32>
    %19 = arith.addf %18, %10 : vector<16x64xf32>
    %c25 = arith.constant 25 : index
    %c0_18 = arith.constant 0 : index
    %20 = vector.load %arg6[%c25, %c0_18] : memref<48x64xf32, #tpu.memory_space<vmem>>, vector<16x64xf32>
    tpu.vector_store %arg6[%c25, %c0_18], %19 {strides = array<i32>} : memref<48x64xf32, #tpu.memory_space<vmem>>, vector<16x64xf32>,
    return
  }
  func.func @transform_0(%arg0: i32) -> (i32, i32) {
    %c0_i32 = arith.constant 0 : i32
    %c0_i32_0 = arith.constant 0 : i32
    %c0_i32_1 = arith.constant 0 : i32
    return %c0_i32, %c0_i32_0 : i32, i32
  }
  func.func @transform_1(%arg0: i32) -> (i32, i32) {
    %c0_i32 = arith.constant 0 : i32
    %c0_i32_0 = arith.constant 0 : i32
    %c0_i32_1 = arith.constant 0 : i32
    return %c0_i32, %c0_i32_0 : i32, i32
  }
  func.func @transform_2(%arg0: i32) -> (i32, i32) {
    %c0_i32 = arith.constant 0 : i32
    %c0_i32_0 = arith.constant 0 : i32
    %c0_i32_1 = arith.constant 0 : i32
    return %c0_i32, %c0_i32_0 : i32, i32
  }
  func.func @transform_3(%arg0: i32) -> (i32, i32) {
    %c0_i32 = arith.constant 0 : i32
    %c0_i32_0 = arith.constant 0 : i32
    %c0_i32_1 = arith.constant 0 : i32
    return %c0_i32, %c0_i32_0 : i32, i32
  }
  func.func @transform_4(%arg0: i32) -> (i32, i32) {
    %c0_i32 = arith.constant 0 : i32
    %c0_i32_0 = arith.constant 0 : i32
    %c0_i32_1 = arith.constant 0 : i32
    return %c0_i32, %c0_i32_0 : i32, i32
  }
  func.func @transform_5(%arg0: i32) -> (i32, i32) {
    %c0_i32 = arith.constant 0 : i32
    %c0_i32_0 = arith.constant 0 : i32
    %c0_i32_1 = arith.constant 0 : i32
    return %c0_i32, %c0_i32_0 : i32, i32
  }
}

module attributes {stable_mosaic.version = 11 : i64} {
  func.func @_head_kernel(%arg0: i32, %arg1: memref<48x64xf32, #tpu.memory_space<vmem>>, %arg2: memref<1x64xf32, #tpu.memory_space<vmem>>, %arg3: memref<1x64xf32, #tpu.memory_space<vmem>>, %arg4: memref<64x16xf32, #tpu.memory_space<vmem>>, %arg5: memref<64x16xf32, #tpu.memory_space<vmem>>, %arg6: memref<1x16xf32, #tpu.memory_space<vmem>>, %arg7: memref<2x16xf32, #tpu.memory_space<vmem>>) attributes {dimension_semantics = [#tpu.dimension_semantics<arbitrary>], iteration_bounds = array<i64: 1>, scalar_prefetch = 0 : i64, scratch_operands = 0 : i64, tpu.core_type = #tpu.core_type<tc>, window_params = [{pipeline_mode = #tpu.pipeline_mode<synchronous>, transform_indices = @transform_0, window_bounds = array<i64: 48, 64>}, {pipeline_mode = #tpu.pipeline_mode<synchronous>, transform_indices = @transform_1, window_bounds = array<i64: 1, 64>}, {pipeline_mode = #tpu.pipeline_mode<synchronous>, transform_indices = @transform_2, window_bounds = array<i64: 1, 64>}, {pipeline_mode = #tpu.pipeline_mode<synchronous>, transform_indices = @transform_3, window_bounds = array<i64: 64, 16>}, {pipeline_mode = #tpu.pipeline_mode<synchronous>, transform_indices = @transform_4, window_bounds = array<i64: 64, 16>}, {pipeline_mode = #tpu.pipeline_mode<synchronous>, transform_indices = @transform_5, window_bounds = array<i64: 1, 16>}, {pipeline_mode = #tpu.pipeline_mode<synchronous>, transform_indices = @transform_6, window_bounds = array<i64: 2, 16>}]} {
    %c0 = arith.constant 0 : index
    %c0_0 = arith.constant 0 : index
    %0 = vector.load %arg2[%c0, %c0_0] : memref<1x64xf32, #tpu.memory_space<vmem>>, vector<1x64xf32>
    %c0_1 = arith.constant 0 : index
    %c0_2 = arith.constant 0 : index
    %1 = vector.load %arg3[%c0_1, %c0_2] : memref<1x64xf32, #tpu.memory_space<vmem>>, vector<1x64xf32>
    %c0_3 = arith.constant 0 : index
    %c0_4 = arith.constant 0 : index
    %2 = vector.load %arg4[%c0_3, %c0_4] : memref<64x16xf32, #tpu.memory_space<vmem>>, vector<64x16xf32>
    %c0_5 = arith.constant 0 : index
    %c0_6 = arith.constant 0 : index
    %3 = vector.load %arg5[%c0_5, %c0_6] : memref<64x16xf32, #tpu.memory_space<vmem>>, vector<64x16xf32>
    %c0_7 = arith.constant 0 : index
    %c0_8 = arith.constant 0 : index
    %4 = vector.load %arg6[%c0_7, %c0_8] : memref<1x16xf32, #tpu.memory_space<vmem>>, vector<1x16xf32>
    %c0_9 = arith.constant 0 : index
    %c0_10 = arith.constant 0 : index
    %5 = vector.load %arg1[%c0_9, %c0_10] : memref<48x64xf32, #tpu.memory_space<vmem>>, vector<24x64xf32>
    %cst = arith.constant dense<0.000000e+00> : vector<24xf32>
    %6 = vector.multi_reduction <add>, %5, %cst [1] : vector<24x64xf32> to vector<24xf32>
    %7 = vector.shape_cast %6 : vector<24xf32> to vector<24x1xf32>
    %cst_11 = arith.constant 6.400000e+01 : f32
    %8 = vector.broadcast %cst_11 : f32 to vector<24x1xf32>
    %9 = arith.divf %7, %8 : vector<24x1xf32>
    %10 = vector.broadcast %9 : vector<24x1xf32> to vector<24x64xf32>
    %11 = arith.subf %5, %10 : vector<24x64xf32>
    %12 = arith.mulf %11, %11 : vector<24x64xf32>
    %cst_12 = arith.constant dense<0.000000e+00> : vector<24xf32>
    %13 = vector.multi_reduction <add>, %12, %cst_12 [1] : vector<24x64xf32> to vector<24xf32>
    %14 = vector.shape_cast %13 : vector<24xf32> to vector<24x1xf32>
    %cst_13 = arith.constant 6.400000e+01 : f32
    %15 = vector.broadcast %cst_13 : f32 to vector<24x1xf32>
    %16 = arith.divf %14, %15 : vector<24x1xf32>
    %17 = vector.broadcast %9 : vector<24x1xf32> to vector<24x64xf32>
    %18 = arith.subf %5, %17 : vector<24x64xf32>
    %cst_14 = arith.constant 9.99999997E-7 : f32
    %19 = vector.broadcast %cst_14 : f32 to vector<24x1xf32>
    %20 = arith.addf %16, %19 : vector<24x1xf32>
    %21 = math.rsqrt %20 : vector<24x1xf32>
    %22 = vector.broadcast %21 : vector<24x1xf32> to vector<24x64xf32>
    %23 = arith.mulf %18, %22 : vector<24x64xf32>
    %24 = vector.broadcast %0 : vector<1x64xf32> to vector<24x64xf32>
    %25 = arith.mulf %23, %24 : vector<24x64xf32>
    %26 = vector.broadcast %1 : vector<1x64xf32> to vector<24x64xf32>
    %27 = arith.addf %25, %26 : vector<24x64xf32>
    %28 = vector.extract_strided_slice %27 {offsets = [0, 0], sizes = [1, 64], strides = [1, 1]} : vector<24x64xf32> to vector<1x64xf32>
    %29 = vector.extract_strided_slice %27 {offsets = [1, 0], sizes = [16, 64], strides = [1, 1]} : vector<24x64xf32> to vector<16x64xf32>
    %cst_15 = arith.constant dense<0.000000e+00> : vector<64xf32>
    %30 = vector.multi_reduction <add>, %29, %cst_15 [0] : vector<16x64xf32> to vector<64xf32>
    %31 = vector.shape_cast %30 : vector<64xf32> to vector<1x64xf32>
    %cst_16 = arith.constant 1.600000e+01 : f32
    %32 = vector.broadcast %cst_16 : f32 to vector<1x64xf32>
    %33 = arith.divf %31, %32 : vector<1x64xf32>
    %cst_17 = arith.constant dense<0.000000e+00> : vector<1x16xf32>
    %34 = tpu.matmul %28, %2, %cst_17 {dimension_numbers = #tpu.dot_dimension_numbers<[1], [0], [0], [1], [0, 0, 1, 1], [], []>} : vector<1x64xf32>, vector<64x16xf32>, vector<1x16xf32> -> vector<1x16xf32>
    %cst_18 = arith.constant dense<0.000000e+00> : vector<1x16xf32>
    %35 = tpu.matmul %33, %3, %cst_18 {dimension_numbers = #tpu.dot_dimension_numbers<[1], [0], [0], [1], [0, 0, 1, 1], [], []>} : vector<1x64xf32>, vector<64x16xf32>, vector<1x16xf32> -> vector<1x16xf32>
    %36 = arith.addf %34, %35 : vector<1x16xf32>
    %37 = arith.addf %36, %4 : vector<1x16xf32>
    %c0_19 = arith.constant 0 : index
    %c0_20 = arith.constant 0 : index
    %38 = vector.load %arg7[%c0_19, %c0_20] : memref<2x16xf32, #tpu.memory_space<vmem>>, vector<1x16xf32>
    tpu.vector_store %arg7[%c0_19, %c0_20], %37 {strides = array<i32>} : memref<2x16xf32, #tpu.memory_space<vmem>>, vector<1x16xf32>,
    %c24 = arith.constant 24 : index
    %c0_21 = arith.constant 0 : index
    %39 = vector.load %arg1[%c24, %c0_21] : memref<48x64xf32, #tpu.memory_space<vmem>>, vector<24x64xf32>
    %cst_22 = arith.constant dense<0.000000e+00> : vector<24xf32>
    %40 = vector.multi_reduction <add>, %39, %cst_22 [1] : vector<24x64xf32> to vector<24xf32>
    %41 = vector.shape_cast %40 : vector<24xf32> to vector<24x1xf32>
    %cst_23 = arith.constant 6.400000e+01 : f32
    %42 = vector.broadcast %cst_23 : f32 to vector<24x1xf32>
    %43 = arith.divf %41, %42 : vector<24x1xf32>
    %44 = vector.broadcast %43 : vector<24x1xf32> to vector<24x64xf32>
    %45 = arith.subf %39, %44 : vector<24x64xf32>
    %46 = arith.mulf %45, %45 : vector<24x64xf32>
    %cst_24 = arith.constant dense<0.000000e+00> : vector<24xf32>
    %47 = vector.multi_reduction <add>, %46, %cst_24 [1] : vector<24x64xf32> to vector<24xf32>
    %48 = vector.shape_cast %47 : vector<24xf32> to vector<24x1xf32>
    %cst_25 = arith.constant 6.400000e+01 : f32
    %49 = vector.broadcast %cst_25 : f32 to vector<24x1xf32>
    %50 = arith.divf %48, %49 : vector<24x1xf32>
    %51 = vector.broadcast %43 : vector<24x1xf32> to vector<24x64xf32>
    %52 = arith.subf %39, %51 : vector<24x64xf32>
    %cst_26 = arith.constant 9.99999997E-7 : f32
    %53 = vector.broadcast %cst_26 : f32 to vector<24x1xf32>
    %54 = arith.addf %50, %53 : vector<24x1xf32>
    %55 = math.rsqrt %54 : vector<24x1xf32>
    %56 = vector.broadcast %55 : vector<24x1xf32> to vector<24x64xf32>
    %57 = arith.mulf %52, %56 : vector<24x64xf32>
    %58 = vector.broadcast %0 : vector<1x64xf32> to vector<24x64xf32>
    %59 = arith.mulf %57, %58 : vector<24x64xf32>
    %60 = vector.broadcast %1 : vector<1x64xf32> to vector<24x64xf32>
    %61 = arith.addf %59, %60 : vector<24x64xf32>
    %62 = vector.extract_strided_slice %61 {offsets = [0, 0], sizes = [1, 64], strides = [1, 1]} : vector<24x64xf32> to vector<1x64xf32>
    %63 = vector.extract_strided_slice %61 {offsets = [1, 0], sizes = [16, 64], strides = [1, 1]} : vector<24x64xf32> to vector<16x64xf32>
    %cst_27 = arith.constant dense<0.000000e+00> : vector<64xf32>
    %64 = vector.multi_reduction <add>, %63, %cst_27 [0] : vector<16x64xf32> to vector<64xf32>
    %65 = vector.shape_cast %64 : vector<64xf32> to vector<1x64xf32>
    %cst_28 = arith.constant 1.600000e+01 : f32
    %66 = vector.broadcast %cst_28 : f32 to vector<1x64xf32>
    %67 = arith.divf %65, %66 : vector<1x64xf32>
    %cst_29 = arith.constant dense<0.000000e+00> : vector<1x16xf32>
    %68 = tpu.matmul %62, %2, %cst_29 {dimension_numbers = #tpu.dot_dimension_numbers<[1], [0], [0], [1], [0, 0, 1, 1], [], []>} : vector<1x64xf32>, vector<64x16xf32>, vector<1x16xf32> -> vector<1x16xf32>
    %cst_30 = arith.constant dense<0.000000e+00> : vector<1x16xf32>
    %69 = tpu.matmul %67, %3, %cst_30 {dimension_numbers = #tpu.dot_dimension_numbers<[1], [0], [0], [1], [0, 0, 1, 1], [], []>} : vector<1x64xf32>, vector<64x16xf32>, vector<1x16xf32> -> vector<1x16xf32>
    %70 = arith.addf %68, %69 : vector<1x16xf32>
    %71 = arith.addf %70, %4 : vector<1x16xf32>
    %c1 = arith.constant 1 : index
    %c0_31 = arith.constant 0 : index
    %72 = vector.load %arg7[%c1, %c0_31] : memref<2x16xf32, #tpu.memory_space<vmem>>, vector<1x16xf32>
    tpu.vector_store %arg7[%c1, %c0_31], %71 {strides = array<i32>} : memref<2x16xf32, #tpu.memory_space<vmem>>, vector<1x16xf32>,
    return
  }
  func.func @transform_0(%arg0: i32) -> (i32, i32) {
    %c0_i32 = arith.constant 0 : i32
    %c0_i32_0 = arith.constant 0 : i32
    %c0_i32_1 = arith.constant 0 : i32
    return %c0_i32, %c0_i32_0 : i32, i32
  }
  func.func @transform_1(%arg0: i32) -> (i32, i32) {
    %c0_i32 = arith.constant 0 : i32
    %c0_i32_0 = arith.constant 0 : i32
    %c0_i32_1 = arith.constant 0 : i32
    return %c0_i32, %c0_i32_0 : i32, i32
  }
  func.func @transform_2(%arg0: i32) -> (i32, i32) {
    %c0_i32 = arith.constant 0 : i32
    %c0_i32_0 = arith.constant 0 : i32
    %c0_i32_1 = arith.constant 0 : i32
    return %c0_i32, %c0_i32_0 : i32, i32
  }
  func.func @transform_3(%arg0: i32) -> (i32, i32) {
    %c0_i32 = arith.constant 0 : i32
    %c0_i32_0 = arith.constant 0 : i32
    %c0_i32_1 = arith.constant 0 : i32
    return %c0_i32, %c0_i32_0 : i32, i32
  }
  func.func @transform_4(%arg0: i32) -> (i32, i32) {
    %c0_i32 = arith.constant 0 : i32
    %c0_i32_0 = arith.constant 0 : i32
    %c0_i32_1 = arith.constant 0 : i32
    return %c0_i32, %c0_i32_0 : i32, i32
  }
  func.func @transform_5(%arg0: i32) -> (i32, i32) {
    %c0_i32 = arith.constant 0 : i32
    %c0_i32_0 = arith.constant 0 : i32
    %c0_i32_1 = arith.constant 0 : i32
    return %c0_i32, %c0_i32_0 : i32, i32
  }
  func.func @transform_6(%arg0: i32) -> (i32, i32) {
    %c0_i32 = arith.constant 0 : i32
    %c0_i32_0 = arith.constant 0 : i32
    %c0_i32_1 = arith.constant 0 : i32
    return %c0_i32, %c0_i32_0 : i32, i32
  }
}

</mosaic_0001>

<bundles_post_ra>
// kernel: dino_forward.4
= control target key start
LH: loop header
LB: loop body
LE: loop exit
PB: predicated region body
PF: predicated region fallthrough
CT: control target
= control target key end

     0   :  { %v271_v0 = vmov 0   ;;  %vm136_vm0 = vcmask 523264   ;;  %v272_v28 = vmov 0.0   ;;  %vm203_vm1 = vcmask 516096   ;;  %s450_s1 = inlined_call_operand.vmem [shape: bf16[192,64], index: 1, kind: input, shape index: {}]   ;;  %s451_s0 = inlined_call_operand.vmem [shape: f32[32,192], index: 0, kind: input, shape index: {}]   ;;  %s452_s3 = inlined_call_operand.vmem [shape: f32[1,64], index: 3, kind: input, shape index: {}]   ;;  %s453_s5 = inlined_call_operand.vmem [shape: f32[48,64], index: 5, kind: output, shape index: {}]   ;;  %s454_s4 = inlined_call_operand.vmem [shape: f32[24,64], index: 4, kind: input, shape index: {}]   ;;  %s455_s2 = inlined_call_operand.vmem [shape: f32[1,64], index: 2, kind: input, shape index: {}]  }
   0x1   :  { %143 = vmatprep.subr.bf16.mxu0 %v271_v0  ;;  %233 = vmatprep.subr.bf16.mxu1 %v271_v0  ;;  %v259_v1 = vld [vmem:[%s450_s1 + $0x38] sm:$0xff]   ;;  %v260_v2 = vld [vmem:[%s450_s1 + $0x30] sm:$0xff]   ;;  %v261_v3 = vld [vmem:[%s450_s1 + $0x28] sm:$0xff]   ;;  %197 = vst.msk [vmem:[%s453_s5] sm:$0xff] %vm136_vm0, %v272_v28 }
   0x2   :  { %144 = vmatpush1.bf16.msra.mxu0 %v259_v1  ;;  %245 = vmatpush1.bf16.msra.mxu1 %v259_v1  ;;  %v262_v4 = vld [vmem:[%s450_s1 + $0x20] sm:$0xff]   ;;  %v22_v5 = vld [vmem:[%s451_s0 + $0x8] sm:$0xff]  ;;  %v24_v6 = vld [vmem:[%s451_s0 + $0x18] sm:$0xff]  ;;  %198 = vst.msk [vmem:[%s453_s5 + $0x8] sm:$0xff] %vm136_vm0, %v272_v28 }
   0x3   :  { %145 = vmatprep.subr.bf16.mxu0 %v271_v0  ;;  %234 = vmatprep.subr.bf16.mxu1 %v271_v0  ;;  %v26_v7 = vld [vmem:[%s451_s0 + $0x28] sm:$0xff]  ;;  %v30_v8 = vpack.c.bf16 %v24_v6, %v22_v5  ;;  %v28_v9 = vld [vmem:[%s451_s0 + $0x38] sm:$0xff]  ;;  %v264_v12 = vld [vmem:[%s450_s1 + $0x10] sm:$0xff]   ;;  %200 = vst.msk [vmem:[%s453_s5 + $0x18] sm:$0xff] %vm136_vm0, %v272_v28 }
   0x4   :  { %v263_v10 = vld [vmem:[%s450_s1 + $0x18] sm:$0xff]   ;;  %v32_v11 = vpack.c.bf16 %v28_v9, %v26_v7  ;;  %v265_v13 = vld [vmem:[%s450_s1 + $0x8] sm:$0xff]   ;;  %v266_v14 = vld [vmem:[%s450_s1] sm:$0xff]   ;;  %199 = vst.msk [vmem:[%s453_s5 + $0x10] sm:$0xff] %vm136_vm0, %v272_v28 }
   0x5   :  { %231 = vmatprep.mubr.msk.bf16.mxu0 %vm136_vm0, %v30_v8  ;;  %v267_v15 = vld [vmem:[%s450_s1 + $0x58] sm:$0xff]   ;;  %v268_v16 = vld [vmem:[%s450_s1 + $0x50] sm:$0xff]   ;;  %v269_v17 = vld [vmem:[%s450_s1 + $0x48] sm:$0xff]   ;;  %201 = vst.msk [vmem:[%s453_s5 + $0x20] sm:$0xff] %vm136_vm0, %v272_v28 }
   0x6   :  { %146 = vmatpush1.bf16.msra.mxu0 %v260_v2  ;;  %246 = vmatpush1.bf16.msra.mxu1 %v260_v2  ;;  %v270_v18 = vld [vmem:[%s450_s1 + $0x40] sm:$0xff]   ;;  %v23_v20 = vld [vmem:[%s451_s0 + $0x10] sm:$0xff]  ;;  %202 = vst.msk [vmem:[%s453_s5 + $0x28] sm:$0xff] %vm136_vm0, %v272_v28 }
   0x7   :  { %147 = vmatprep.subr.bf16.mxu0 %v271_v0  ;;  %235 = vmatprep.subr.bf16.mxu1 %v271_v0  ;;  %v21_v19 = vld [vmem:[%s451_s0] sm:$0xff]  ;;  %v27_v22 = vld [vmem:[%s451_s0 + $0x30] sm:$0xff] }
   0x8   :  { %232 = vmatprep.mubr.msk.bf16.mxu1 %vm136_vm0, %v32_v11  ;;  %v25_v21 = vld [vmem:[%s451_s0 + $0x20] sm:$0xff]  ;;  %v29_v23 = vpack.c.bf16 %v23_v20, %v21_v19  ;;  %v196_v40 = vld [vmem:[%s454_s4 + $0x9] sm:$0xff] }
   0x9   :  { %v31_v24 = vpack.c.bf16 %v27_v22, %v25_v21  ;;  %v192_v25 = vld [vmem:[%s452_s3] sm:$0x1]  ;;  %v195_v31 = vld [vmem:[%s454_s4 + $0x1] sm:$0xff] }
   0xa   :  { %148 = vmatpush1.bf16.msra.mxu0 %v261_v3  ;;  %247 = vmatpush1.bf16.msra.mxu1 %v261_v3  ;;  %v193_v26 = vld [vmem:[%s454_s4] sm:$0x1] }
   0xb   :  { %149 = vmatprep.subr.bf16.mxu0 %v271_v0  ;;  %236 = vmatprep.subr.bf16.mxu1 %v271_v0  ;;  %v194_v27 = vadd.f32 %v193_v26, %v192_v25  ;;  %v218_v29 = vld [vmem:[%s455_s2] ss:$0 sm:$0xff] }
   0xd   :  { %204 = vst.msk [vmem:[%s453_s5] sm:$0x1] %vm203_vm1, %v194_v27  ;;  %209 = vst.msk [vmem:[%s453_s5 + $0x18] sm:$0x1] %vm203_vm1, %v194_v27 }
   0xe   :  { %150 = vmatpush1.bf16.msra.mxu0 %v262_v4  ;;  %248 = vmatpush1.bf16.msra.mxu1 %v262_v4 }
   0xf   :  { %151 = vmatprep.subr.bf16.mxu0 %v271_v0  ;;  %237 = vmatprep.subr.bf16.mxu1 %v271_v0 }
  0x12   :  { %152 = vmatpush1.bf16.msra.mxu0 %v263_v10  ;;  %249 = vmatpush1.bf16.msra.mxu1 %v263_v10 }
  0x13   :  { %153 = vmatprep.subr.bf16.mxu0 %v271_v0  ;;  %238 = vmatprep.subr.bf16.mxu1 %v271_v0 }
  0x16   :  { %154 = vmatpush1.bf16.msra.mxu0 %v264_v12  ;;  %250 = vmatpush1.bf16.msra.mxu1 %v264_v12 }
  0x17   :  { %155 = vmatprep.subr.bf16.mxu0 %v271_v0  ;;  %239 = vmatprep.subr.bf16.mxu1 %v271_v0 }
  0x1a   :  { %156 = vmatpush1.bf16.msra.mxu0 %v265_v13  ;;  %251 = vmatpush1.bf16.msra.mxu1 %v265_v13 }
  0x1b   :  { %157 = vmatprep.subr.bf16.mxu0 %v271_v0  ;;  %240 = vmatprep.subr.bf16.mxu1 %v271_v0 }
  0x1e   :  { %158 = vmatpush1.bf16.msra.mxu0 %v266_v14  ;;  %252 = vmatpush1.bf16.msra.mxu1 %v266_v14 }
  0x1f   :  { %167 = vmatprep.subr.bf16.mxu0 %v271_v0  ;;  %241 = vmatprep.subr.bf16.mxu1 %v271_v0 }
  0x22   :  { %168 = vmatpush2.bf16.msra.mxu0 %v267_v15  ;;  %253 = vmatpush2.bf16.msra.mxu1 %v267_v15 }
  0x23   :  { %169 = vmatprep.subr.bf16.mxu0 %v271_v0  ;;  %242 = vmatprep.subr.bf16.mxu1 %v271_v0 }
  0x26   :  { %170 = vmatpush2.bf16.msra.mxu0 %v268_v16  ;;  %254 = vmatpush2.bf16.msra.mxu1 %v268_v16 }
  0x27   :  { %171 = vmatprep.subr.bf16.mxu0 %v271_v0  ;;  %243 = vmatprep.subr.bf16.mxu1 %v271_v0 }
  0x2a   :  { %172 = vmatpush2.bf16.msra.mxu0 %v269_v17  ;;  %255 = vmatpush2.bf16.msra.mxu1 %v269_v17 }
  0x2b   :  { %173 = vmatprep.subr.bf16.mxu0 %v271_v0  ;;  %244 = vmatprep.subr.bf16.mxu1 %v271_v0 }
  0x2e   :  { %174 = vmatpush2.bf16.msra.mxu0 %v270_v18  ;;  %256 = vmatpush2.bf16.msra.mxu1 %v270_v18 }
  0x31   :  { %176 = vmatmul.mubr.bf16.vlgmr.msra.gmra.mxu0 %v29_v23  ;;  %184 = vmatmul.mubr.bf16.vlgmr.msra.gmra.mxu1 %v31_v24 }
  0xf1   :  { %v177_v30 = vpop.f32.mrf.mxu0  ;;  %v185_v32 = vpop.f32.mrf.mxu1 }
  0xf2   :  { %v178_v33 = vadd.f32 %v218_v29, %v177_v30  ;;  %v186_v34 = vadd.f32 %v218_v29, %v185_v32 }
  0xf3   :  { %v179_v35 = vpop.f32.mrf.mxu0  ;;  %v187_v36 = vpop.f32.mrf.mxu1 }
  0xf4   :  { %v205_v37 = vadd.f32 %v195_v31, %v178_v33  ;;  %v210_v38 = vadd.f32 %v195_v31, %v186_v34 }
  0xf5   :  { %v180_v39 = vpop.f32.mrf.mxu0  ;;  %v188_v41 = vpop.f32.mrf.mxu1 }
  0xf6   :  { %207 = vst.msk [vmem:[%s453_s5 + $0x1] sm:$0xff] %vm136_vm0, %v205_v37  ;;  %212 = vst.msk [vmem:[%s453_s5 + $0x19] sm:$0xff] %vm136_vm0, %v210_v38  ;;  %v181_v42 = vadd.f32 %v218_v29, %v180_v39  ;;  %v189_v43 = vadd.f32 %v218_v29, %v188_v41 }
  0xf7   :  { %v182_v44 = vpop.f32.mrf.mxu0  ;;  %v190_v45 = vpop.f32.mrf.mxu1 }
  0xf8   :  { %v206_v46 = vadd.f32 %v196_v40, %v181_v42  ;;  %v211_v47 = vadd.f32 %v196_v40, %v189_v43 }
  0xfa   :  { %208 = vst.msk [vmem:[%s453_s5 + $0x9] sm:$0xff] %vm136_vm0, %v206_v46  ;;  %213 = vst.msk [vmem:[%s453_s5 + $0x21] sm:$0xff] %vm136_vm0, %v211_v47 }

// kernel: dino_forward.7
= control target key start
LH: loop header
LB: loop body
LE: loop exit
PB: predicated region body
PF: predicated region fallthrough
CT: control target
= control target key end

     0   :  { %vm46_vm0 = vcmask 523264   ;;  %s933_s0 = inlined_call_operand.vmem [shape: f32[48,64], index: 0, kind: input, shape index: {}]   ;;  %s934_s1 = inlined_call_operand.vmem [shape: f32[1,64], index: 1, kind: input, shape index: {}]   ;;  %s935_s2 = inlined_call_operand.vmem [shape: f32[1,64], index: 2, kind: input, shape index: {}]   ;;  %s936_s3 = inlined_call_operand.vmem [shape: f32[64,16], index: 3, kind: input, shape index: {}]   ;;  %s937_s4 = inlined_call_operand.vmem [shape: f32[64,16], index: 4, kind: input, shape index: {}]   ;;  %s938_s5 = inlined_call_operand.vmem [shape: f32[1,16], index: 5, kind: input, shape index: {}]   ;;  %s939_s6 = inlined_call_operand.hbm [shape: f32[2,16], index: 6, kind: output, shape index: {}]  }
   0x1   :  { %v43_v0 = vld [vmem:[%s933_s0] sm:$0xff]  ;;  %v45_v1 = vld [vmem:[%s933_s0 + $0x10] sm:$0xff]  ;;  %v44_v2 = vld [vmem:[%s933_s0 + $0x8] sm:$0xff] }
   0x2   :  { %v47_v3 = vsel %vm46_vm0, %v43_v0, 0.0  ;;  %v53_v4 = vsel %vm46_vm0, %v45_v1, 0.0  ;;  %v275_v5 = vld [vmem:[%s933_s0 + $0x18] sm:$0xff] }
   0x3   :  { %48 = vadd.xlane.f32.xlu0 %v47_v3  ;;  %54 = vadd.xlane.f32.xlu1 %v53_v4 }
   0x4   :  { %11 = vsyncpa [#allocation3], 0  ;;  %v50_v6 = vsel %vm46_vm0, %v44_v2, 0.0  ;;  %v278_v7 = vsel %vm46_vm0, %v275_v5, 0.0  ;;  %v276_v8 = vld [vmem:[%s933_s0 + $0x20] sm:$0xff]  ;;  %v277_v9 = vld [vmem:[%s933_s0 + $0x28] sm:$0xff] }
   0x5   :  { %v281_v10 = vsel %vm46_vm0, %v276_v8, 0.0  ;;  %v284_v11 = vsel %vm46_vm0, %v277_v9, 0.0  ;;  %v659_v42 = vmov 0.0   ;;  %v755_v43 = vld [vmem:[%s936_s3 + $0x38] sm:$0xff]  ;;  %v763_v44 = vld [vmem:[%s936_s3 + $0x30] sm:$0xff]  ;;  %v770_v45 = vld [vmem:[%s936_s3 + $0x28] sm:$0xff] }
   0x6   :  { %565 = vmatprep.subr.mxu1 %v659_v42  ;;  %546 = vmatprep.subr.mxu0 %v659_v42  ;;  %v777_v46 = vld [vmem:[%s936_s3 + $0x20] sm:$0xff]  ;;  %v784_v47 = vld [vmem:[%s936_s3 + $0x18] sm:$0xff]  ;;  %v791_v48 = vld [vmem:[%s936_s3 + $0x10] sm:$0xff]  ;;  %vm660_vm1 = vmmov 0   ;;  %vm108_vm2 = vcmask 1046528   ;;  %vm273_vm3 = vcmask 122880  }
   0x7   :  { %51 = vadd.xlane.f32.xlu0 %v50_v6  ;;  %279 = vadd.xlane.f32.xlu1 %v278_v7  ;;  %v798_v49 = vld [vmem:[%s936_s3 + $0x8] sm:$0xff]  ;;  %v805_v50 = vld [vmem:[%s936_s3] sm:$0xff]  ;;  %v816_v51 = vld [vmem:[%s937_s4 + $0x38] sm:$0xff]  ;;  %s661_s17 = smov [#allocation2]  }
   0x8   :  { %566 = vmatpush3.msra.mxu1 %v755_v43  ;;  %581 = vmatprep.mubr.msk.f32.mxu1 %vm660_vm1, %v659_v42  ;;  %v823_v52 = vld [vmem:[%s937_s4 + $0x30] sm:$0xff]  ;;  %v830_v53 = vld [vmem:[%s937_s4 + $0x28] sm:$0xff]  ;;  %v837_v54 = vld [vmem:[%s937_s4 + $0x20] sm:$0xff]  ;;  %s496_s18 = sshll.u32 %s661_s17, 4  ;;  %s497_s18 = int_to_ptr.vmem [resolvable:$true] %s496_s18 }
   0x9   :  { %567 = vmatprep.subr.mxu1 %v659_v42  ;;  %562 = vmatprep.mubr.msk.f32.mxu0 %vm660_vm1, %v659_v42  ;;  %v844_v55 = vld [vmem:[%s937_s4 + $0x18] sm:$0xff]  ;;  %v849_v56 = vld [vmem:[%s937_s4 + $0x10] sm:$0xff]  ;;  %v856_v57 = vld [vmem:[%s937_s4 + $0x8] sm:$0xff]  ;;  %s637_s19 = scalar_lea.vmem %s497_s18, 32  ;;  %p642_p1 = scmp.lt.s32.totalorder %s497_s18, %s497_s18 }
   0xa   :  { %568 = vmatpush3.msra.mxu1 %v763_v44  ;;  %547 = vmatpush3.msra.mxu0 %v816_v51  ;;  %v863_v58 = vld [vmem:[%s937_s4] sm:$0xff]  ;;  %p638_p0 = scmp.ne.s32.totalorder %s497_s18, %s637_s19  ;;  %p643_p2 = scmp.lt.s32.totalorder %s637_s19, %s637_s19 }
   0xb   :  { %282 = vadd.xlane.f32.xlu0 %v281_v10  ;;  %285 = vadd.xlane.f32.xlu1 %v284_v11 }
   0xc   :  { %569 = vmatprep.subr.mxu1 %v659_v42  ;;  %548 = vmatprep.subr.mxu0 %v659_v42  ;;  %p644_p3 = por %p643_p2, %p642_p1 }
   0xd   :  { %570 = vmatpush3.msra.mxu1 %v770_v45  ;;  %549 = vmatpush3.msra.mxu0 %v823_v52 }
   0xe   :  { %571 = vmatprep.subr.mxu1 %v659_v42  ;;  %550 = vmatprep.subr.mxu0 %v659_v42  ;;  %p645_p4 = pnand %p644_p3, %p638_p0 }
   0xf   :  { %572 = vmatpush3.msra.mxu1 %v777_v46  ;;  %551 = vmatpush3.msra.mxu0 %v830_v53 }
  0x10   :  { %573 = vmatprep.subr.mxu1 %v659_v42  ;;  %552 = vmatprep.subr.mxu0 %v659_v42 }
  0x11   :  { %574 = vmatpush3.msra.mxu1 %v784_v47  ;;  %553 = vmatpush3.msra.mxu0 %v837_v54 }
  0x12   :  { %575 = vmatprep.subr.mxu1 %v659_v42  ;;  %554 = vmatprep.subr.mxu0 %v659_v42 }
  0x13   :  { %576 = vmatpush3.msra.mxu1 %v791_v48  ;;  %555 = vmatpush3.msra.mxu0 %v844_v55 }
  0x14   :  { %577 = vmatprep.subr.mxu1 %v659_v42  ;;  %556 = vmatprep.subr.mxu0 %v659_v42 }
  0x15   :  { %578 = vmatpush3.msra.mxu1 %v798_v49  ;;  %557 = vmatpush3.msra.mxu0 %v849_v56 }
  0x16   :  { %579 = vmatprep.subr.mxu1 %v659_v42  ;;  %558 = vmatprep.subr.mxu0 %v659_v42 }
  0x17   :  { %580 = vmatpush3.msra.mxu1 %v805_v50  ;;  %559 = vmatpush3.msra.mxu0 %v856_v57 }
  0x18   :  { %603 = vmatprep.subr.mxu1 %v659_v42  ;;  %560 = vmatprep.subr.mxu0 %v659_v42 }
  0x19   :  { %561 = vmatpush3.msra.mxu0 %v863_v58 }
  0x1a   :  { %584 = vmatprep.subr.mxu0 %v659_v42 }
  0x8c   :  { %v49_v12 = vpop.xlane.xlu0 %48  ;;  %v55_v13 = vpop.xlane.xlu1 %54 }
  0x8d   :  { %v57_v14 = vmul.f32 0.015625, %v49_v12  ;;  %v59_v15 = vmul.f32 0.015625, %v55_v13 }
  0x8f   :  { %v721_v16 = vsub.f32 %v43_v0, %v57_v14  ;;  %v723_v17 = vsub.f32 %v45_v1, %v59_v15  ;;  %v504_v14 = vld [vmem:[%s934_s1] ss:$0 sm:$0xff] }
  0x90   :  { %v52_v18 = vpop.xlane.xlu0 %51  ;;  %v280_v19 = vpop.xlane.xlu1 %279 }
  0x91   :  { %v58_v20 = vmul.f32 0.015625, %v52_v18  ;;  %v287_v21 = vmul.f32 0.015625, %v280_v19  ;;  %v63_v22 = vmul.f32 %v721_v16, %v721_v16  ;;  %v65_v23 = vmul.f32 %v723_v17, %v723_v17  ;;  %v505_v18 = vld [vmem:[%s935_s2] ss:$0 sm:$0xff] }
  0x93   :  { %v729_v24 = vsub.f32 %v44_v2, %v58_v20  ;;  %v731_v25 = vsub.f32 %v275_v5, %v287_v21  ;;  %v66_v26 = vsel %vm46_vm0, %v63_v22, 0.0  ;;  %v72_v29 = vsel %vm46_vm0, %v65_v23, 0.0 }
  0x94   :  { %67 = vadd.xlane.f32.xlu0 %v66_v26  ;;  %v283_v27 = vpop.xlane.xlu0 %282  ;;  %v286_v28 = vpop.xlane.xlu1 %285 }
  0x95   :  { %v288_v30 = vmul.f32 0.015625, %v283_v27  ;;  %v289_v31 = vmul.f32 0.015625, %v286_v28  ;;  %v64_v32 = vmul.f32 %v729_v24, %v729_v24  ;;  %v293_v33 = vmul.f32 %v731_v25, %v731_v25 }
  0x97   :  { %v739_v34 = vsub.f32 %v276_v8, %v288_v30  ;;  %v741_v35 = vsub.f32 %v277_v9, %v289_v31  ;;  %v69_v36 = vsel %vm46_vm0, %v64_v32, 0.0  ;;  %v296_v37 = vsel %vm46_vm0, %v293_v33, 0.0 }
  0x98   :  { %73 = vadd.xlane.f32.xlu0 %v72_v29  ;;  %70 = vadd.xlane.f32.xlu1 %v69_v36 }
  0x99   :  { %v294_v38 = vmul.f32 %v739_v34, %v739_v34  ;;  %v295_v39 = vmul.f32 %v741_v35, %v741_v35 }
  0x9b   :  { %v299_v40 = vsel %vm46_vm0, %v294_v38, 0.0  ;;  %v302_v41 = vsel %vm46_vm0, %v295_v39, 0.0 }
  0x9c   :  { %297 = vadd.xlane.f32.xlu1 %v296_v37  ;;  %300 = vadd.xlane.f32.xlu0 %v299_v40 }
  0xa0   :  { %303 = vadd.xlane.f32.xlu1 %v302_v41 }
 0x11d   :  { %v68_v59 = vpop.xlane.xlu0 %67 }
 0x11e   :  { %v75_v60 = vmul.f32 0.015625, %v68_v59 }
 0x120   :  { %v78_v61 = vadd.f32 1e-06, %v75_v60 }
 0x121   :  { %v71_v62 = vpop.xlane.xlu1 %70  ;;  %v74_v63 = vpop.xlane.xlu0 %73 }
 0x122   :  { %625 = vrsqrt.f32 %v78_v61  ;;  %v76_v0 = vmul.f32 0.015625, %v71_v62  ;;  %v77_v1 = vmul.f32 0.015625, %v74_v63 }
 0x124   :  { %v79_v2 = vadd.f32 1e-06, %v76_v0  ;;  %v80_v3 = vadd.f32 1e-06, %v77_v1 }
 0x125   :  { %v298_v4 = vpop.xlane.xlu1 %297  ;;  %v301_v5 = vpop.xlane.xlu0 %300 }
 0x126   :  { %627 = vrsqrt.f32 %v79_v2  ;;  %v305_v6 = vmul.f32 0.015625, %v298_v4  ;;  %v306_v7 = vmul.f32 0.015625, %v301_v5 }
 0x127   :  { %629 = vrsqrt.f32 %v80_v3 }
 0x128   :  { %v308_v8 = vadd.f32 1e-06, %v305_v6  ;;  %v309_v9 = vadd.f32 1e-06, %v306_v7 }
 0x129   :  { %v304_v10 = vpop.xlane.xlu1 %303 }
 0x12a   :  { %631 = vrsqrt.f32 %v308_v8  ;;  %v307_v11 = vmul.f32 0.015625, %v304_v10 }
 0x12b   :  { %633 = vrsqrt.f32 %v309_v9 }
 0x12c   :  { %v310_v12 = vadd.f32 1e-06, %v307_v11 }
 0x12e   :  { %635 = vrsqrt.f32 %v310_v12 }
 0x12f   :  { %v626_v13 = vpop.eup %625 }
 0x130   :  { %v84_v15 = vmul.f32 %v626_v13, %v721_v16  ;;  %v42_v13 = vld [vmem:[%s938_s5] sm:$0x1] }
 0x132   :  { %v93_v19 = vmul.f32 %v504_v14, %v84_v15 }
 0x133   :  { %v628_v20 = vpop.eup %627 }
 0x134   :  { %v630_v21 = vpop.eup %629  ;;  %v85_v22 = vmul.f32 %v628_v20, %v729_v24  ;;  %v102_v23 = vadd.f32 %v505_v18, %v93_v19 }
 0x135   :  { %v86_v26 = vmul.f32 %v630_v21, %v723_v17 }
 0x136   :  { %v94_v27 = vmul.f32 %v504_v14, %v85_v22  ;;  %582 = vmatmul.mubr.msk.f32.vlgmr.msra.gmra.mxu1 %vm46_vm0, %v102_v23  ;;  %v109_v32 = vrot.slane %v102_v23, 1 }
 0x137   :  { %v632_v28 = vpop.eup %631  ;;  %v95_v29 = vmul.f32 %v504_v14, %v86_v26  ;;  %604 = vmatpush3.msra.mxu1 %v755_v43  ;;  %619 = vmatprep.mubr.msk.f32.mxu1 %vm660_vm1, %v659_v42 }
 0x138   :  { %v634_v16 = vpop.eup %633  ;;  %v314_v30 = vmul.f32 %v632_v28, %v731_v25  ;;  %v103_v31 = vadd.f32 %v505_v18, %v94_v27  ;;  %605 = vmatprep.subr.mxu1 %v659_v42 }
 0x139   :  { %v315_v24 = vmul.f32 %v634_v16, %v739_v34  ;;  %606 = vmatpush3.msra.mxu1 %v763_v44  ;;  %v104_v17 = vadd.f32 %v505_v18, %v95_v29 }
 0x13a   :  { %v110_v33 = vrot.slane %v103_v31, 1  ;;  %607 = vmatprep.subr.mxu1 %v659_v42  ;;  %v317_v36 = vmul.f32 %v504_v14, %v314_v30 }
 0x13b   :  { %v636_v37 = vpop.eup %635  ;;  %v318_v38 = vmul.f32 %v504_v14, %v315_v24  ;;  %608 = vmatpush3.msra.mxu1 %v770_v45  ;;  %v112_v39 = vrot.slane %v104_v17, 1 }
 0x13c   :  { %v316_v25 = vmul.f32 %v636_v37, %v741_v35  ;;  %v111_v40 = vsel %vm108_vm2, %v109_v32, %v110_v33  ;;  %609 = vmatprep.subr.mxu1 %v659_v42  ;;  %v320_v34 = vadd.f32 %v505_v18, %v317_v36 }
 0x13d   :  { %610 = vmatpush3.msra.mxu1 %v777_v46  ;;  %v321_v41 = vadd.f32 %v505_v18, %v318_v38  ;;  %v113_v43 = vsel %vm108_vm2, %v110_v33, %v112_v39  ;;  %v116_v44 = vsel %vm46_vm0, %v111_v40, 0.0 }
 0x13e   :  { %v319_v59 = vmul.f32 %v504_v14, %v316_v25  ;;  %611 = vmatprep.subr.mxu1 %v659_v42  ;;  %v326_v60 = vrot.slane %v320_v34, 1  ;;  %v117_v45 = vsel %vm46_vm0, %v113_v43, 0.0 }
 0x13f   :  { %612 = vmatpush3.msra.mxu1 %v784_v47  ;;  %v327_v35 = vrot.slane %v321_v41, 1  ;;  %v118_v61 = vadd.f32 %v117_v45, %v116_v44 }
 0x140   :  { %613 = vmatprep.subr.mxu1 %v659_v42  ;;  %v322_v62 = vadd.f32 %v505_v18, %v319_v59 }
 0x141   :  { %614 = vmatpush3.msra.mxu1 %v791_v48  ;;  %v119_v46 = vrot.slane %v118_v61, 4  ;;  %v328_v63 = vsel %vm108_vm2, %v326_v60, %v327_v35 }
 0x142   :  { %615 = vmatprep.subr.mxu1 %v659_v42  ;;  %v329_v0 = vrot.slane %v322_v62, 1  ;;  %v333_v3 = vsel %vm46_vm0, %v328_v63, 0.0 }
 0x143   :  { %616 = vmatpush3.msra.mxu1 %v798_v49  ;;  %v120_v1 = vadd.f32 %v119_v46, %v118_v61 }
 0x144   :  { %617 = vmatprep.subr.mxu1 %v659_v42  ;;  %v330_v47 = vsel %vm108_vm2, %v327_v35, %v329_v0 }
 0x145   :  { %618 = vmatpush3.msra.mxu1 %v805_v50  ;;  %v121_v2 = vrot.slane %v120_v1, 2  ;;  %v334_v48 = vsel %vm46_vm0, %v330_v47, 0.0 }
 0x146   :  { %620 = vmatmul.mubr.msk.f32.vlgmr.msra.gmra.mxu1 %vm46_vm0, %v320_v34  ;;  %v335_v4 = vadd.f32 %v334_v48, %v333_v3 }
 0x147   :  { %v122_v5 = vadd.f32 %v121_v2, %v120_v1 }
 0x148   :  { %v336_v6 = vrot.slane %v335_v4, 4 }
 0x149   :  { %v123_v7 = vrot.slane %v122_v5, 1 }
 0x14a   :  { %v337_v8 = vadd.f32 %v336_v6, %v335_v4 }
 0x14b   :  { %v124_v49 = vadd.f32 %v123_v7, %v122_v5 }
 0x14c   :  { %v338_v10 = vrot.slane %v337_v8, 2 }
 0x14d   :  { %v126_v9 = vmul.f32 0.0625, %v124_v49 }
 0x14e   :  { %v339_v50 = vadd.f32 %v338_v10, %v337_v8 }
 0x14f   :  { %563 = vmatmul.mubr.msk.f32.vlgmr.msra.gmra.mxu0 %vm46_vm0, %v126_v9 }
 0x150   :  { %585 = vmatpush3.msra.mxu0 %v816_v51  ;;  %600 = vmatprep.mubr.msk.f32.mxu0 %vm660_vm1, %v659_v42  ;;  %v340_v11 = vrot.slane %v339_v50, 1 }
 0x151   :  { %586 = vmatprep.subr.mxu0 %v659_v42 }
 0x152   :  { %587 = vmatpush3.msra.mxu0 %v823_v52  ;;  %v341_v51 = vadd.f32 %v340_v11, %v339_v50 }
 0x153   :  { %588 = vmatprep.subr.mxu0 %v659_v42 }
 0x154   :  { %589 = vmatpush3.msra.mxu0 %v830_v53  ;;  %v342_v52 = vmul.f32 0.0625, %v341_v51 }
 0x155   :  { %590 = vmatprep.subr.mxu0 %v659_v42 }
 0x156   :  { %591 = vmatpush3.msra.mxu0 %v837_v54 }
 0x157   :  { %592 = vmatprep.subr.mxu0 %v659_v42 }
 0x158   :  { %593 = vmatpush3.msra.mxu0 %v844_v55 }
 0x159   :  { %594 = vmatprep.subr.mxu0 %v659_v42 }
 0x15a   :  { %595 = vmatpush3.msra.mxu0 %v849_v56 }
 0x15b   :  { %596 = vmatprep.subr.mxu0 %v659_v42 }
 0x15c   :  { %597 = vmatpush3.msra.mxu0 %v856_v57 }
 0x15d   :  { %598 = vmatprep.subr.mxu0 %v659_v42 }
 0x15e   :  { %599 = vmatpush3.msra.mxu0 %v863_v58 }
 0x15f   :  { %601 = vmatmul.mubr.msk.f32.vlgmr.msra.gmra.mxu0 %vm46_vm0, %v342_v52 }
 0x1f6   :  { %v268_v53 = vpop.f32.mrf.mxu1 }
 0x1f8   :  { %v583_v54 = vpop.f32.mrf.mxu1 }
 0x206   :  { %v484_v12 = vpop.f32.mrf.mxu1 }
 0x208   :  { %v621_v55 = vpop.f32.mrf.mxu1 }
 0x20f   :  { %v196_v56 = vpop.f32.mrf.mxu0 }
 0x210   :  { %v269_v14 = vadd.f32 %v268_v53, %v196_v56 }
 0x211   :  { %v564_v15 = vpop.f32.mrf.mxu0 }
 0x212   :  { %v272_v57 = vadd.f32 %v269_v14, %v42_v13 }
 0x214   :  { %274 = vst.msk [vmem:[#allocation2] sm:$0x1] %vm273_vm3, %v272_v57 }
 0x21f   :  { %v412_v42 = vpop.f32.mrf.mxu0 }
 0x220   :  { %v485_v58 = vadd.f32 %v484_v12, %v412_v42 }
 0x221   :  { %v602_v18 = vpop.f32.mrf.mxu0 }
 0x222   :  { %v488_v19 = vadd.f32 %v485_v58, %v42_v13 }
 0x224   :  { %489 = vst.msk [vmem:[#allocation2 + $0x1] sm:$0x1] %vm273_vm3, %v488_v19 }
 0x225   :  { %648 = shalt.err (!%p645_p4)
}
 0x226   :  { %499 = dma.vmem_to_hbm [thread:$0]  %s497_s18, 32, %s939_s6, [#allocation3]  }
 0x227   :  { %657 = dma.done.wait [#allocation3], 32  }
 0x228   :  { %658 = vsyncadd [#allocation3], 4294967264 }
 0x229   :  { %503 = vsyncpa [#allocation3], 1 }

// kernel: dino_forward.5
= control target key start
LH: loop header
LB: loop body
LE: loop exit
PB: predicated region body
PF: predicated region fallthrough
CT: control target
= control target key end

     0   :  { %vm146_vm0 = vcmask 523264   ;;  %v4018_v58 = vmov 0.0   ;;  %vm3092_vm1 = vmmov 0   ;;  %vm450_vm2 = vcmask 261120   ;;  %s3093_s30 = smov 96   ;;  %s3996_s0 = inlined_call_operand.vmem [shape: f32[48,64], index: 0, kind: input, shape index: {}]   ;;  %s3997_s3 = inlined_call_operand.vmem [shape: bf16[64,64], index: 3, kind: input, shape index: {}]   ;;  %s3998_s5 = inlined_call_operand.vmem [shape: bf16[64,64], index: 5, kind: input, shape index: {}]   ;;  %s3999_s7 = inlined_call_operand.vmem [shape: bf16[64,64], index: 7, kind: input, shape index: {}]   ;;  %s4000_s1 = inlined_call_operand.vmem [shape: f32[1,64], index: 1, kind: input, shape index: {}]   ;;  %s4001_s2 = inlined_call_operand.vmem [shape: f32[1,64], index: 2, kind: input, shape index: {}]   ;;  %s4002_s6 = inlined_call_operand.vmem [shape: f32[1,64], index: 6, kind: input, shape index: {}]   ;;  %s4003_s4 = inlined_call_operand.vmem [shape: f32[1,64], index: 4, kind: input, shape index: {}]   ;;  %s4004_s8 = inlined_call_operand.vmem [shape: f32[1,64], index: 8, kind: input, shape index: {}]   ;;  %s4005_s9 = inlined_call_operand.vmem [shape: bf16[64,64], index: 9, kind: input, shape index: {}]   ;;  %s4006_s10 = inlined_call_operand.vmem [shape: f32[1,64], index: 10, kind: input, shape index: {}]   ;;  %s4007_s13 = inlined_call_operand.vmem [shape: bf16[64,256], index: 13, kind: input, shape index: {}]   ;;  %s4008_s11 = inlined_call_operand.vmem [shape: f32[1,64], index: 11, kind: input, shape index: {}]   ;;  %s4009_s12 = inlined_call_operand.vmem [shape: f32[1,64], index: 12, kind: input, shape index: {}]   ;;  %s4010_s15 = inlined_call_operand.vmem [shape: bf16[256,64], index: 15, kind: input, shape index: {}]   ;;  %s4011_s14 = inlined_call_operand.vmem [shape: f32[1,256], index: 14, kind: input, shape index: {}]   ;;  %s4012_s16 = inlined_call_operand.vmem [shape: f32[1,64], index: 16, kind: input, shape index: {}]   ;;  %s4013_s17 = inlined_call_operand.vmem [shape: f32[48,64], index: 17, kind: output, shape index: {}]  }
   0x1   :  { %4020 = sst [smem:[#allocation2_spill]] %s3996_s0  ;;  %v3221_v22 = vld [vmem:[%s3998_s5 + $0x18] sm:$0xff]   ;;  %v3234_v24 = vld [vmem:[%s3998_s5 + $0x10] sm:$0xff]   ;;  %v3247_v26 = vld [vmem:[%s3998_s5 + $0x8] sm:$0xff]   ;;  %vm549_vm4 = vcmask 195584  }
   0x2   :  { %4021 = sst [smem:[#allocation3_spill]] %s3997_s3  ;;  %2715 = vmatprep.subr.bf16.mxu1 %v3221_v22  ;;  %v3261_v28 = vld [vmem:[%s3998_s5] sm:$0xff]   ;;  %v2940_v29 = vld [vmem:[%s3999_s7 + $0x18] sm:$0xff]   ;;  %v2941_v55 = vld [vmem:[%s3999_s7 + $0x10] sm:$0xff]  }
   0x3   :  { %s4022_s26 = sld [smem:[#allocation2_spill]]  ;;  %2716 = vmatpush3.bf16.msra.mxu1 %v3221_v22  ;;  %v3275_v41 = vld [vmem:[%s4000_s1] ss:$0 sm:$0xff]  ;;  %v2942_v56 = vld [vmem:[%s3999_s7 + $0x8] sm:$0xff]  }
   0x4   :  { %s4023_s19 = sld [smem:[#allocation3_spill]]  ;;  %2717 = vmatprep.subr.bf16.mxu1 %v3234_v24  ;;  %v3281_v47 = vld [vmem:[%s4001_s2] ss:$0 sm:$0xff] }
   0x5   :  { %v2943_v57 = vld [vmem:[%s3999_s7] sm:$0xff]  }
   0x6   :  { %v2447_v59 = vld [vmem:[%s4002_s6] ss:$0 sm:$0xff] }
   0x7   :  { %2718 = vmatpush3.bf16.msra.mxu1 %v3234_v24 }
   0x8   :  { %2719 = vmatprep.subr.bf16.mxu1 %v3247_v26 }
   0x9   :  { %v3189_v0 = vld [vmem:[%s4022_s26] sm:$0xff]  ;;  %v3194_v1 = vld [vmem:[%s4022_s26 + $0x10] sm:$0xff]  ;;  %v3199_v2 = vld [vmem:[%s4022_s26 + $0x8] sm:$0xff] }
   0xa   :  { %v147_v3 = vsel %vm146_vm0, %v3189_v0, 0.0  ;;  %v153_v4 = vsel %vm146_vm0, %v3194_v1, 0.0  ;;  %v150_v5 = vsel %vm146_vm0, %v3199_v2, 0.0  ;;  %v3216_v21 = vld [vmem:[%s4023_s19 + $0x18] sm:$0xff]   ;;  %v3227_v23 = vld [vmem:[%s4023_s19 + $0x10] sm:$0xff]   ;;  %v3241_v25 = vld [vmem:[%s4023_s19 + $0x8] sm:$0xff]  }
   0xb   :  { %148 = vadd.xlane.f32.xlu0 %v147_v3  ;;  %154 = vadd.xlane.f32.xlu1 %v153_v4  ;;  %v3255_v27 = vld [vmem:[%s4023_s19] sm:$0xff]  }
   0xc   :  { %2703 = vmatprep.subr.bf16.mxu0 %v3216_v21  ;;  %2720 = vmatpush3.bf16.msra.mxu1 %v3247_v26 }
   0xd   :  { %2704 = vmatpush3.bf16.msra.mxu0 %v3216_v21  ;;  %2721 = vmatprep.subr.bf16.mxu1 %v3261_v28 }
   0xe   :  { %2705 = vmatprep.subr.bf16.mxu0 %v3227_v23 }
   0xf   :  { %151 = vadd.xlane.f32.xlu0 %v150_v5 }
  0x10   :  { %2722 = vmatpush3.bf16.msra.mxu1 %v3261_v28 }
  0x11   :  { %2706 = vmatpush3.bf16.msra.mxu0 %v3227_v23  ;;  %2739 = vmatprep.subr.mxu1 %v4018_v58 }
  0x12   :  { %2707 = vmatprep.subr.bf16.mxu0 %v3241_v25 }
  0x15   :  { %2708 = vmatpush3.bf16.msra.mxu0 %v3241_v25 }
  0x16   :  { %2709 = vmatprep.subr.bf16.mxu0 %v3255_v27 }
  0x19   :  { %2710 = vmatpush3.bf16.msra.mxu0 %v3255_v27 }
  0x1a   :  { %2727 = vmatprep.subr.bf16.mxu0 %v2940_v29 }
  0x94   :  { %v149_v6 = vpop.xlane.xlu0 %148  ;;  %v155_v7 = vpop.xlane.xlu1 %154 }
  0x95   :  { %v157_v8 = vmul.f32 0.015625, %v149_v6  ;;  %v159_v9 = vmul.f32 0.015625, %v155_v7  ;;  %v2440_v6 = vld [vmem:[%s4003_s4] ss:$0 sm:$0xff] }
  0x97   :  { %v160_v10 = vsub.f32 %v3189_v0, %v157_v8  ;;  %v162_v11 = vsub.f32 %v3194_v1, %v159_v9 }
  0x98   :  { %v152_v12 = vpop.xlane.xlu0 %151 }
  0x99   :  { %v158_v13 = vmul.f32 0.015625, %v152_v12  ;;  %v163_v14 = vmul.f32 %v160_v10, %v160_v10  ;;  %v165_v15 = vmul.f32 %v162_v11, %v162_v11 }
  0x9b   :  { %v161_v16 = vsub.f32 %v3199_v2, %v158_v13  ;;  %v166_v17 = vsel %vm146_vm0, %v163_v14, 0.0  ;;  %v172_v18 = vsel %vm146_vm0, %v165_v15, 0.0  ;;  %v2454_v15 = vld [vmem:[%s4004_s8] ss:$0 sm:$0xff] }
  0x9c   :  { %167 = vadd.xlane.f32.xlu1 %v166_v17 }
  0x9d   :  { %v164_v19 = vmul.f32 %v161_v16, %v161_v16 }
  0x9f   :  { %v169_v20 = vsel %vm146_vm0, %v164_v19, 0.0 }
  0xa0   :  { %173 = vadd.xlane.f32.xlu1 %v172_v18  ;;  %170 = vadd.xlane.f32.xlu0 %v169_v20 }
 0x125   :  { %v168_v30 = vpop.xlane.xlu1 %167 }
 0x126   :  { %v175_v31 = vmul.f32 0.015625, %v168_v30 }
 0x128   :  { %v178_v32 = vadd.f32 1e-06, %v175_v31 }
 0x129   :  { %v174_v33 = vpop.xlane.xlu1 %173  ;;  %v171_v34 = vpop.xlane.xlu0 %170 }
 0x12a   :  { %2976 = vrsqrt.f32 %v178_v32  ;;  %v177_v35 = vmul.f32 0.015625, %v174_v33  ;;  %v176_v36 = vmul.f32 0.015625, %v171_v34 }
 0x12c   :  { %v180_v37 = vadd.f32 1e-06, %v177_v35  ;;  %v179_v38 = vadd.f32 1e-06, %v176_v36 }
 0x12e   :  { %2978 = vrsqrt.f32 %v180_v37 }
 0x12f   :  { %2980 = vrsqrt.f32 %v179_v38 }
 0x137   :  { %v2977_v39 = vpop.eup %2976 }
 0x138   :  { %v184_v40 = vmul.f32 %v2977_v39, %v160_v10  ;;  %v57_v39 = vlaneseq }
 0x13a   :  { %v193_v46 = vmul.f32 %v3275_v41, %v184_v40  ;;  %v58_v40 = vand.u32 127, %v57_v39 }
 0x13b   :  { %v2979_v42 = vpop.eup %2978 }
 0x13c   :  { %v2981_v43 = vpop.eup %2980  ;;  %v186_v44 = vmul.f32 %v2979_v42, %v162_v11  ;;  %v202_v51 = vadd.f32 %v3281_v47, %v193_v46  ;;  %vm59_vm3 = vcmp.lt.s32.totalorder %v58_v40, 17  ;;  %v3094_v42 = vmov -1e+30  }
 0x13d   :  { %v185_v45 = vmul.f32 %v2981_v43, %v161_v16  ;;  %v3364_v43 = vsel %vm59_vm3, 0.0, %v3094_v42 }
 0x13e   :  { %v195_v48 = vmul.f32 %v3275_v41, %v186_v44 }
 0x13f   :  { %v194_v49 = vmul.f32 %v3275_v41, %v185_v45 }
 0x140   :  { %v204_v50 = vadd.f32 %v3281_v47, %v195_v48 }
 0x141   :  { %v203_v52 = vadd.f32 %v3281_v47, %v194_v49 }
 0x142   :  { %v206_v53 = vpack.c.bf16 %v204_v50, %v204_v50 }
 0x143   :  { %v205_v54 = vpack.c.bf16 %v203_v52, %v202_v51 }
 0x145   :  { %2711 = vmatprep.mubr.msk.bf16.mxu0 %vm146_vm0, %v205_v54  ;;  %2723 = vmatprep.mubr.msk.bf16.mxu1 %vm146_vm0, %v205_v54 }
 0x146   :  { %2712 = vmatmul.mubr.msk.bf16.vlgmr.msra.gmra.mxu0 %vm146_vm0, %v206_v53  ;;  %2724 = vmatmul.mubr.msk.bf16.vlgmr.msra.gmra.mxu1 %vm146_vm0, %v206_v53 }
 0x147   :  { %2728 = vmatpush3.bf16.msra.mxu0 %v2940_v29  ;;  %2735 = vmatprep.mubr.msk.bf16.mxu0 %vm146_vm0, %v205_v54 }
 0x148   :  { %2729 = vmatprep.subr.bf16.mxu0 %v2941_v55  ;;  %2745 = vmatprep.mubr.msk.f32.mxu1 %vm3092_vm1, %v4018_v58 }
 0x14b   :  { %2730 = vmatpush3.bf16.msra.mxu0 %v2941_v55 }
 0x14c   :  { %2731 = vmatprep.subr.bf16.mxu0 %v2942_v56 }
 0x14f   :  { %2732 = vmatpush3.bf16.msra.mxu0 %v2942_v56 }
 0x150   :  { %2733 = vmatprep.subr.bf16.mxu0 %v2943_v57 }
 0x153   :  { %2734 = vmatpush3.bf16.msra.mxu0 %v2943_v57 }
 0x154   :  { %2754 = vmatprep.subr.mxu0 %v4018_v58 }
 0x156   :  { %2736 = vmatmul.mubr.msk.bf16.vlgmr.msra.gmra.mxu0 %vm146_vm0, %v206_v53 }
 0x157   :  { %2760 = vmatprep.mubr.msk.f32.mxu0 %vm3092_vm1, %v4018_v58 }
 0x206   :  { %v2713_v60 = vpop.f32.mrf.mxu0  ;;  %v2725_v61 = vpop.f32.mrf.mxu1 }
 0x207   :  { %v364_v62 = vadd.f32 %v2725_v61, %v2447_v59  ;;  %v286_v16 = vadd.f32 %v2713_v60, %v2440_v6 }
 0x208   :  { %v277_v63 = vpop.f32.mrf.mxu0  ;;  %v355_v3 = vpop.f32.mrf.mxu1 }
 0x209   :  { %684 = vrot.lane.b32.xlu0 %v364_v62, %s3093_s30  ;;  %2740 = vmatpush3.xpose.msk.msra.mxu1 %vm450_vm2, %v364_v62  ;;  %v278_v12 = vadd.f32 %v2440_v6, %v277_v63  ;;  %v356_v13 = vadd.f32 %v2447_v59, %v355_v3  ;;  %v449_v20 = vmul.f32 0.17677669, %v286_v16 }
 0x20a   :  { %v2714_v4 = vpop.f32.mrf.mxu0  ;;  %v2726_v5 = vpop.f32.mrf.mxu1  ;;  %2741 = vmatprep.subr.mxu1 %v4018_v58 }
 0x20b   :  { %v447_v14 = vmul.f32 0.17677669, %v278_v12 }
 0x20c   :  { %v280_v7 = vpop.f32.mrf.mxu0  ;;  %v358_v8 = vpop.f32.mrf.mxu1 }
 0x20d   :  { %v281_v9 = vadd.f32 %v2440_v6, %v280_v7  ;;  %v359_v10 = vadd.f32 %v2447_v59, %v358_v8 }
 0x20f   :  { %v448_v11 = vmul.f32 0.17677669, %v281_v9  ;;  %682 = vrot.lane.b32.xlu1 %v359_v10, %s3093_s30  ;;  %2742 = vmatpush3.xpose.msk.msra.mxu1 %vm450_vm2, %v359_v10 }
 0x210   :  { %2743 = vmatprep.subr.mxu1 %v4018_v58 }
 0x211   :  { %676 = vrot.lane.b32.xlu0 %v448_v11, %s3093_s30 }
 0x213   :  { %680 = vrot.lane.b32.xlu1 %v356_v13, %s3093_s30  ;;  %2744 = vmatpush3.xpose.msk.msra.mxu1 %vm450_vm2, %v356_v13 }
 0x214   :  { %2769 = vmatprep.subr.mxu1 %v4018_v58 }
 0x216   :  { %v2737_v17 = vpop.f32.mrf.mxu0  ;;  %2746 = vmatmul.mubr.msk.f32.vlgmr.msra.gmra.mxu1 %vm450_vm2, %v447_v14 }
 0x217   :  { %v3329_v18 = vadd.f32 %v2737_v17, %v2454_v15  ;;  %674 = vrot.lane.b32.xlu1 %v447_v14, %s3093_s30  ;;  %2748 = vmatprep.mubr.msk.f32.mxu1 %vm3092_vm1, %v4018_v58 }
 0x218   :  { %v433_v19 = vpop.f32.mrf.mxu0 }
 0x219   :  { %2755 = vmatpush3.msra.mxu0 %v3329_v18  ;;  %v3343_v32 = vadd.f32 %v2454_v15, %v433_v19 }
 0x21a   :  { %v2738_v29 = vpop.f32.mrf.mxu0  ;;  %2749 = vmatmul.mubr.msk.f32.gmra.mxu1 %vm450_vm2, %v448_v11  ;;  %2756 = vmatprep.subr.mxu0 %v4018_v58 }
 0x21b   :  { %678 = vrot.lane.b32.xlu1 %v449_v20, %s3093_s30  ;;  %2751 = vmatprep.mubr.msk.f32.mxu1 %vm3092_vm1, %v4018_v58 }
 0x21c   :  { %v436_v30 = vpop.f32.mrf.mxu0 }
 0x21d   :  { %v3340_v31 = vadd.f32 %v2454_v15, %v436_v30 }
 0x21e   :  { %2752 = vmatmul.mubr.msk.f32.gmra.mxu1 %vm450_vm2, %v449_v20 }
 0x21f   :  { %2757 = vmatpush3.msra.mxu0 %v3340_v31  ;;  %2775 = vmatprep.mubr.msk.f32.mxu1 %vm3092_vm1, %v4018_v58 }
 0x220   :  { %2758 = vmatprep.subr.mxu0 %v4018_v58 }
 0x221   :  { %2759 = vmatpush3.msra.mxu0 %v3343_v32 }
 0x222   :  { %2784 = vmatprep.subr.mxu0 %v4018_v58 }
 0x27b   :  { %v685_v33 = vpop.permute.xlu0 %684 }
 0x27c   :  { %2770 = vmatpush3.xpose.msk.msra.mxu1 %vm450_vm2, %v685_v33 }
 0x27d   :  { %2771 = vmatprep.subr.mxu1 %v4018_v58 }
 0x281   :  { %v683_v34 = vpop.permute.xlu1 %682 }
 0x282   :  { %2772 = vmatpush3.xpose.msk.msra.mxu1 %vm450_vm2, %v683_v34 }
 0x283   :  { %2773 = vmatprep.subr.mxu1 %v4018_v58  ;;  %v677_v37 = vpop.permute.xlu0 %676 }
 0x285   :  { %v681_v35 = vpop.permute.xlu1 %680 }
 0x286   :  { %2774 = vmatpush3.xpose.msk.msra.mxu1 %vm450_vm2, %v681_v35 }
 0x289   :  { %v675_v36 = vpop.permute.xlu1 %674 }
 0x28a   :  { %2776 = vmatmul.mubr.msk.f32.vlgmr.msra.gmra.mxu1 %vm450_vm2, %v675_v36 }
 0x28b   :  { %2778 = vmatprep.mubr.msk.f32.mxu1 %vm3092_vm1, %v4018_v58 }
 0x28d   :  { %v679_v38 = vpop.permute.xlu1 %678 }
 0x28e   :  { %2779 = vmatmul.mubr.msk.f32.gmra.mxu1 %vm450_vm2, %v677_v37 }
 0x28f   :  { %2781 = vmatprep.mubr.msk.f32.mxu1 %vm3092_vm1, %v4018_v58 }
 0x292   :  { %2782 = vmatmul.mubr.msk.f32.gmra.mxu1 %vm450_vm2, %v679_v38 }
 0x2d6   :  { %v535_v44 = vpop.f32.mrf.mxu1 }
 0x2d7   :  { %v536_v45 = vadd.f32 %v535_v44, %v3364_v43 }
 0x2d8   :  { %v2747_v46 = vpop.f32.mrf.mxu1 }
 0x2d9   :  { %v550_v48 = vsel %vm549_vm4, %v536_v45, -inf }
 0x2da   :  { %551 = vmax.xlane.f32.xlu0 %v550_v48  ;;  %v540_v49 = vpop.f32.mrf.mxu1 }
 0x2db   :  { %v541_v50 = vadd.f32 %v540_v49, %v3364_v43 }
 0x2dc   :  { %v2750_v51 = vpop.f32.mrf.mxu1 }
 0x2dd   :  { %v553_v52 = vsel %vm549_vm4, %v541_v50, -inf }
 0x2de   :  { %554 = vmax.xlane.f32.xlu1 %v553_v52  ;;  %v545_v53 = vpop.f32.mrf.mxu1 }
 0x2df   :  { %v546_v54 = vadd.f32 %v545_v53, %v3364_v43 }
 0x2e0   :  { %v2753_v55 = vpop.f32.mrf.mxu1 }
 0x2e1   :  { %v556_v56 = vsel %vm549_vm4, %v546_v54, -inf }
 0x2e2   :  { %557 = vmax.xlane.f32.xlu0 %v556_v56 }
 0x34a   :  { %v764_v57 = vpop.f32.mrf.mxu1 }
 0x34b   :  { %v765_v59 = vadd.f32 %v764_v57, %v3364_v43 }
 0x34c   :  { %v2777_v60 = vpop.f32.mrf.mxu1 }
 0x34d   :  { %v778_v61 = vsel %vm549_vm4, %v765_v59, -inf }
 0x34e   :  { %779 = vmax.xlane.f32.xlu0 %v778_v61  ;;  %v769_v62 = vpop.f32.mrf.mxu1 }
 0x34f   :  { %v770_v63 = vadd.f32 %v769_v62, %v3364_v43 }
 0x350   :  { %v2780_v3 = vpop.f32.mrf.mxu1 }
 0x351   :  { %v781_v4 = vsel %vm549_vm4, %v770_v63, -inf }
 0x352   :  { %782 = vmax.xlane.f32.xlu0 %v781_v4  ;;  %v774_v5 = vpop.f32.mrf.mxu1 }
 0x353   :  { %v775_v6 = vadd.f32 %v774_v5, %v3364_v43 }
 0x354   :  { %v2783_v7 = vpop.f32.mrf.mxu1 }
 0x355   :  { %v784_v8 = vsel %vm549_vm4, %v775_v6, -inf }
 0x356   :  { %785 = vmax.xlane.f32.xlu1 %v784_v8 }
 0x363   :  { %v552_v9 = vpop.xlane.xlu0 %551 }
 0x364   :  { %v559_v10 = vsub.f32 %v536_v45, %v552_v9 }
 0x366   :  { %v562_v11 = vmul.f32 1.442695, %v559_v10 }
 0x367   :  { %v555_v12 = vpop.xlane.xlu1 %554 }
 0x368   :  { %2982 = vpow2.f32 %v562_v11  ;;  %v560_v13 = vsub.f32 %v541_v50, %v555_v12 }
 0x36a   :  { %v564_v14 = vmul.f32 1.442695, %v560_v13 }
 0x36b   :  { %v558_v15 = vpop.xlane.xlu0 %557 }
 0x36c   :  { %2984 = vpow2.f32 %v564_v14  ;;  %v561_v16 = vsub.f32 %v546_v54, %v558_v15 }
 0x36e   :  { %v566_v17 = vmul.f32 1.442695, %v561_v16 }
 0x370   :  { %2986 = vpow2.f32 %v566_v17 }
 0x375   :  { %v2983_v19 = vpop.eup %2982 }
 0x376   :  { %v568_v20 = vsel %vm549_vm4, %v2983_v19, 0.0 }
 0x377   :  { %569 = vadd.xlane.f32.xlu0 %v568_v20  ;;  %v3411_v20 = vld [vmem:[%s4005_s9 + $0x18] sm:$0xff]  }
 0x378   :  { %2799 = vmatprep.subr.bf16.mxu1 %v3411_v20 }
 0x379   :  { %v2985_v29 = vpop.eup %2984  ;;  %2800 = vmatpush3.bf16.msra.mxu1 %v3411_v20 }
 0x37a   :  { %v571_v30 = vsel %vm549_vm4, %v2985_v29, 0.0 }
 0x37b   :  { %572 = vadd.xlane.f32.xlu1 %v571_v30  ;;  %v3425_v30 = vld [vmem:[%s4005_s9 + $0x8] sm:$0xff]  }
 0x37d   :  { %v2987_v33 = vpop.eup %2986 }
 0x37e   :  { %v574_v34 = vsel %vm549_vm4, %v2987_v33, 0.0 }
 0x37f   :  { %575 = vadd.xlane.f32.xlu0 %v574_v34 }
 0x3d7   :  { %v780_v35 = vpop.xlane.xlu0 %779 }
 0x3d8   :  { %v787_v36 = vsub.f32 %v765_v59, %v780_v35 }
 0x3da   :  { %v790_v37 = vmul.f32 1.442695, %v787_v36 }
 0x3db   :  { %v783_v38 = vpop.xlane.xlu0 %782 }
 0x3dc   :  { %2988 = vpow2.f32 %v790_v37  ;;  %v788_v40 = vsub.f32 %v770_v63, %v783_v38 }
 0x3de   :  { %v792_v42 = vmul.f32 1.442695, %v788_v40 }
 0x3df   :  { %v786_v49 = vpop.xlane.xlu1 %785 }
 0x3e0   :  { %2990 = vpow2.f32 %v792_v42  ;;  %v789_v52 = vsub.f32 %v775_v6, %v786_v49  ;;  %v2947_v42 = vld [vmem:[%s4005_s9] sm:$0xff]  }
 0x3e2   :  { %v794_v54 = vmul.f32 1.442695, %v789_v52 }
 0x3e9   :  { %v2989_v44 = vpop.eup %2988 }
 0x3ea   :  { %v796_v45 = vsel %vm549_vm4, %v2989_v44, 0.0 }
 0x3eb   :  { %797 = vadd.xlane.f32.xlu1 %v796_v45 }
 0x3ed   :  { %v2991_v46 = vpop.eup %2990 }
 0x3ee   :  { %v799_v48 = vsel %vm549_vm4, %v2991_v46, 0.0 }
 0x3ef   :  { %800 = vadd.xlane.f32.xlu0 %v799_v48 }
 0x3fc   :  { %816 = vrot.lane.b32.xlu1 %v3340_v31, %s3093_s30 }
 0x400   :  { %v570_v50 = vpop.xlane.xlu0 %569 }
 0x401   :  { %2992 = vrcp.f32 %v570_v50 }
 0x404   :  { %v573_v51 = vpop.xlane.xlu1 %572 }
 0x405   :  { %2994 = vrcp.f32 %v573_v51  ;;  %818 = vrot.lane.b32.xlu0 %v3329_v18, %s3093_s30 }
 0x408   :  { %v576_v53 = vpop.xlane.xlu0 %575 }
 0x409   :  { %2996 = vrcp.f32 %v576_v53 }
 0x40a   :  { %2998 = vpow2.f32 %v794_v54 }
 0x40e   :  { %v2993_v55 = vpop.eup %2992 }
 0x40f   :  { %v580_v56 = vmul.f32 %v2993_v55, %v2983_v19 }
 0x411   :  { %2761 = vmatmul.mubr.msk.f32.vlgmr.msra.gmra.mxu0 %vm549_vm4, %v580_v56 }
 0x412   :  { %v2995_v57 = vpop.eup %2994  ;;  %2763 = vmatprep.mubr.msk.f32.mxu0 %vm3092_vm1, %v4018_v58 }
 0x413   :  { %v581_v31 = vmul.f32 %v2995_v57, %v2985_v29  ;;  %v3417_v29 = vld [vmem:[%s4005_s9 + $0x10] sm:$0xff]   ;;  %v2487_v57 = vld [vmem:[%s4006_s10] ss:$0 sm:$0xff] }
 0x414   :  { %2801 = vmatprep.subr.bf16.mxu1 %v3417_v29 }
 0x415   :  { %2764 = vmatmul.mubr.msk.f32.gmra.mxu0 %vm549_vm4, %v581_v31  ;;  %2802 = vmatpush3.bf16.msra.mxu1 %v3417_v29 }
 0x416   :  { %v2997_v59 = vpop.eup %2996  ;;  %2766 = vmatprep.mubr.msk.f32.mxu0 %vm3092_vm1, %v4018_v58  ;;  %2807 = vmatprep.subr.bf16.mxu1 %v3425_v30 }
 0x417   :  { %v582_v18 = vmul.f32 %v2997_v59, %v2987_v33  ;;  %v2999_v60 = vpop.eup %2998 }
 0x418   :  { %v802_v61 = vsel %vm549_vm4, %v2999_v60, 0.0 }
 0x419   :  { %2767 = vmatmul.mubr.msk.f32.gmra.mxu0 %vm549_vm4, %v582_v18 }
 0x41a   :  { %2790 = vmatprep.mubr.msk.f32.mxu0 %vm3092_vm1, %v4018_v58 }
 0x420   :  { %803 = vadd.xlane.f32.xlu1 %v802_v61 }
 0x431   :  { %814 = vrot.lane.b32.xlu1 %v3343_v32, %s3093_s30 }
 0x474   :  { %v798_v62 = vpop.xlane.xlu1 %797 }
 0x475   :  { %3000 = vrcp.f32 %v798_v62 }
 0x478   :  { %v801_v63 = vpop.xlane.xlu0 %800  ;;  %v817_v4 = vpop.permute.xlu1 %816 }
 0x479   :  { %3002 = vrcp.f32 %v801_v63 }
 0x47c   :  { %v819_v3 = vpop.permute.xlu0 %818 }
 0x47d   :  { %2785 = vmatpush3.msra.mxu0 %v819_v3 }
 0x47e   :  { %2786 = vmatprep.subr.mxu0 %v4018_v58 }
 0x47f   :  { %2787 = vmatpush3.msra.mxu0 %v817_v4 }
 0x480   :  { %2788 = vmatprep.subr.mxu0 %v4018_v58 }
 0x482   :  { %v3001_v6 = vpop.eup %3000 }
 0x483   :  { %v808_v7 = vmul.f32 %v3001_v6, %v2989_v44 }
 0x486   :  { %v3003_v9 = vpop.eup %3002 }
 0x487   :  { %v809_v32 = vmul.f32 %v3003_v9, %v2991_v46 }
 0x4a9   :  { %v804_v5 = vpop.xlane.xlu1 %803 }
 0x4aa   :  { %3004 = vrcp.f32 %v804_v5 }
 0x4ad   :  { %v815_v8 = vpop.permute.xlu1 %814 }
 0x4ae   :  { %2789 = vmatpush3.msra.mxu0 %v815_v8 }
 0x4af   :  { %2791 = vmatmul.mubr.msk.f32.vlgmr.msra.gmra.mxu0 %vm549_vm4, %v808_v7  ;;  %v1441_v7 = vld [vmem:[%s4022_s26 + $0x28] sm:$0xff] }
 0x4b0   :  { %2793 = vmatprep.mubr.msk.f32.mxu0 %vm3092_vm1, %v4018_v58  ;;  %v1448_v8 = vsel %vm146_vm0, %v1441_v7, 0.0 }
 0x4b3   :  { %2794 = vmatmul.mubr.msk.f32.gmra.mxu0 %vm549_vm4, %v809_v32 }
 0x4b4   :  { %2796 = vmatprep.mubr.msk.f32.mxu0 %vm3092_vm1, %v4018_v58 }
 0x4b7   :  { %v3005_v10 = vpop.eup %3004 }
 0x4b8   :  { %v810_v11 = vmul.f32 %v3005_v10, %v2999_v60  ;;  %v1440_v60 = vld [vmem:[%s4022_s26 + $0x20] sm:$0xff] }
 0x4b9   :  { %v1445_v3 = vsel %vm146_vm0, %v1440_v60, 0.0 }
 0x4ba   :  { %2797 = vmatmul.mubr.msk.f32.gmra.mxu0 %vm549_vm4, %v810_v11 }
 0x4d1   :  { %v658_v12 = vpop.f32.mrf.mxu0 }
 0x4d3   :  { %v2762_v13 = vpop.f32.mrf.mxu0 }
 0x4d5   :  { %v663_v14 = vpop.f32.mrf.mxu0 }
 0x4d6   :  { %v672_v15 = vpack.c.bf16 %v663_v14, %v658_v12 }
 0x4d7   :  { %v2765_v16 = vpop.f32.mrf.mxu0 }
 0x4d9   :  { %v668_v17 = vpop.f32.mrf.mxu0 }
 0x4da   :  { %v673_v45 = vpack.c.bf16 %v668_v17, %v668_v17 }
 0x4db   :  { %v2768_v19 = vpop.f32.mrf.mxu0 }
 0x56f   :  { %v898_v33 = vpop.f32.mrf.mxu0 }
 0x571   :  { %v2792_v34 = vpop.f32.mrf.mxu0 }
 0x573   :  { %v903_v35 = vpop.f32.mrf.mxu0 }
 0x574   :  { %v912_v36 = vpack.c.bf16 %v903_v35, %v898_v33 }
 0x575   :  { %v2795_v37 = vpop.f32.mrf.mxu0 }
 0x576   :  { %2803 = vmatprep.mubr.msk.bf16.mxu1 %vm450_vm2, %v912_v36 }
 0x57a   :  { %v908_v38 = vpop.f32.mrf.mxu0 }
 0x57b   :  { %v913_v40 = vpack.c.bf16 %v908_v38, %v908_v38 }
 0x57c   :  { %v2798_v44 = vpop.f32.mrf.mxu0 }
 0x57d   :  { %2804 = vmatmul.mubr.msk.bf16.vlgmr.msra.gmra.mxu1 %vm450_vm2, %v913_v40 }
 0x57e   :  { %2808 = vmatpush3.bf16.msra.mxu1 %v3425_v30  ;;  %2811 = vmatprep.mubr.msk.bf16.mxu1 %vm450_vm2, %v672_v15 }
 0x57f   :  { %2809 = vmatprep.subr.bf16.mxu1 %v2947_v42 }
 0x582   :  { %2810 = vmatpush3.bf16.msra.mxu1 %v2947_v42 }
 0x585   :  { %2812 = vmatmul.mubr.msk.bf16.vlgmr.msra.gmra.mxu1 %vm450_vm2, %v673_v45 }
 0x63d   :  { %v2805_v46 = vpop.f32.mrf.mxu1 }
 0x63f   :  { %v966_v48 = vpop.f32.mrf.mxu1 }
 0x641   :  { %v2806_v49 = vpop.f32.mrf.mxu1 }
 0x643   :  { %v969_v50 = vpop.f32.mrf.mxu1 }
 0x645   :  { %v2813_v51 = vpop.f32.mrf.mxu1 }
 0x646   :  { %v1041_v55 = vadd.f32 %v2813_v51, %v2805_v46 }
 0x647   :  { %v1032_v52 = vpop.f32.mrf.mxu1 }
 0x648   :  { %v1033_v53 = vadd.f32 %v1032_v52, %v966_v48  ;;  %v1048_v61 = vadd.f32 %v1041_v55, %v3194_v1  ;;  %v1439_v1 = vld [vmem:[%s4022_s26 + $0x18] sm:$0xff] }
 0x649   :  { %v2814_v54 = vpop.f32.mrf.mxu1  ;;  %v1442_v6 = vsel %vm146_vm0, %v1439_v1, 0.0 }
 0x64a   :  { %v1046_v56 = vadd.f32 %v1033_v53, %v3189_v0  ;;  %v3452_v4 = vadd.f32 %v2487_v57, %v1048_v61  ;;  %v3519_v61 = vld [vmem:[%s4007_s13 + $0x10] ss:$8 sps:$4 sm:$0xff]  }
 0x64b   :  { %v1035_v31 = vpop.f32.mrf.mxu1 }
 0x64c   :  { %v3440_v59 = vadd.f32 %v2487_v57, %v1046_v56  ;;  %v1036_v18 = vadd.f32 %v1035_v31, %v969_v50  ;;  %v2950_v56 = vld [vmem:[%s4007_s13 + $0x34] ss:$8 sps:$4 sm:$0xff]   ;;  %v2953_v31 = vld [vmem:[%s4007_s13 + $0x24] ss:$8 sps:$4 sm:$0xff]  }
 0x64d   :  { %1182 = vmatprep.subr.bf16.mxu0 %v2950_v56 }
 0x64e   :  { %v1047_v62 = vadd.f32 %v1036_v18, %v3199_v2  ;;  %v1058_v63 = vsel %vm146_vm0, %v3440_v59, 0.0  ;;  %v1064_v2 = vsel %vm146_vm0, %v3452_v4, 0.0  ;;  %v2951_v18 = vld [vmem:[%s4007_s13 + $0x20] ss:$8 sps:$4 sm:$0xff]  }
 0x64f   :  { %1059 = vadd.xlane.f32.xlu1 %v1058_v63  ;;  %v3531_v63 = vld [vmem:[%s4007_s13] ss:$8 sps:$4 sm:$0xff]  }
 0x650   :  { %v3449_v0 = vadd.f32 %v2487_v57, %v1047_v62  ;;  %v2948_v57 = vld [vmem:[%s4007_s13 + $0x30] ss:$8 sps:$4 sm:$0xff]   ;;  %v3526_v62 = vld [vmem:[%s4007_s13 + $0x4] ss:$8 sps:$4 sm:$0xff]  }
 0x651   :  { %1183 = vmatpush1.bf16.msra.mxu0 %v2948_v57 }
 0x652   :  { %v1061_v5 = vsel %vm146_vm0, %v3449_v0, 0.0  ;;  %1184 = vmatprep.subr.bf16.mxu0 %v2953_v31 }
 0x653   :  { %1062 = vadd.xlane.f32.xlu0 %v1061_v5  ;;  %1446 = vadd.xlane.f32.xlu1 %v1445_v3  ;;  %v4016_v3 = vmov 0  }
 0x654   :  { %1206 = vmatprep.mubr.bf16.mxu0 %v4016_v3 }
 0x655   :  { %1185 = vmatpush1.bf16.msra.mxu0 %v2951_v18 }
 0x657   :  { %1065 = vadd.xlane.f32.xlu0 %v1064_v2 }
 0x65b   :  { %1443 = vadd.xlane.f32.xlu0 %v1442_v6 }
 0x65f   :  { %1449 = vadd.xlane.f32.xlu0 %v1448_v8 }
 0x6d8   :  { %v1060_v9 = vpop.xlane.xlu1 %1059 }
 0x6d9   :  { %v1067_v32 = vmul.f32 0.015625, %v1060_v9 }
 0x6db   :  { %v3467_v10 = vsub.f32 %v3440_v59, %v1067_v32 }
 0x6dc   :  { %v1063_v11 = vpop.xlane.xlu0 %1062  ;;  %v1447_v12 = vpop.xlane.xlu1 %1446 }
 0x6dd   :  { %v1068_v13 = vmul.f32 0.015625, %v1063_v11  ;;  %v1073_v14 = vmul.f32 %v3467_v10, %v3467_v10  ;;  %v1452_v15 = vmul.f32 0.015625, %v1447_v12 }
 0x6df   :  { %v3472_v16 = vsub.f32 %v3449_v0, %v1068_v13  ;;  %v1076_v17 = vsel %vm146_vm0, %v1073_v14, 0.0  ;;  %v3477_v35 = vsub.f32 %v1440_v60, %v1452_v15  ;;  %v3514_v60 = vld [vmem:[%s4007_s13 + $0x14] ss:$8 sps:$4 sm:$0xff]  }
 0x6e0   :  { %v1066_v19 = vpop.xlane.xlu0 %1065  ;;  %1077 = vadd.xlane.f32.xlu1 %v1076_v17  ;;  %1186 = vmatprep.subr.bf16.mxu0 %v3514_v60 }
 0x6e1   :  { %v1069_v33 = vmul.f32 0.015625, %v1066_v19  ;;  %v1074_v34 = vmul.f32 %v3472_v16, %v3472_v16  ;;  %v1458_v44 = vmul.f32 %v3477_v35, %v3477_v35  ;;  %1187 = vmatpush1.bf16.msra.mxu0 %v3519_v61 }
 0x6e2   :  { %1188 = vmatprep.subr.bf16.mxu0 %v3526_v62 }
 0x6e3   :  { %v3480_v36 = vsub.f32 %v3452_v4, %v1069_v33  ;;  %v1079_v37 = vsel %vm146_vm0, %v1074_v34, 0.0  ;;  %v1463_v51 = vsel %vm146_vm0, %v1458_v44, 0.0 }
 0x6e4   :  { %1080 = vadd.xlane.f32.xlu0 %v1079_v37  ;;  %v1444_v38 = vpop.xlane.xlu0 %1443 }
 0x6e5   :  { %v1451_v40 = vmul.f32 0.015625, %v1444_v38  ;;  %v1075_v42 = vmul.f32 %v3480_v36, %v3480_v36  ;;  %1189 = vmatpush1.bf16.msra.mxu0 %v3531_v63 }
 0x6e6   :  { %2815 = vmatprep.subr.bf16.mxu0 %v3216_v21 }
 0x6e7   :  { %v3487_v45 = vsub.f32 %v1439_v1, %v1451_v40  ;;  %v1082_v46 = vsel %vm146_vm0, %v1075_v42, 0.0  ;;  %v2488_v42 = vld [vmem:[%s4008_s11] ss:$0 sm:$0xff] }
 0x6e8   :  { %v1450_v48 = vpop.xlane.xlu0 %1449  ;;  %1083 = vadd.xlane.f32.xlu1 %v1082_v46 }
 0x6e9   :  { %v1453_v49 = vmul.f32 0.015625, %v1450_v48  ;;  %v1457_v50 = vmul.f32 %v3487_v45, %v3487_v45 }
 0x6eb   :  { %v3493_v52 = vsub.f32 %v1441_v7, %v1453_v49  ;;  %v1460_v53 = vsel %vm146_vm0, %v1457_v50, 0.0  ;;  %v2489_v49 = vld [vmem:[%s4009_s12] ss:$0 sm:$0xff] }
 0x6ec   :  { %1461 = vadd.xlane.f32.xlu0 %v1460_v53  ;;  %1464 = vadd.xlane.f32.xlu1 %v1463_v51 }
 0x6ed   :  { %v1459_v54 = vmul.f32 %v3493_v52, %v3493_v52 }
 0x6ef   :  { %v1466_v55 = vsel %vm146_vm0, %v1459_v54, 0.0 }
 0x6f0   :  { %1467 = vadd.xlane.f32.xlu0 %v1466_v55 }
 0x769   :  { %v1078_v5 = vpop.xlane.xlu1 %1077 }
 0x76a   :  { %v1085_v1 = vmul.f32 0.015625, %v1078_v5 }
 0x76c   :  { %v1088_v2 = vadd.f32 1e-06, %v1085_v1 }
 0x76d   :  { %v1081_v6 = vpop.xlane.xlu0 %1080 }
 0x76e   :  { %3006 = vrsqrt.f32 %v1088_v2  ;;  %v1086_v7 = vmul.f32 0.015625, %v1081_v6 }
 0x770   :  { %v1089_v8 = vadd.f32 1e-06, %v1086_v7 }
 0x771   :  { %v1084_v9 = vpop.xlane.xlu1 %1083 }
 0x772   :  { %3008 = vrsqrt.f32 %v1089_v8  ;;  %v1087_v32 = vmul.f32 0.015625, %v1084_v9  ;;  %v3639_v9 = vld [vmem:[%s4010_s15 + $0x58] sm:$0xff]  }
 0x774   :  { %v1090_v11 = vadd.f32 1e-06, %v1087_v32  ;;  %v3644_v32 = vld [vmem:[%s4010_s15 + $0x18] sm:$0xff]  }
 0x775   :  { %v1462_v12 = vpop.xlane.xlu0 %1461  ;;  %v1465_v13 = vpop.xlane.xlu1 %1464 }
 0x776   :  { %3010 = vrsqrt.f32 %v1090_v11  ;;  %v1469_v14 = vmul.f32 0.015625, %v1462_v12  ;;  %v1470_v15 = vmul.f32 0.015625, %v1465_v13  ;;  %v3651_v11 = vld [vmem:[%s4010_s15 + $0x50] sm:$0xff]   ;;  %v3663_v13 = vld [vmem:[%s4010_s15 + $0x48] sm:$0xff]  }
 0x777   :  { %v3656_v12 = vld [vmem:[%s4010_s15 + $0x10] sm:$0xff]  }
 0x778   :  { %v1472_v17 = vadd.f32 1e-06, %v1469_v14  ;;  %v1473_v19 = vadd.f32 1e-06, %v1470_v15  ;;  %v3668_v14 = vld [vmem:[%s4010_s15 + $0x8] sm:$0xff]   ;;  %v3675_v15 = vld [vmem:[%s4010_s15 + $0x40] sm:$0xff]  }
 0x779   :  { %v1468_v33 = vpop.xlane.xlu0 %1467 }
 0x77a   :  { %3012 = vrsqrt.f32 %v1472_v17  ;;  %v1471_v34 = vmul.f32 0.015625, %v1468_v33  ;;  %v3680_v17 = vld [vmem:[%s4010_s15] sm:$0xff]   ;;  %v1119_v33 = vshrl.u32 %v57_v39, 7 }
 0x77b   :  { %v3007_v37 = vpop.eup %3006  ;;  %3014 = vrsqrt.f32 %v1473_v19  ;;  %v3687_v19 = vld [vmem:[%s3999_s7 + $0x18] sm:$0xff]  }
 0x77c   :  { %v1094_v38 = vmul.f32 %v3007_v37, %v3467_v10  ;;  %v1474_v40 = vadd.f32 1e-06, %v1471_v34  ;;  %v1120_v34 = vsub.s32 0, %v1119_v33  ;;  %v109_v37 = vld [vmem:[%s4011_s14] sm:$0x3] }
 0x77e   :  { %3016 = vrsqrt.f32 %v1474_v40  ;;  %v1103_v46 = vmul.f32 %v2488_v42, %v1094_v38  ;;  %v1124_v38 = vsub.s32 1, %v1119_v33  ;;  %v3694_v40 = vrot.slane %v109_v37, %v1120_v34 }
 0x77f   :  { %v3009_v44 = vpop.eup %3008 }
 0x780   :  { %v1095_v48 = vmul.f32 %v3009_v44, %v3472_v16  ;;  %v1112_v53 = vadd.f32 %v2489_v49, %v1103_v46 }
 0x782   :  { %v1104_v50 = vmul.f32 %v2488_v42, %v1095_v48 }
 0x783   :  { %v3011_v51 = vpop.eup %3010 }
 0x784   :  { %v1113_v54 = vadd.f32 %v2489_v49, %v1104_v50  ;;  %v1096_v10 = vmul.f32 %v3011_v51, %v3480_v36 }
 0x786   :  { %v1115_v55 = vpack.c.bf16 %v1113_v54, %v1112_v53  ;;  %v1105_v56 = vmul.f32 %v2488_v42, %v1096_v10  ;;  %v3696_v42 = vrot.slane %v109_v37, %v1124_v38 }
 0x787   :  { %v3013_v57 = vpop.eup %3012 }
 0x788   :  { %v3015_v31 = vpop.eup %3014  ;;  %2498 = vmatmul.mubr.msk.bf16.vlgmr.msra.gmra.mxu0 %vm146_vm0, %v1115_v55  ;;  %v1478_v18 = vmul.f32 %v3013_v57, %v3487_v45  ;;  %v1114_v5 = vadd.f32 %v2489_v49, %v1105_v56 }
 0x789   :  { %2816 = vmatpush3.bf16.msra.mxu0 %v3216_v21  ;;  %1216 = vmatprep.mubr.bf16.mxu0 %v4016_v3  ;;  %v1479_v16 = vmul.f32 %v3015_v31, %v3477_v35 }
 0x78a   :  { %2817 = vmatprep.subr.bf16.mxu0 %v3227_v23  ;;  %v1481_v1 = vmul.f32 %v3275_v41, %v1478_v18  ;;  %v1116_v35 = vpack.c.bf16 %v1114_v5, %v1114_v5 }
 0x78b   :  { %v3017_v36 = vpop.eup %3016  ;;  %v1482_v2 = vmul.f32 %v3275_v41, %v1479_v16 }
 0x78c   :  { %v1480_v6 = vmul.f32 %v3017_v36, %v3493_v52  ;;  %v1484_v7 = vadd.f32 %v3281_v47, %v1481_v1  ;;  %v3632_v52 = vld [vmem:[%s4010_s15 + $0x20] sm:$0xff]  }
 0x78d   :  { %2818 = vmatpush3.bf16.msra.mxu0 %v3227_v23  ;;  %v1485_v21 = vadd.f32 %v3281_v47, %v1482_v2 }
 0x78e   :  { %v1483_v45 = vmul.f32 %v3275_v41, %v1480_v6  ;;  %2819 = vmatprep.subr.bf16.mxu0 %v3241_v25 }
 0x78f   :  { %v3560_v8 = vpack.c.bf16 %v1485_v21, %v1484_v7 }
 0x790   :  { %2499 = vmatmul.mubr.msk.bf16.gmra.mxu0 %vm146_vm0, %v1116_v35  ;;  %v1486_v23 = vadd.f32 %v3281_v47, %v1483_v45  ;;  %v3627_v47 = vld [vmem:[%s4010_s15 + $0x60] sm:$0xff]  }
 0x791   :  { %2820 = vmatpush3.bf16.msra.mxu0 %v3241_v25  ;;  %2823 = vmatprep.mubr.msk.bf16.mxu0 %vm146_vm0, %v3560_v8  ;;  %v3603_v25 = vld [vmem:[%s4010_s15 + $0x70] sm:$0xff]  }
 0x792   :  { %2821 = vmatprep.subr.bf16.mxu0 %v3255_v27  ;;  %v3570_v41 = vpack.c.bf16 %v1486_v23, %v1486_v23 }
 0x795   :  { %2822 = vmatpush3.bf16.msra.mxu0 %v3255_v27  ;;  %v3615_v27 = vld [vmem:[%s4010_s15 + $0x68] sm:$0xff]  }
 0x796   :  { %2827 = vmatprep.subr.bf16.mxu0 %v3221_v22 }
 0x798   :  { %2824 = vmatmul.mubr.msk.bf16.vlgmr.msra.gmra.mxu0 %vm146_vm0, %v3570_v41 }
 0x799   :  { %2828 = vmatpush3.bf16.msra.mxu0 %v3221_v22  ;;  %2835 = vmatprep.mubr.msk.bf16.mxu0 %vm146_vm0, %v3560_v8  ;;  %v3591_v22 = vld [vmem:[%s4010_s15 + $0x78] sm:$0xff]  }
 0x79a   :  { %2829 = vmatprep.subr.bf16.mxu0 %v3234_v24  ;;  %2597 = vmatprep.subr.bf16.mxu1 %v3591_v22 }
 0x79d   :  { %2830 = vmatpush3.bf16.msra.mxu0 %v3234_v24  ;;  %v3596_v24 = vld [vmem:[%s4010_s15 + $0x38] sm:$0xff]  }
 0x79e   :  { %2831 = vmatprep.subr.bf16.mxu0 %v3247_v26  ;;  %2598 = vmatpush3.bf16.msra.mxu1 %v3596_v24 }
 0x79f   :  { %2599 = vmatprep.subr.bf16.mxu1 %v3603_v25 }
 0x7a1   :  { %2832 = vmatpush3.bf16.msra.mxu0 %v3247_v26  ;;  %v3608_v26 = vld [vmem:[%s4010_s15 + $0x30] sm:$0xff]  }
 0x7a2   :  { %2833 = vmatprep.subr.bf16.mxu0 %v3261_v28  ;;  %2600 = vmatpush3.bf16.msra.mxu1 %v3608_v26 }
 0x7a3   :  { %2601 = vmatprep.subr.bf16.mxu1 %v3615_v27 }
 0x7a5   :  { %2834 = vmatpush3.bf16.msra.mxu0 %v3261_v28  ;;  %v3620_v28 = vld [vmem:[%s4010_s15 + $0x28] sm:$0xff]  }
 0x7a6   :  { %2851 = vmatprep.subr.mxu0 %v4018_v58  ;;  %2602 = vmatpush3.bf16.msra.mxu1 %v3620_v28 }
 0x7a7   :  { %2603 = vmatprep.subr.bf16.mxu1 %v3627_v47 }
 0x7a8   :  { %2836 = vmatmul.mubr.msk.bf16.vlgmr.msra.gmra.mxu0 %vm146_vm0, %v3570_v41 }
 0x7a9   :  { %2857 = vmatprep.mubr.msk.f32.mxu0 %vm3092_vm1, %v4018_v58 }
 0x7aa   :  { %2604 = vmatpush3.bf16.msra.mxu1 %v3632_v52 }
 0x7ab   :  { %2605 = vmatprep.subr.bf16.mxu1 %v3639_v9 }
 0x7ae   :  { %2606 = vmatpush3.bf16.msra.mxu1 %v3644_v32 }
 0x7af   :  { %2607 = vmatprep.subr.bf16.mxu1 %v3651_v11 }
 0x7b2   :  { %2608 = vmatpush3.bf16.msra.mxu1 %v3656_v12 }
 0x7b3   :  { %2609 = vmatprep.subr.bf16.mxu1 %v3663_v13 }
 0x7b6   :  { %2610 = vmatpush3.bf16.msra.mxu1 %v3668_v14 }
 0x7b7   :  { %2611 = vmatprep.subr.bf16.mxu1 %v3675_v15 }
 0x7ba   :  { %2612 = vmatpush3.bf16.msra.mxu1 %v3680_v17 }
 0x7bb   :  { %2839 = vmatprep.subr.bf16.mxu1 %v3687_v19 }
 0x848   :  { %v1208_v44 = vpop.f32.mrf.mxu0 }
 0x849   :  { %v3699_v46 = vadd.f32 %v1208_v44, %v3694_v40 }
 0x84a   :  { %v1210_v48 = vpop.f32.mrf.mxu0 }
 0x84b   :  { %v1225_v49 = vmul.f32 %v3699_v46, %v3699_v46  ;;  %v3704_v39 = vadd.f32 %v1210_v48, %v3696_v42 }
 0x84c   :  { %v1212_v50 = vpop.f32.mrf.mxu0 }
 0x84d   :  { %v1231_v51 = vmul.f32 %v1225_v49, %v3699_v46  ;;  %v1226_v53 = vmul.f32 %v3704_v39, %v3704_v39  ;;  %v3710_v54 = vadd.f32 %v1212_v50, %v3694_v40 }
 0x84e   :  { %v1214_v10 = vpop.f32.mrf.mxu0 }
 0x84f   :  { %v1237_v55 = vmul.f32 0.044715, %v1231_v51  ;;  %v1232_v56 = vmul.f32 %v1226_v53, %v3704_v39  ;;  %v1227_v57 = vmul.f32 %v3710_v54, %v3710_v54  ;;  %v3716_v31 = vadd.f32 %v1214_v10, %v3696_v42 }
 0x850   :  { %v1218_v18 = vpop.f32.mrf.mxu0 }
 0x851   :  { %v1243_v16 = vadd.f32 %v1237_v55, %v3699_v46  ;;  %v1238_v5 = vmul.f32 0.044715, %v1232_v56  ;;  %v1233_v1 = vmul.f32 %v1227_v57, %v3710_v54  ;;  %v1228_v36 = vmul.f32 %v3716_v31, %v3716_v31 }
 0x852   :  { %v3723_v2 = vadd.f32 %v1218_v18, %v3694_v40  ;;  %v1220_v6 = vpop.f32.mrf.mxu0 }
 0x853   :  { %v1249_v7 = vmul.f32 0.7978846, %v1243_v16  ;;  %v1244_v21 = vadd.f32 %v1238_v5, %v3704_v39  ;;  %v1239_v45 = vmul.f32 0.044715, %v1233_v1  ;;  %v1234_v35 = vmul.f32 %v1228_v36, %v3716_v31 }
 0x854   :  { %v1229_v23 = vmul.f32 %v3723_v2, %v3723_v2  ;;  %v3730_v33 = vadd.f32 %v1220_v6, %v3696_v42  ;;  %v1222_v34 = vpop.f32.mrf.mxu0 }
 0x855   :  { %v1250_v37 = vmul.f32 0.7978846, %v1244_v21  ;;  %v1245_v38 = vadd.f32 %v1239_v45, %v3710_v54  ;;  %v1240_v44 = vmul.f32 0.044715, %v1234_v35  ;;  %3018 = vtanh.f32 %v1249_v7 }
 0x856   :  { %v1235_v48 = vmul.f32 %v1229_v23, %v3723_v2  ;;  %v1230_v49 = vmul.f32 %v3730_v33, %v3730_v33  ;;  %v1223_v50 = vpop.f32.mrf.mxu0 }
 0x857   :  { %3020 = vtanh.f32 %v1250_v37  ;;  %v1251_v51 = vmul.f32 0.7978846, %v1245_v38  ;;  %v1246_v53 = vadd.f32 %v1240_v44, %v3716_v31 }
 0x858   :  { %v1241_v10 = vmul.f32 0.044715, %v1235_v48  ;;  %v1236_v55 = vmul.f32 %v1230_v49, %v3730_v33  ;;  %v2825_v56 = vpop.f32.mrf.mxu0 }
 0x859   :  { %3022 = vtanh.f32 %v1251_v51  ;;  %v1252_v57 = vmul.f32 0.7978846, %v1246_v53  ;;  %v3073_v51 = vld [vmem:[%s4002_s6] ss:$0 sm:$0xff] }
 0x85a   :  { %v1247_v18 = vadd.f32 %v1241_v10, %v3723_v2  ;;  %v1242_v16 = vmul.f32 0.044715, %v1236_v55  ;;  %v1529_v5 = vpop.f32.mrf.mxu0 }
 0x85b   :  { %3024 = vtanh.f32 %v1252_v57 }
 0x85c   :  { %v1253_v1 = vmul.f32 0.7978846, %v1247_v18  ;;  %v1248_v36 = vadd.f32 %v1242_v16, %v3730_v33  ;;  %v2826_v6 = vpop.f32.mrf.mxu0 }
 0x85e   :  { %3026 = vtanh.f32 %v1253_v1  ;;  %v1254_v7 = vmul.f32 0.7978846, %v1248_v36  ;;  %v1532_v34 = vpop.f32.mrf.mxu0  ;;  %v3074_v1 = vld [vmem:[%s4003_s4] ss:$0 sm:$0xff] }
 0x85f   :  { %v1530_v36 = vadd.f32 %v3074_v1, %v1529_v5 }
 0x860   :  { %3028 = vtanh.f32 %v1254_v7 }
 0x861   :  { %v1639_v3 = vmul.f32 0.17677669, %v1530_v36 }
 0x862   :  { %v3019_v21 = vpop.eup %3018 }
 0x863   :  { %v1261_v37 = vadd.f32 1.0, %v3019_v21 }
 0x864   :  { %v3021_v45 = vpop.eup %3020 }
 0x865   :  { %v1262_v35 = vadd.f32 1.0, %v3021_v45  ;;  %v1267_v18 = vmul.f32 0.5, %v1261_v37 }
 0x866   :  { %v3023_v23 = vpop.eup %3022 }
 0x867   :  { %v1263_v38 = vadd.f32 1.0, %v3023_v23  ;;  %v1268_v49 = vmul.f32 0.5, %v1262_v35 }
 0x868   :  { %v3025_v44 = vpop.eup %3024  ;;  %v2837_v48 = vpop.f32.mrf.mxu0 }
 0x869   :  { %v1269_v50 = vmul.f32 0.5, %v1263_v38  ;;  %v1586_v53 = vadd.f32 %v3073_v51, %v2837_v48  ;;  %v1264_v10 = vadd.f32 1.0, %v3025_v44  ;;  %v1274_v7 = vmul.f32 %v1268_v49, %v3704_v39 }
 0x86a   :  { %v1577_v55 = vpop.f32.mrf.mxu0  ;;  %v1273_v48 = vmul.f32 %v1267_v18, %v3699_v46 }
 0x86b   :  { %v3027_v57 = vpop.eup %3026  ;;  %1874 = vrot.lane.b32.xlu1 %v1586_v53, %s3093_s30  ;;  %2852 = vmatpush3.xpose.msk.msra.mxu0 %vm450_vm2, %v1586_v53  ;;  %v1270_v16 = vmul.f32 0.5, %v1264_v10  ;;  %v1275_v45 = vmul.f32 %v1269_v50, %v3710_v54  ;;  %v1578_v35 = vadd.f32 %v3073_v51, %v1577_v55  ;;  %v1538_v53 = vadd.f32 %v3074_v1, %v2825_v56 }
 0x86c   :  { %v2838_v6 = vpop.f32.mrf.mxu0  ;;  %2853 = vmatprep.subr.mxu0 %v4018_v58  ;;  %v1265_v37 = vadd.f32 1.0, %v3027_v57  ;;  %v1533_v58 = vadd.f32 %v3074_v1, %v1532_v34 }
 0x86d   :  { %v3029_v21 = vpop.eup %3028  ;;  %v1276_v23 = vmul.f32 %v1270_v16, %v3716_v31  ;;  %v1279_v39 = vpack.c.bf16 %v1275_v45, %v1273_v48  ;;  %v4024_v31 = vmov 0.0   ;;  %v1641_v46 = vmul.f32 0.17677669, %v1538_v53 }
 0x86e   :  { %v1580_v38 = vpop.f32.mrf.mxu0  ;;  %v1266_v44 = vadd.f32 1.0, %v3029_v21  ;;  %v1271_v54 = vmul.f32 0.5, %v1265_v37  ;;  %v1640_v50 = vmul.f32 0.17677669, %v1533_v58 }
 0x86f   :  { %v1581_v10 = vadd.f32 %v3073_v51, %v1580_v38  ;;  %1870 = vrot.lane.b32.xlu1 %v1578_v35, %s3093_s30  ;;  %v1280_v5 = vpack.c.bf16 %v1276_v23, %v1274_v7  ;;  %v3075_v51 = vld [vmem:[%s3999_s7 + $0x10] sm:$0xff]  }
 0x870   :  { %v1272_v6 = vmul.f32 0.5, %v1266_v44  ;;  %v1277_v34 = vmul.f32 %v1271_v54, %v3723_v2 }
 0x871   :  { %1872 = vrot.lane.b32.xlu0 %v1581_v10, %s3093_s30  ;;  %2854 = vmatpush3.xpose.msk.msra.mxu0 %vm450_vm2, %v1581_v10 }
 0x872   :  { %1417 = vmatprep.mubr.bf16.mxu1 %v1280_v5  ;;  %2855 = vmatprep.subr.mxu0 %v4024_v31  ;;  %v1278_v49 = vmul.f32 %v1272_v6, %v3730_v33  ;;  %v1281_v58 = vpack.c.bf16 %v1277_v34, %v1277_v34 }
 0x873   :  { %1418 = vmatmul.mubr.bf16.vlgmr.msra.gmra.mxu1 %v1279_v39  ;;  %1864 = vrot.lane.b32.xlu1 %v1639_v3, %s3093_s30 }
 0x874   :  { %2840 = vmatpush3.bf16.msra.mxu1 %v3687_v19  ;;  %v1282_v56 = vpack.c.bf16 %v1278_v49, %v1278_v49  ;;  %v3076_v19 = vld [vmem:[%s3999_s7 + $0x8] sm:$0xff]  }
 0x875   :  { %1868 = vrot.lane.b32.xlu0 %v1641_v46, %s3093_s30  ;;  %2856 = vmatpush3.xpose.msk.msra.mxu0 %vm450_vm2, %v1578_v35 }
 0x876   :  { %1425 = vmatprep.mubr.bf16.mxu1 %v1282_v56  ;;  %2841 = vmatprep.subr.bf16.mxu1 %v3075_v51 }
 0x877   :  { %1866 = vrot.lane.b32.xlu1 %v1640_v50, %s3093_s30  ;;  %2881 = vmatprep.subr.mxu0 %v4024_v31 }
 0x878   :  { %2842 = vmatpush3.bf16.msra.mxu1 %v3075_v51  ;;  %2858 = vmatmul.mubr.msk.f32.vlgmr.msra.gmra.mxu0 %vm450_vm2, %v1639_v3  ;;  %v3077_v3 = vld [vmem:[%s3999_s7] sm:$0xff]  }
 0x879   :  { %2843 = vmatprep.subr.bf16.mxu1 %v3076_v19  ;;  %2860 = vmatprep.mubr.msk.f32.mxu0 %vm3092_vm1, %v4024_v31 }
 0x87b   :  { %1426 = vmatmul.mubr.bf16.gmra.mxu1 %v1281_v58  ;;  %v3078_v58 = vld [vmem:[%s4004_s8] ss:$0 sm:$0xff] }
 0x87c   :  { %2844 = vmatpush3.bf16.msra.mxu1 %v3076_v19  ;;  %2847 = vmatprep.mubr.msk.bf16.mxu1 %vm146_vm0, %v3560_v8 }
 0x87d   :  { %2861 = vmatmul.mubr.msk.f32.gmra.mxu0 %vm450_vm2, %v1640_v50  ;;  %2845 = vmatprep.subr.bf16.mxu1 %v3077_v3 }
 0x87e   :  { %2863 = vmatprep.mubr.msk.f32.mxu0 %vm3092_vm1, %v4024_v31 }
 0x880   :  { %2846 = vmatpush3.bf16.msra.mxu1 %v3077_v3 }
 0x881   :  { %2864 = vmatmul.mubr.msk.f32.gmra.mxu0 %vm450_vm2, %v1641_v46  ;;  %2866 = vmatprep.subr.mxu1 %v4024_v31 }
 0x882   :  { %2887 = vmatprep.mubr.msk.f32.mxu0 %vm3092_vm1, %v4024_v31 }
 0x883   :  { %2848 = vmatmul.mubr.msk.bf16.vlgmr.msra.gmra.mxu1 %vm146_vm0, %v3570_v41 }
 0x884   :  { %2872 = vmatprep.mubr.msk.f32.mxu1 %vm3092_vm1, %v4024_v31 }
 0x8dd   :  { %v1875_v8 = vpop.permute.xlu1 %1874 }
 0x8de   :  { %2882 = vmatpush3.xpose.msk.msra.mxu0 %vm450_vm2, %v1875_v8 }
 0x8df   :  { %2883 = vmatprep.subr.mxu0 %v4024_v31 }
 0x8e1   :  { %v1871_v2 = vpop.permute.xlu1 %1870 }
 0x8e3   :  { %v1873_v33 = vpop.permute.xlu0 %1872 }
 0x8e4   :  { %2884 = vmatpush3.xpose.msk.msra.mxu0 %vm450_vm2, %v1873_v33 }
 0x8e5   :  { %2885 = vmatprep.subr.mxu0 %v4024_v31  ;;  %v1865_v55 = vpop.permute.xlu1 %1864 }
 0x8e7   :  { %v1869_v57 = vpop.permute.xlu0 %1868 }
 0x8e8   :  { %2886 = vmatpush3.xpose.msk.msra.mxu0 %vm450_vm2, %v1871_v2 }
 0x8e9   :  { %2911 = vmatprep.subr.bf16.mxu0 %v3411_v20  ;;  %v1867_v41 = vpop.permute.xlu1 %1866 }
 0x8eb   :  { %2888 = vmatmul.mubr.msk.f32.vlgmr.msra.gmra.mxu0 %vm450_vm2, %v1865_v55 }
 0x8ec   :  { %2890 = vmatprep.mubr.msk.f32.mxu0 %vm3092_vm1, %v4024_v31  ;;  %2912 = vmatpush3.bf16.msra.mxu0 %v3411_v20  ;;  %v3810_v20 = vld [vmem:[%s4012_s16] ss:$0 sm:$0xff] }
 0x8ed   :  { %2913 = vmatprep.subr.bf16.mxu0 %v3417_v29 }
 0x8ef   :  { %2891 = vmatmul.mubr.msk.f32.gmra.mxu0 %vm450_vm2, %v1867_v41 }
 0x8f0   :  { %2893 = vmatprep.mubr.msk.f32.mxu0 %vm3092_vm1, %v4024_v31  ;;  %2914 = vmatpush3.bf16.msra.mxu0 %v3417_v29 }
 0x8f1   :  { %2919 = vmatprep.subr.bf16.mxu0 %v3425_v30 }
 0x8f3   :  { %2894 = vmatmul.mubr.msk.f32.gmra.mxu0 %vm450_vm2, %v1869_v57 }
 0x933   :  { %v2613_v18 = vpop.f32.mrf.mxu1 }
 0x935   :  { %v2614_v16 = vpop.f32.mrf.mxu1 }
 0x936   :  { %v2615_v1 = vadd.f32 %v2614_v16, %v2613_v18 }
 0x937   :  { %v2616_v36 = vpop.f32.mrf.mxu1 }
 0x938   :  { %v1420_v7 = vadd.f32 %v2615_v1, %v3810_v20  ;;  %v1726_v21 = vpop.f32.mrf.mxu0 }
 0x939   :  { %v3814_v45 = vadd.f32 %v1726_v21, %v3364_v43  ;;  %v2617_v29 = vpop.f32.mrf.mxu1 }
 0x93a   :  { %v1433_v30 = vadd.f32 %v1420_v7, %v3440_v59  ;;  %v2618_v35 = vadd.f32 %v2617_v29, %v2616_v36  ;;  %v2859_v23 = vpop.f32.mrf.mxu0 }
 0x93b   :  { %v2619_v37 = vpop.f32.mrf.mxu1  ;;  %v1740_v38 = vsel %vm549_vm4, %v3814_v45, -inf }
 0x93c   :  { %1436 = vst.msk [vmem:[%s4013_s17] sm:$0xff] %vm146_vm0, %v1433_v30  ;;  %v1423_v44 = vadd.f32 %v2618_v35, %v3810_v20  ;;  %1741 = vmax.xlane.f32.xlu1 %v1740_v38 }
 0x93d   :  { %v1731_v48 = vpop.f32.mrf.mxu0  ;;  %v2620_v53 = vpop.f32.mrf.mxu1 }
 0x93e   :  { %v1434_v10 = vadd.f32 %v1423_v44, %v3449_v0  ;;  %v1732_v59 = vadd.f32 %v1731_v48, %v3364_v43  ;;  %v2621_v5 = vadd.f32 %v2620_v53, %v2619_v37 }
 0x93f   :  { %v2862_v6 = vpop.f32.mrf.mxu0  ;;  %v2622_v39 = vpop.f32.mrf.mxu1 }
 0x940   :  { %1437 = vst.msk [vmem:[%s4013_s17 + $0x8] sm:$0xff] %vm146_vm0, %v1434_v10  ;;  %v1428_v54 = vadd.f32 %v2621_v5, %v3810_v20  ;;  %v1743_v49 = vsel %vm549_vm4, %v1732_v59, -inf }
 0x941   :  { %1744 = vmax.xlane.f32.xlu0 %v1743_v49  ;;  %v1736_v46 = vpop.f32.mrf.mxu0  ;;  %v2623_v56 = vpop.f32.mrf.mxu1 }
 0x942   :  { %v1435_v50 = vadd.f32 %v1428_v54, %v3452_v4  ;;  %v1737_v0 = vadd.f32 %v1736_v46, %v3364_v43 }
 0x943   :  { %v2865_v34 = vpop.f32.mrf.mxu0  ;;  %v2849_v51 = vpop.f32.mrf.mxu1 }
 0x944   :  { %1438 = vst.msk [vmem:[%s4013_s17 + $0x10] sm:$0xff] %vm146_vm0, %v1435_v50  ;;  %v1634_v19 = vadd.f32 %v3078_v58, %v2849_v51  ;;  %v1746_v3 = vsel %vm549_vm4, %v1737_v0, -inf }
 0x945   :  { %1747 = vmax.xlane.f32.xlu0 %v1746_v3  ;;  %v1625_v8 = vpop.f32.mrf.mxu1 }
 0x946   :  { %2867 = vmatpush3.msra.mxu1 %v1634_v19  ;;  %v1626_v55 = vadd.f32 %v3078_v58, %v1625_v8 }
 0x947   :  { %v2850_v4 = vpop.f32.mrf.mxu1  ;;  %2868 = vmatprep.subr.mxu1 %v4024_v31 }
 0x949   :  { %v1628_v2 = vpop.f32.mrf.mxu1 }
 0x94a   :  { %v3843_v33 = vadd.f32 %v3078_v58, %v1628_v2 }
 0x94c   :  { %2869 = vmatpush3.msra.mxu1 %v3843_v33 }
 0x94d   :  { %2870 = vmatprep.subr.mxu1 %v4024_v31 }
 0x94e   :  { %2871 = vmatpush3.msra.mxu1 %v1626_v55 }
 0x94f   :  { %2896 = vmatprep.subr.mxu1 %v4024_v31 }
 0x9ab   :  { %v1954_v41 = vpop.f32.mrf.mxu0 }
 0x9ac   :  { %v1955_v57 = vadd.f32 %v1954_v41, %v3364_v43 }
 0x9ad   :  { %v2889_v18 = vpop.f32.mrf.mxu0 }
 0x9ae   :  { %v1968_v16 = vsel %vm549_vm4, %v1955_v57, -inf }
 0x9af   :  { %1969 = vmax.xlane.f32.xlu0 %v1968_v16  ;;  %v1959_v1 = vpop.f32.mrf.mxu0 }
 0x9b0   :  { %v1960_v36 = vadd.f32 %v1959_v1, %v3364_v43 }
 0x9b1   :  { %v2892_v7 = vpop.f32.mrf.mxu0 }
 0x9b2   :  { %v1971_v21 = vsel %vm549_vm4, %v1960_v36, -inf }
 0x9b3   :  { %1972 = vmax.xlane.f32.xlu1 %v1971_v21  ;;  %v1964_v29 = vpop.f32.mrf.mxu0 }
 0x9b4   :  { %v1965_v30 = vadd.f32 %v1964_v29, %v3364_v43 }
 0x9b5   :  { %v2895_v35 = vpop.f32.mrf.mxu0 }
 0x9b6   :  { %v1974_v23 = vsel %vm549_vm4, %v1965_v30, -inf }
 0x9b7   :  { %1975 = vmax.xlane.f32.xlu0 %v1974_v23 }
 0x9c4   :  { %2008 = vrot.lane.b32.xlu1 %v1634_v19, %s3093_s30 }
 0x9c5   :  { %v1742_v44 = vpop.xlane.xlu1 %1741 }
 0x9c6   :  { %v1749_v53 = vsub.f32 %v3814_v45, %v1742_v44 }
 0x9c8   :  { %v1752_v5 = vmul.f32 1.442695, %v1749_v53 }
 0x9ca   :  { %v1745_v37 = vpop.xlane.xlu0 %1744 }
 0x9cb   :  { %v1750_v38 = vsub.f32 %v1732_v59, %v1745_v37 }
 0x9cd   :  { %v1754_v48 = vmul.f32 1.442695, %v1750_v38 }
 0x9ce   :  { %v1748_v10 = vpop.xlane.xlu0 %1747 }
 0x9cf   :  { %3030 = vpow2.f32 %v1754_v48  ;;  %v1751_v6 = vsub.f32 %v1737_v0, %v1748_v10 }
 0x9d0   :  { %3032 = vpow2.f32 %v1752_v5 }
 0x9d1   :  { %v1756_v39 = vmul.f32 1.442695, %v1751_v6 }
 0x9d3   :  { %3034 = vpow2.f32 %v1756_v39 }
 0x9dc   :  { %v3031_v43 = vpop.eup %3030 }
 0x9dd   :  { %v1761_v54 = vsel %vm549_vm4, %v3031_v43, 0.0  ;;  %v3033_v49 = vpop.eup %3032 }
 0x9de   :  { %1762 = vadd.xlane.f32.xlu0 %v1761_v54  ;;  %v1758_v46 = vsel %vm549_vm4, %v3033_v49, 0.0 }
 0x9e0   :  { %v3035_v56 = vpop.eup %3034 }
 0x9e1   :  { %v1764_v59 = vsel %vm549_vm4, %v3035_v56, 0.0 }
 0x9e8   :  { %1759 = vadd.xlane.f32.xlu1 %v1758_v46  ;;  %v3081_v46 = vld [vmem:[%s4007_s13 + $0x34] ss:$8 sps:$4 sm:$0xff]  }
 0x9ec   :  { %1765 = vadd.xlane.f32.xlu1 %v1764_v59  ;;  %v4025_v59 = vmov 0  }
 0xa38   :  { %v1970_v45 = vpop.xlane.xlu0 %1969 }
 0xa39   :  { %v1977_v50 = vsub.f32 %v1955_v57, %v1970_v45  ;;  %v3083_v45 = vld [vmem:[%s4007_s13 + $0x24] ss:$8 sps:$4 sm:$0xff]  }
 0xa3b   :  { %v1980_v34 = vmul.f32 1.442695, %v1977_v50  ;;  %v3084_v50 = vld [vmem:[%s4007_s13 + $0x20] ss:$8 sps:$4 sm:$0xff]  }
 0xa3c   :  { %v1973_v51 = vpop.xlane.xlu1 %1972 }
 0xa3d   :  { %3036 = vpow2.f32 %v1980_v34  ;;  %v1978_v0 = vsub.f32 %v1960_v36, %v1973_v51 }
 0xa3f   :  { %v1982_v58 = vmul.f32 1.442695, %v1978_v0 }
 0xa40   :  { %v1976_v19 = vpop.xlane.xlu0 %1975  ;;  %v2009_v1 = vpop.permute.xlu1 %2008 }
 0xa41   :  { %3038 = vpow2.f32 %v1982_v58  ;;  %v1979_v3 = vsub.f32 %v1965_v30, %v1976_v19 }
 0xa43   :  { %v1984_v8 = vmul.f32 1.442695, %v1979_v3 }
 0xa45   :  { %3040 = vpow2.f32 %v1984_v8 }
 0xa4a   :  { %v3037_v4 = vpop.eup %3036 }
 0xa4b   :  { %v1986_v2 = vsel %vm549_vm4, %v3037_v4, 0.0 }
 0xa4c   :  { %1987 = vadd.xlane.f32.xlu0 %v1986_v2 }
 0xa4e   :  { %v3039_v41 = vpop.eup %3038 }
 0xa4f   :  { %v1989_v18 = vsel %vm549_vm4, %v3039_v41, 0.0 }
 0xa50   :  { %1990 = vadd.xlane.f32.xlu1 %v1989_v18 }
 0xa52   :  { %v3041_v16 = vpop.eup %3040 }
 0xa53   :  { %v1992_v57 = vsel %vm549_vm4, %v3041_v16, 0.0 }
 0xa54   :  { %1993 = vadd.xlane.f32.xlu0 %v1992_v57 }
 0xa61   :  { %2004 = vrot.lane.b32.xlu1 %v1626_v55, %s3093_s30 }
 0xa67   :  { %v1763_v36 = vpop.xlane.xlu0 %1762 }
 0xa6a   :  { %2006 = vrot.lane.b32.xlu0 %v3843_v33, %s3093_s30 }
 0xa71   :  { %v1760_v7 = vpop.xlane.xlu1 %1759 }
 0xa72   :  { %3042 = vrcp.f32 %v1760_v7 }
 0xa73   :  { %3044 = vrcp.f32 %v1763_v36 }
 0xa75   :  { %v1766_v21 = vpop.xlane.xlu1 %1765 }
 0xa76   :  { %3046 = vrcp.f32 %v1766_v21 }
 0xa7f   :  { %v3043_v29 = vpop.eup %3042 }
 0xa80   :  { %v1770_v30 = vmul.f32 %v3043_v29, %v3033_v49  ;;  %v3045_v35 = vpop.eup %3044 }
 0xa81   :  { %v1771_v55 = vmul.f32 %v3045_v35, %v3031_v43 }
 0xa82   :  { %2873 = vmatmul.mubr.msk.f32.vlgmr.msra.gmra.mxu1 %vm549_vm4, %v1770_v30 }
 0xa83   :  { %2897 = vmatpush3.msra.mxu1 %v2009_v1  ;;  %2875 = vmatprep.mubr.msk.f32.mxu1 %vm3092_vm1, %v4024_v31  ;;  %v3047_v33 = vpop.eup %3046  ;;  %v3088_v1 = vld [vmem:[%s4022_s26 + $0x20] sm:$0xff] }
 0xa84   :  { %2898 = vmatprep.subr.mxu1 %v4024_v31  ;;  %v1772_v23 = vmul.f32 %v3047_v33, %v3035_v56  ;;  %v3082_v56 = vld [vmem:[%s4007_s13 + $0x30] ss:$8 sps:$4 sm:$0xff]  }
 0xa86   :  { %2876 = vmatmul.mubr.msk.f32.gmra.mxu1 %vm549_vm4, %v1771_v55 }
 0xa87   :  { %2878 = vmatprep.mubr.msk.f32.mxu1 %vm3092_vm1, %v4024_v31 }
 0xa8a   :  { %2879 = vmatmul.mubr.msk.f32.gmra.mxu1 %vm549_vm4, %v1772_v23 }
 0xa8b   :  { %2902 = vmatprep.mubr.msk.f32.mxu1 %vm3092_vm1, %v4024_v31 }
 0xad5   :  { %v1988_v37 = vpop.xlane.xlu0 %1987 }
 0xad6   :  { %3048 = vrcp.f32 %v1988_v37 }
 0xad9   :  { %v1991_v38 = vpop.xlane.xlu1 %1990 }
 0xada   :  { %3050 = vrcp.f32 %v1991_v38 }
 0xadd   :  { %v1994_v44 = vpop.xlane.xlu0 %1993  ;;  %v2005_v10 = vpop.permute.xlu1 %2004 }
 0xade   :  { %3052 = vrcp.f32 %v1994_v44 }
 0xae1   :  { %v2007_v48 = vpop.permute.xlu0 %2006 }
 0xae2   :  { %2899 = vmatpush3.msra.mxu1 %v2007_v48 }
 0xae3   :  { %v3049_v53 = vpop.eup %3048  ;;  %2900 = vmatprep.subr.mxu1 %v4024_v31 }
 0xae4   :  { %v1998_v5 = vmul.f32 %v3049_v53, %v3037_v4  ;;  %2901 = vmatpush3.msra.mxu1 %v2005_v10 }
 0xae5   :  { %2675 = vmatprep.subr.bf16.mxu1 %v3591_v22 }
 0xae6   :  { %2903 = vmatmul.mubr.msk.f32.vlgmr.msra.gmra.mxu1 %vm549_vm4, %v1998_v5 }
 0xae7   :  { %v3051_v6 = vpop.eup %3050  ;;  %2905 = vmatprep.mubr.msk.f32.mxu1 %vm3092_vm1, %v4024_v31  ;;  %2676 = vmatpush3.bf16.msra.mxu1 %v3596_v24 }
 0xae8   :  { %v1999_v39 = vmul.f32 %v3051_v6, %v3039_v41  ;;  %2677 = vmatprep.subr.bf16.mxu1 %v3603_v25  ;;  %v3085_v41 = vld [vmem:[%s4022_s26 + $0x18] sm:$0xff] }
 0xaea   :  { %2906 = vmatmul.mubr.msk.f32.gmra.mxu1 %vm549_vm4, %v1999_v39 }
 0xaeb   :  { %v3053_v43 = vpop.eup %3052  ;;  %2908 = vmatprep.mubr.msk.f32.mxu1 %vm3092_vm1, %v4024_v31  ;;  %2678 = vmatpush3.bf16.msra.mxu1 %v3608_v26 }
 0xaec   :  { %v2000_v22 = vmul.f32 %v3053_v43, %v3041_v16  ;;  %2679 = vmatprep.subr.bf16.mxu1 %v3615_v27  ;;  %v3087_v16 = vld [vmem:[%s4022_s26 + $0x28] sm:$0xff] }
 0xaee   :  { %2909 = vmatmul.mubr.msk.f32.gmra.mxu1 %vm549_vm4, %v2000_v22 }
 0xaef   :  { %2680 = vmatpush3.bf16.msra.mxu1 %v3620_v28 }
 0xaf0   :  { %2681 = vmatprep.subr.bf16.mxu1 %v3627_v47 }
 0xaf3   :  { %2682 = vmatpush3.bf16.msra.mxu1 %v3632_v52 }
 0xaf4   :  { %2683 = vmatprep.subr.bf16.mxu1 %v3639_v9 }
 0xaf7   :  { %2684 = vmatpush3.bf16.msra.mxu1 %v3644_v32 }
 0xaf8   :  { %2685 = vmatprep.subr.bf16.mxu1 %v3651_v11 }
 0xafb   :  { %2686 = vmatpush3.bf16.msra.mxu1 %v3656_v12 }
 0xafc   :  { %2687 = vmatprep.subr.bf16.mxu1 %v3663_v13 }
 0xaff   :  { %2688 = vmatpush3.bf16.msra.mxu1 %v3668_v14 }
 0xb00   :  { %2689 = vmatprep.subr.bf16.mxu1 %v3675_v15  ;;  %v3079_v15 = vld [vmem:[%s4005_s9 + $0x8] sm:$0xff]  }
 0xb03   :  { %2690 = vmatpush3.bf16.msra.mxu1 %v3680_v17  ;;  %v3080_v17 = vld [vmem:[%s4005_s9] sm:$0xff]  }
 0xb42   :  { %v1848_v24 = vpop.f32.mrf.mxu1 }
 0xb44   :  { %v2874_v25 = vpop.f32.mrf.mxu1 }
 0xb46   :  { %v1853_v26 = vpop.f32.mrf.mxu1 }
 0xb47   :  { %v1862_v27 = vpack.c.bf16 %v1853_v26, %v1848_v24 }
 0xb48   :  { %v2877_v28 = vpop.f32.mrf.mxu1 }
 0xb4a   :  { %v1858_v47 = vpop.f32.mrf.mxu1 }
 0xb4b   :  { %v1863_v49 = vpack.c.bf16 %v1858_v47, %v1858_v47 }
 0xb4c   :  { %v2880_v52 = vpop.f32.mrf.mxu1 }
 0xba6   :  { %v2088_v9 = vpop.f32.mrf.mxu1 }
 0xba8   :  { %v2904_v32 = vpop.f32.mrf.mxu1 }
 0xbaa   :  { %v2093_v11 = vpop.f32.mrf.mxu1 }
 0xbab   :  { %v2102_v31 = vpack.c.bf16 %v2093_v11, %v2088_v9 }
 0xbac   :  { %v2907_v12 = vpop.f32.mrf.mxu1 }
 0xbad   :  { %2915 = vmatprep.mubr.msk.bf16.mxu0 %vm450_vm2, %v2102_v31 }
 0xbae   :  { %v2098_v13 = vpop.f32.mrf.mxu1 }
 0xbaf   :  { %v2103_v14 = vpack.c.bf16 %v2098_v13, %v2098_v13 }
 0xbb0   :  { %v2910_v54 = vpop.f32.mrf.mxu1 }
 0xbb1   :  { %2916 = vmatmul.mubr.msk.bf16.vlgmr.msra.gmra.mxu0 %vm450_vm2, %v2103_v14  ;;  %v3089_v54 = vld [vmem:[%s4008_s11] ss:$0 sm:$0xff] }
 0xbb2   :  { %2920 = vmatpush3.bf16.msra.mxu0 %v3079_v15  ;;  %2923 = vmatprep.mubr.msk.bf16.mxu0 %vm450_vm2, %v1862_v27 }
 0xbb3   :  { %2921 = vmatprep.subr.bf16.mxu0 %v3080_v17 }
 0xbb6   :  { %2922 = vmatpush3.bf16.msra.mxu0 %v3080_v17 }
 0xbb7   :  { %2279 = vmatprep.subr.bf16.mxu0 %v3081_v46  ;;  %v3090_v46 = vld [vmem:[%s4009_s12] ss:$0 sm:$0xff] }
 0xbb9   :  { %2924 = vmatmul.mubr.msk.bf16.vlgmr.msra.gmra.mxu0 %vm450_vm2, %v1863_v49 }
 0xbba   :  { %2280 = vmatpush1.bf16.msra.mxu0 %v3082_v56  ;;  %2303 = vmatprep.mubr.bf16.mxu0 %v4025_v59 }
 0xbbb   :  { %2281 = vmatprep.subr.bf16.mxu0 %v3083_v45 }
 0xbbe   :  { %2282 = vmatpush1.bf16.msra.mxu0 %v3084_v50 }
 0xbbf   :  { %2283 = vmatprep.subr.bf16.mxu0 %v3514_v60 }
 0xbc2   :  { %2284 = vmatpush1.bf16.msra.mxu0 %v3519_v61  ;;  %v3086_v61 = vld [vmem:[%s4006_s10] ss:$0 sm:$0xff] }
 0xbc3   :  { %2285 = vmatprep.subr.bf16.mxu0 %v3526_v62 }
 0xbc6   :  { %2286 = vmatpush1.bf16.msra.mxu0 %v3531_v63 }
 0xc71   :  { %v2917_v34 = vpop.f32.mrf.mxu0 }
 0xc73   :  { %v2144_v51 = vpop.f32.mrf.mxu0 }
 0xc75   :  { %v2918_v0 = vpop.f32.mrf.mxu0 }
 0xc77   :  { %v2147_v58 = vpop.f32.mrf.mxu0 }
 0xc79   :  { %v2925_v19 = vpop.f32.mrf.mxu0 }
 0xc7a   :  { %v2207_v2 = vadd.f32 %v2925_v19, %v2917_v34 }
 0xc7b   :  { %v2198_v3 = vpop.f32.mrf.mxu0 }
 0xc7c   :  { %v2199_v8 = vadd.f32 %v2198_v3, %v2144_v51  ;;  %v2214_v57 = vadd.f32 %v3087_v16, %v2207_v2 }
 0xc7d   :  { %v2926_v4 = vpop.f32.mrf.mxu0 }
 0xc7e   :  { %v2212_v60 = vadd.f32 %v3085_v41, %v2199_v8  ;;  %v3944_v29 = vadd.f32 %v3086_v61, %v2214_v57 }
 0xc7f   :  { %v2201_v18 = vpop.f32.mrf.mxu0 }
 0xc80   :  { %v3932_v62 = vadd.f32 %v3086_v61, %v2212_v60  ;;  %v2202_v63 = vadd.f32 %v2201_v18, %v2147_v58  ;;  %v2224_v35 = vsel %vm146_vm0, %v3944_v29, 0.0 }
 0xc82   :  { %v2213_v36 = vadd.f32 %v3088_v1, %v2202_v63  ;;  %v2218_v7 = vsel %vm146_vm0, %v3932_v62, 0.0 }
 0xc83   :  { %2219 = vadd.xlane.f32.xlu1 %v2218_v7 }
 0xc84   :  { %v3942_v21 = vadd.f32 %v3086_v61, %v2213_v36 }
 0xc86   :  { %v2221_v30 = vsel %vm146_vm0, %v3942_v21, 0.0 }
 0xc87   :  { %2222 = vadd.xlane.f32.xlu0 %v2221_v30 }
 0xc8b   :  { %2225 = vadd.xlane.f32.xlu0 %v2224_v35 }
 0xd0c   :  { %v2220_v55 = vpop.xlane.xlu1 %2219 }
 0xd0d   :  { %v2227_v33 = vmul.f32 0.015625, %v2220_v55 }
 0xd0f   :  { %v2230_v23 = vsub.f32 %v3932_v62, %v2227_v33 }
 0xd10   :  { %v2223_v37 = vpop.xlane.xlu0 %2222 }
 0xd11   :  { %v2228_v38 = vmul.f32 0.015625, %v2223_v37  ;;  %v2233_v44 = vmul.f32 %v2230_v23, %v2230_v23 }
 0xd13   :  { %v2231_v48 = vsub.f32 %v3942_v21, %v2228_v38  ;;  %v2236_v53 = vsel %vm146_vm0, %v2233_v44, 0.0 }
 0xd14   :  { %v2226_v10 = vpop.xlane.xlu0 %2225  ;;  %2237 = vadd.xlane.f32.xlu1 %v2236_v53 }
 0xd15   :  { %v2229_v5 = vmul.f32 0.015625, %v2226_v10  ;;  %v2234_v6 = vmul.f32 %v2231_v48, %v2231_v48 }
 0xd17   :  { %v2232_v39 = vsub.f32 %v3944_v29, %v2229_v5  ;;  %v2239_v43 = vsel %vm146_vm0, %v2234_v6, 0.0 }
 0xd18   :  { %2240 = vadd.xlane.f32.xlu0 %v2239_v43 }
 0xd19   :  { %v2235_v22 = vmul.f32 %v2232_v39, %v2232_v39 }
 0xd1b   :  { %v2242_v24 = vsel %vm146_vm0, %v2235_v22, 0.0 }
 0xd1c   :  { %2243 = vadd.xlane.f32.xlu1 %v2242_v24 }
 0xd9d   :  { %v2238_v25 = vpop.xlane.xlu1 %2237 }
 0xd9e   :  { %v2245_v26 = vmul.f32 0.015625, %v2238_v25 }
 0xda0   :  { %v2248_v27 = vadd.f32 1e-06, %v2245_v26 }
 0xda1   :  { %v2241_v28 = vpop.xlane.xlu0 %2240 }
 0xda2   :  { %3054 = vrsqrt.f32 %v2248_v27  ;;  %v2246_v47 = vmul.f32 0.015625, %v2241_v28 }
 0xda4   :  { %v2249_v52 = vadd.f32 1e-06, %v2246_v47 }
 0xda5   :  { %v2244_v9 = vpop.xlane.xlu1 %2243 }
 0xda6   :  { %3056 = vrsqrt.f32 %v2249_v52  ;;  %v2247_v32 = vmul.f32 0.015625, %v2244_v9 }
 0xda8   :  { %v2250_v11 = vadd.f32 1e-06, %v2247_v32 }
 0xdaa   :  { %3058 = vrsqrt.f32 %v2250_v11 }
 0xdaf   :  { %v3055_v31 = vpop.eup %3054 }
 0xdb0   :  { %v2254_v12 = vmul.f32 %v3055_v31, %v2230_v23 }
 0xdb2   :  { %v2257_v15 = vmul.f32 %v3089_v54, %v2254_v12 }
 0xdb3   :  { %v3057_v13 = vpop.eup %3056 }
 0xdb4   :  { %v2255_v14 = vmul.f32 %v3057_v13, %v2231_v48  ;;  %v2260_v56 = vadd.f32 %v3090_v46, %v2257_v15 }
 0xdb6   :  { %v2258_v17 = vmul.f32 %v3089_v54, %v2255_v14 }
 0xdb7   :  { %v3059_v49 = vpop.eup %3058 }
 0xdb8   :  { %v2261_v45 = vadd.f32 %v3090_v46, %v2258_v17  ;;  %v2256_v50 = vmul.f32 %v3059_v49, %v2232_v39 }
 0xdba   :  { %v2263_v34 = vpack.c.bf16 %v2261_v45, %v2260_v56  ;;  %v2259_v51 = vmul.f32 %v3089_v54, %v2256_v50 }
 0xdbc   :  { %2545 = vmatmul.mubr.msk.bf16.vlgmr.msra.gmra.mxu0 %vm146_vm0, %v2263_v34  ;;  %v2262_v0 = vadd.f32 %v3090_v46, %v2259_v51 }
 0xdbd   :  { %2313 = vmatprep.mubr.bf16.mxu0 %v4025_v59 }
 0xdbe   :  { %v2264_v58 = vpack.c.bf16 %v2262_v0, %v2262_v0 }
 0xdc4   :  { %2546 = vmatmul.mubr.msk.bf16.gmra.mxu0 %vm146_vm0, %v2264_v58 }
 0xe7c   :  { %v2305_v19 = vpop.f32.mrf.mxu0 }
 0xe7d   :  { %v3966_v3 = vadd.f32 %v2305_v19, %v3694_v40 }
 0xe7e   :  { %v2307_v8 = vpop.f32.mrf.mxu0 }
 0xe7f   :  { %v2322_v4 = vmul.f32 %v3966_v3, %v3966_v3  ;;  %v2308_v2 = vadd.f32 %v2307_v8, %v3696_v42 }
 0xe80   :  { %v2309_v41 = vpop.f32.mrf.mxu0 }
 0xe81   :  { %v2328_v60 = vmul.f32 %v2322_v4, %v3966_v3  ;;  %v2323_v18 = vmul.f32 %v2308_v2, %v2308_v2  ;;  %v2310_v59 = vadd.f32 %v2309_v41, %v3694_v40 }
 0xe82   :  { %v2311_v61 = vpop.f32.mrf.mxu0 }
 0xe83   :  { %v2334_v63 = vmul.f32 0.044715, %v2328_v60  ;;  %v2329_v16 = vmul.f32 %v2323_v18, %v2308_v2  ;;  %v2324_v57 = vmul.f32 %v2310_v59, %v2310_v59  ;;  %v2312_v1 = vadd.f32 %v2311_v61, %v3696_v42 }
 0xe84   :  { %v2315_v36 = vpop.f32.mrf.mxu0 }
 0xe85   :  { %v2340_v7 = vadd.f32 %v2334_v63, %v3966_v3  ;;  %v2335_v30 = vmul.f32 0.044715, %v2329_v16  ;;  %v2330_v35 = vmul.f32 %v2324_v57, %v2310_v59  ;;  %v2325_v55 = vmul.f32 %v2312_v1, %v2312_v1 }
 0xe86   :  { %v2316_v33 = vadd.f32 %v2315_v36, %v3694_v40  ;;  %v2317_v23 = vpop.f32.mrf.mxu0 }
 0xe87   :  { %v2346_v37 = vmul.f32 0.7978846, %v2340_v7  ;;  %v2341_v38 = vadd.f32 %v2335_v30, %v2308_v2  ;;  %v2336_v44 = vmul.f32 0.044715, %v2330_v35  ;;  %v2331_v48 = vmul.f32 %v2325_v55, %v2312_v1 }
 0xe88   :  { %v2326_v53 = vmul.f32 %v2316_v33, %v2316_v33  ;;  %v2318_v10 = vadd.f32 %v2317_v23, %v3696_v42  ;;  %v2319_v5 = vpop.f32.mrf.mxu0 }
 0xe89   :  { %v2347_v6 = vmul.f32 0.7978846, %v2341_v38  ;;  %v2342_v39 = vadd.f32 %v2336_v44, %v2310_v59  ;;  %v2337_v43 = vmul.f32 0.044715, %v2331_v48  ;;  %3060 = vtanh.f32 %v2346_v37 }
 0xe8a   :  { %v2332_v22 = vmul.f32 %v2326_v53, %v2316_v33  ;;  %v2327_v24 = vmul.f32 %v2318_v10, %v2318_v10  ;;  %v2320_v25 = vpop.f32.mrf.mxu0 }
 0xe8b   :  { %3062 = vtanh.f32 %v2347_v6  ;;  %v2348_v26 = vmul.f32 0.7978846, %v2342_v39  ;;  %v2343_v27 = vadd.f32 %v2337_v43, %v2312_v1 }
 0xe8c   :  { %v2338_v40 = vmul.f32 0.044715, %v2332_v22  ;;  %v2333_v28 = vmul.f32 %v2327_v24, %v2318_v10 }
 0xe8d   :  { %3064 = vtanh.f32 %v2348_v26  ;;  %v2349_v47 = vmul.f32 0.7978846, %v2343_v27 }
 0xe8e   :  { %v2344_v52 = vadd.f32 %v2338_v40, %v2316_v33  ;;  %v2339_v9 = vmul.f32 0.044715, %v2333_v28 }
 0xe8f   :  { %3066 = vtanh.f32 %v2349_v47 }
 0xe90   :  { %v2350_v32 = vmul.f32 0.7978846, %v2344_v52  ;;  %v2345_v42 = vadd.f32 %v2339_v9, %v2318_v10 }
 0xe92   :  { %3068 = vtanh.f32 %v2350_v32  ;;  %v2351_v11 = vmul.f32 0.7978846, %v2345_v42 }
 0xe94   :  { %3070 = vtanh.f32 %v2351_v11 }
 0xe96   :  { %v3061_v31 = vpop.eup %3060 }
 0xe97   :  { %v2358_v54 = vadd.f32 1.0, %v3061_v31 }
 0xe98   :  { %v3063_v12 = vpop.eup %3062 }
 0xe99   :  { %v2359_v13 = vadd.f32 1.0, %v3063_v12  ;;  %v2364_v45 = vmul.f32 0.5, %v2358_v54 }
 0xe9a   :  { %v3065_v14 = vpop.eup %3064 }
 0xe9b   :  { %v2360_v15 = vadd.f32 1.0, %v3065_v14  ;;  %v2365_v56 = vmul.f32 0.5, %v2359_v13  ;;  %v2370_v4 = vmul.f32 %v2364_v45, %v3966_v3 }
 0xe9c   :  { %v3067_v17 = vpop.eup %3066 }
 0xe9d   :  { %v2366_v49 = vmul.f32 0.5, %v2360_v15  ;;  %v2361_v46 = vadd.f32 1.0, %v3067_v17  ;;  %v2371_v19 = vmul.f32 %v2365_v56, %v2308_v2 }
 0xe9f   :  { %v3069_v50 = vpop.eup %3068  ;;  %v2367_v34 = vmul.f32 0.5, %v2361_v46  ;;  %v2372_v51 = vmul.f32 %v2366_v49, %v2310_v59 }
 0xea0   :  { %v2362_v0 = vadd.f32 1.0, %v3069_v50 }
 0xea1   :  { %v3071_v58 = vpop.eup %3070  ;;  %v2373_v8 = vmul.f32 %v2367_v34, %v2312_v1  ;;  %v2376_v18 = vpack.c.bf16 %v2372_v51, %v2370_v4 }
 0xea2   :  { %v2363_v41 = vadd.f32 1.0, %v3071_v58  ;;  %v2368_v63 = vmul.f32 0.5, %v2362_v0 }
 0xea3   :  { %v2377_v60 = vpack.c.bf16 %v2373_v8, %v2371_v19 }
 0xea4   :  { %v2369_v61 = vmul.f32 0.5, %v2363_v41  ;;  %v2374_v36 = vmul.f32 %v2368_v63, %v2316_v33 }
 0xea5   :  { %2412 = vmatprep.mubr.bf16.mxu1 %v2377_v60 }
 0xea6   :  { %2413 = vmatmul.mubr.bf16.vlgmr.msra.gmra.mxu1 %v2376_v18  ;;  %v2375_v16 = vmul.f32 %v2369_v61, %v2318_v10  ;;  %v2378_v7 = vpack.c.bf16 %v2374_v36, %v2374_v36 }
 0xea8   :  { %v2379_v57 = vpack.c.bf16 %v2375_v16, %v2375_v16 }
 0xeaa   :  { %2420 = vmatprep.mubr.bf16.mxu1 %v2379_v57 }
 0xeae   :  { %2421 = vmatmul.mubr.bf16.gmra.mxu1 %v2378_v7 }
 0xf66   :  { %v2691_v59 = vpop.f32.mrf.mxu1 }
 0xf68   :  { %v2692_v30 = vpop.f32.mrf.mxu1 }
 0xf69   :  { %v2693_v35 = vadd.f32 %v2692_v30, %v2691_v59 }
 0xf6a   :  { %v2694_v2 = vpop.f32.mrf.mxu1 }
 0xf6b   :  { %v2415_v1 = vadd.f32 %v2693_v35, %v3810_v20 }
 0xf6c   :  { %v2695_v3 = vpop.f32.mrf.mxu1 }
 0xf6d   :  { %v2428_v55 = vadd.f32 %v2415_v1, %v3932_v62  ;;  %v2696_v23 = vadd.f32 %v2695_v3, %v2694_v2 }
 0xf6e   :  { %v2697_v37 = vpop.f32.mrf.mxu1 }
 0xf6f   :  { %2431 = vst.msk [vmem:[%s4013_s17 + $0x18] sm:$0xff] %vm146_vm0, %v2428_v55  ;;  %v2418_v33 = vadd.f32 %v2696_v23, %v3810_v20 }
 0xf70   :  { %v2698_v38 = vpop.f32.mrf.mxu1 }
 0xf71   :  { %v2429_v44 = vadd.f32 %v2418_v33, %v3942_v21  ;;  %v2699_v48 = vadd.f32 %v2698_v38, %v2697_v37 }
 0xf72   :  { %v2700_v53 = vpop.f32.mrf.mxu1 }
 0xf73   :  { %2432 = vst.msk [vmem:[%s4013_s17 + $0x20] sm:$0xff] %vm146_vm0, %v2429_v44  ;;  %v2423_v62 = vadd.f32 %v2699_v48, %v3810_v20 }
 0xf74   :  { %v2701_v10 = vpop.f32.mrf.mxu1 }
 0xf75   :  { %v2430_v5 = vadd.f32 %v2423_v62, %v3944_v29 }
 0xf77   :  { %2433 = vst.msk [vmem:[%s4013_s17 + $0x28] sm:$0xff] %vm146_vm0, %v2430_v5 }

</bundles_post_ra>
